<compile_context>
chip_gen: v7x
topology: tpu7x:2x2x1
jax: 0.10.0
libtpu: 0.0.40
codegen_flags: <defaults>
</compile_context>

<pallas_src>
import jax
import jax.numpy as jnp
from jax.experimental import pallas as pl
from jax.experimental.pallas import tpu as pltpu

HIDDEN = 128
LATENT = 32
DENSE2 = 64


def _round_up(n, m):
    return ((n + m - 1) // m) * m


def _make_kernel(seq_len, block_t, n_grid, b_pad, unroll=8):
    """Kernel factory closing over static sequence / tiling parameters."""
    H = HIDDEN
    rem = seq_len - (n_grid - 1) * block_t       # valid steps in the final block

    def kernel(x_ref,                    # (block_t*b_pad, C+1) time slab (+ones col)
               w_ih0_ref,                # (C+1, 4H) input proj, bias folded in
               w_step_ref,               # (2H, 8H) bf16 fused step weight
               b1_ref,                   # (1, 4H)
               w_d1_ref, b_d1_ref,       # (H, H), (1, H)
               w_d2_ref, b_d2_ref,       # (H, 64), (1, 64)
               w_head_ref, b_head_ref,   # (64, 2L), (1, 2L)  merged mu|logvar
               out_ref,                  # (b_pad, 2L)
               h0_ref, c0_ref, h1_ref, c1_ref,   # (b_pad, H) state across blocks
               rec0_ref,                 # (b_pad, 4H) h0 @ W_hh0 carry
               g0_ref):                  # (block_t*b_pad, 4H) staged input proj
        t_blk = pl.program_id(0)

        @pl.when(t_blk == 0)
        def _init():
            z = jnp.zeros((b_pad, H), jnp.float32)
            h0_ref[...] = z
            c0_ref[...] = z
            h1_ref[...] = z
            c1_ref[...] = z
            rec0_ref[...] = jnp.zeros((b_pad, 4 * H), jnp.float32)

        # One batched MXU push per block for the whole layer-0 input projection
        # (bias included via the ones column) -- off the serial critical path.
        g0_ref[...] = jnp.dot(x_ref[...], w_ih0_ref[...],
                              preferred_element_type=jnp.float32)

        w_step = w_step_ref[...]
        # Hoisted bias broadcast (JAX does not CSE broadcast_in_dim).
        b1b = jnp.broadcast_to(b1_ref[...], (b_pad, 4 * H))

        def lstm_block(n_steps):
            """Run n_steps (static) of the 2-layer recurrence from/to scratch."""
            def step(t, carry):
                h0, c0, h1, c1, rec0 = carry
                row = pl.multiple_of(t * b_pad, b_pad)
                # Layer 0: staged input proj + carried recurrent term.
                # Gate order after pack-time reorder: (i, f, o, g).
                g0 = g0_ref[pl.ds(row, b_pad), :] + rec0
                s0 = jax.nn.sigmoid(g0[:, :3 * H])
                gg0 = jnp.tanh(g0[:, 3 * H:])
                c0n = s0[:, H:2 * H] * c0 + s0[:, :H] * gg0
                h0n = s0[:, 2 * H:] * jnp.tanh(c0n)

                # nn.LSTM(dropout=0.2) is inter-layer, training-only -> no-op.

                # Single fused per-step matmul (wavefront):
                #   [h0(t) | h1(t-1)] @ [[W_ih1, W_hh0], [W_hh1, 0]]
                #   [:4H]  -> layer-1 gates (pre-bias) for step t
                #   [4H:]  -> layer-0 recurrent term for step t+1
                lhs = jnp.concatenate([h0n, h1], axis=-1).astype(w_step.dtype)
                big = jnp.dot(lhs, w_step, preferred_element_type=jnp.float32)
                g1 = big[:, :4 * H] + b1b
                rec0n = big[:, 4 * H:]

                s1 = jax.nn.sigmoid(g1[:, :3 * H])
                gg1 = jnp.tanh(g1[:, 3 * H:])
                c1n = s1[:, H:2 * H] * c1 + s1[:, :H] * gg1
                h1n = s1[:, 2 * H:] * jnp.tanh(c1n)
                return h0n, c0n, h1n, c1n, rec0n

            carry = (h0_ref[...], c0_ref[...], h1_ref[...], c1_ref[...],
                     rec0_ref[...])
            h0, c0, h1, c1, rec0 = jax.lax.fori_loop(
                0, n_steps, step, carry, unroll=min(unroll, n_steps))
            h0_ref[...] = h0
            c0_ref[...] = c0
            h1_ref[...] = h1
            c1_ref[...] = c1
            rec0_ref[...] = rec0

        if rem == block_t:
            # Sequence length is a multiple of the time block: no tail handling.
            lstm_block(block_t)
        else:
            # Only the last block is short; run exactly its valid steps there
            # (static trip count) -- no per-step padding masks anywhere.
            @pl.when(t_blk < n_grid - 1)
            def _full():
                lstm_block(block_t)

            @pl.when(t_blk == n_grid - 1)
            def _tail():
                lstm_block(rem)

        # Epilogue: dense stack + merged mu/logvar head at the final block.
        @pl.when(t_blk == n_grid - 1)
        def _epilogue():
            h = jnp.maximum(
                jnp.dot(h1_ref[...], w_d1_ref[...],
                        preferred_element_type=jnp.float32) + b_d1_ref[...], 0.0)
            h = jnp.maximum(
                jnp.dot(h, w_d2_ref[...],
                        preferred_element_type=jnp.float32) + b_d2_ref[...], 0.0)
            out_ref[...] = (
                jnp.dot(h, w_head_ref[...], preferred_element_type=jnp.float32)
                + b_head_ref[...])

    return kernel


def init_params(key, input_size, latent_dim=LATENT):
    """Deterministic synthetic parameters in the PyTorch nn.Module layout."""
    combined = input_size + 2
    H = HIDDEN
    keys = list(jax.random.split(key, 16))

    def u(shape, fan_in):
        bound = 1.0 / (fan_in ** 0.5)
        return jax.random.uniform(keys.pop(), shape, jnp.float32, -bound, bound)

    return dict(
        w_ih_l0=u((4 * H, combined), H), w_hh_l0=u((4 * H, H), H),
        b_ih_l0=u((4 * H,), H), b_hh_l0=u((4 * H,), H),
        w_ih_l1=u((4 * H, H), H), w_hh_l1=u((4 * H, H), H),
        b_ih_l1=u((4 * H,), H), b_hh_l1=u((4 * H,), H),
        w_dense1=u((H, H), H), b_dense1=u((H,), H),
        w_dense2=u((DENSE2, H), H), b_dense2=u((DENSE2,), H),
        w_mu=u((latent_dim, DENSE2), DENSE2), b_mu=u((latent_dim,), DENSE2),
        w_lv=u((latent_dim, DENSE2), DENSE2), b_lv=u((latent_dim,), DENSE2),
    )


def _reorder_gates(w):
    """Permute the gate (last) dim from PyTorch (i, f, g, o) to (i, f, o, g)."""
    H = HIDDEN
    return jnp.concatenate([w[..., :2 * H], w[..., 3 * H:], w[..., 2 * H:3 * H]],
                           axis=-1)


def pack_params(p):
    """PyTorch layout -> kernel layout.

    Transpose to (in, out); reorder gates to (i,f,o,g); fold the layer-0 bias
    into the input-projection weight (ones column in x); build the fused
    wavefront step weight [[W_ih1, W_hh0], [W_hh1, 0]] in bf16; merge mu/logvar.
    """
    H = HIDDEN
    w_ih0 = _reorder_gates(p["w_ih_l0"].T)                          # (C, 4H)
    b0 = _reorder_gates((p["b_ih_l0"] + p["b_hh_l0"])[None, :])     # (1, 4H)
    w_ih0_aug = jnp.concatenate([w_ih0, b0], axis=0)                # (C+1, 4H)

    w_hh0 = _reorder_gates(p["w_hh_l0"].T)                          # (H, 4H)
    w_ih1 = _reorder_gates(p["w_ih_l1"].T)                          # (H, 4H)
    w_hh1 = _reorder_gates(p["w_hh_l1"].T)                          # (H, 4H)
    top = jnp.concatenate([w_ih1, w_hh0], axis=1)                   # (H, 8H)
    bot = jnp.concatenate([w_hh1, jnp.zeros((H, 4 * H), jnp.float32)], axis=1)
    w_step = jnp.concatenate([top, bot], axis=0).astype(jnp.bfloat16)  # (2H, 8H)

    b1 = _reorder_gates((p["b_ih_l1"] + p["b_hh_l1"])[None, :])     # (1, 4H)

    w_d1 = p["w_dense1"].T
    b_d1 = p["b_dense1"][None, :]
    w_d2 = p["w_dense2"].T
    b_d2 = p["b_dense2"][None, :]
    w_head = jnp.concatenate([p["w_mu"].T, p["w_lv"].T], axis=1)    # (64, 2L)
    b_head = jnp.concatenate([p["b_mu"], p["b_lv"]])[None, :]       # (1, 2L)
    return (w_ih0_aug, w_step, b1, w_d1, b_d1, w_d2, b_d2, w_head, b_head)


def replay_encoder(beatmap_features, positions, packed_params, *, block_t=128):
    """Pallas forward pass of ReplayEncoder (inference).

    beatmap_features: (B, T, input_size), positions: (B, T, 2).
    Returns (mu, logvar), each (B, latent_dim).
    """
    H = HIDDEN
    x = jnp.concatenate([beatmap_features, positions], axis=-1).astype(jnp.float32)
    B, T, C = x.shape

    b_pad = _round_up(max(B, 1), 8)                       # sublane-align the batch
    bt = _round_up(max(8, min(block_t, _round_up(T, 8))), 8)
    T_pad = _round_up(T, bt)
    n_grid = T_pad // bt

    # Time-major; append a ones column so the layer-0 bias rides in the
    # projection matmul; pad batch to a sublane multiple and time to a block
    # multiple (the padded tail is skipped inside the kernel, never masked).
    x = jnp.transpose(x, (1, 0, 2))                                   # (T, B, C)
    x = jnp.pad(x, ((0, T_pad - T), (0, b_pad - B), (0, 0)))
    x = jnp.concatenate([x, jnp.ones((T_pad, b_pad, 1), jnp.float32)], axis=-1)
    x2d = x.reshape(T_pad * b_pad, C + 1)                 # lane-dense row layout

    (w_ih0, w_step, b1, w_d1, b_d1, w_d2, b_d2, w_head, b_head) = packed_params
    L2 = w_head.shape[1]                                  # 2 * latent_dim

    const = lambda t: (0, 0)                              # weights stay resident
    grid_spec = pltpu.PrefetchScalarGridSpec(
        num_scalar_prefetch=0,
        grid=(n_grid,),
        in_specs=[
            pl.BlockSpec((bt * b_pad, C + 1), lambda t: (t, 0)),   # x time slab
            pl.BlockSpec(w_ih0.shape, const),
            pl.BlockSpec(w_step.shape, const),
            pl.BlockSpec(b1.shape, const),
            pl.BlockSpec(w_d1.shape, const),
            pl.BlockSpec(b_d1.shape, const),
            pl.BlockSpec(w_d2.shape, const),
            pl.BlockSpec(b_d2.shape, const),
            pl.BlockSpec(w_head.shape, const),
            pl.BlockSpec(b_head.shape, const),
        ],
        out_specs=pl.BlockSpec((b_pad, L2), const),
        scratch_shapes=[
            pltpu.VMEM((b_pad, H), jnp.float32),            # h0
            pltpu.VMEM((b_pad, H), jnp.float32),            # c0
            pltpu.VMEM((b_pad, H), jnp.float32),            # h1
            pltpu.VMEM((b_pad, H), jnp.float32),            # c1
            pltpu.VMEM((b_pad, 4 * H), jnp.float32),        # h0 @ W_hh0 carry
            pltpu.VMEM((bt * b_pad, 4 * H), jnp.float32),   # staged input proj
        ],
    )

    out = pl.pallas_call(
        _make_kernel(seq_len=T, block_t=bt, n_grid=n_grid, b_pad=b_pad),
        out_shape=jax.ShapeDtypeStruct((b_pad, L2), jnp.float32),
        grid_spec=grid_spec,
        compiler_params=pltpu.CompilerParams(
            dimension_semantics=("arbitrary",),             # serial time recurrence
        ),
    )(x2d, *packed_params)

    L = L2 // 2
    return out[:B, :L], out[:B, L:]


def replay_encoder_ref(beatmap_features, positions, torch_params):
    """Pure-JAX reference in the original PyTorch layout (f32, HIGHEST precision)."""
    p = torch_params
    H = HIDDEN
    hp = jax.lax.Precision.HIGHEST
    x = jnp.concatenate([beatmap_features, positions], axis=-1).astype(jnp.float32)
    B, T, _ = x.shape

    def cell(c, gates):
        i = jax.nn.sigmoid(gates[:, 0 * H:1 * H])
        f = jax.nn.sigmoid(gates[:, 1 * H:2 * H])
        g = jnp.tanh(gates[:, 2 * H:3 * H])
        o = jax.nn.sigmoid(gates[:, 3 * H:4 * H])
        c = f * c + i * g
        return o * jnp.tanh(c), c

    h0 = c0 = h1 = c1 = jnp.zeros((B, H), jnp.float32)
    for t in range(T):
        xt = x[:, t, :]
        g0 = (jnp.dot(xt, p["w_ih_l0"].T, precision=hp)
              + jnp.dot(h0, p["w_hh_l0"].T, precision=hp)
              + p["b_ih_l0"] + p["b_hh_l0"])
        h0, c0 = cell(c0, g0)
        g1 = (jnp.dot(h0, p["w_ih_l1"].T, precision=hp)
              + jnp.dot(h1, p["w_hh_l1"].T, precision=hp)
              + p["b_ih_l1"] + p["b_hh_l1"])
        h1, c1 = cell(c1, g1)
    h = jax.nn.relu(jnp.dot(h1, p["w_dense1"].T, precision=hp) + p["b_dense1"])
    h = jax.nn.relu(jnp.dot(h, p["w_dense2"].T, precision=hp) + p["b_dense2"])
    mu = jnp.dot(h, p["w_mu"].T, precision=hp) + p["b_mu"]
    logvar = jnp.dot(h, p["w_lv"].T, precision=hp) + p["b_lv"]
    return mu, logvar


if __name__ == "__main__":
    key = jax.random.PRNGKey(0)
    k_params, k_data = jax.random.split(key)

    batch, input_size = 2, 4
    torch_params = init_params(k_params, input_size)
    params = pack_params(torch_params)

    # Case 1: short sequence, single grid block (no-padding static path).
    # Case 2: multiple grid blocks with a partial final block (exercises the
    #         cross-block state carry and the static tail handling).
    for seq, bt in ((8, 128), (45, 16)):
        kf, kp = jax.random.split(jax.random.fold_in(k_data, seq))
        beatmap_features = jax.random.normal(kf, (batch, seq, input_size), jnp.float32)
        positions = jax.random.normal(kp, (batch, seq, 2), jnp.float32)

        mu, logvar = replay_encoder(beatmap_features, positions, params, block_t=bt)
        jax.block_until_ready((mu, logvar))

        assert mu.shape == (batch, LATENT) and logvar.shape == (batch, LATENT)
        assert bool(jnp.all(jnp.isfinite(mu))) and bool(jnp.all(jnp.isfinite(logvar)))

        mu_ref, logvar_ref = replay_encoder_ref(beatmap_features, positions,
                                                torch_params)
        assert bool(jnp.allclose(mu, mu_ref, atol=2e-2, rtol=2e-2)), (seq, bt)
        assert bool(jnp.allclose(logvar, logvar_ref, atol=2e-2, rtol=2e-2)), (seq, bt)

    print("KERNEL_OK")
</pallas_src>

<mosaic_0001>
module attributes {stable_mosaic.version = 11 : i64} {
  func.func @kernel(%arg0: i32, %arg1: memref<64x7xf32, #tpu.memory_space<vmem>>, %arg2: memref<7x512xf32, #tpu.memory_space<vmem>>, %arg3: memref<256x1024xbf16, #tpu.memory_space<vmem>>, %arg4: memref<1x512xf32, #tpu.memory_space<vmem>>, %arg5: memref<128x128xf32, #tpu.memory_space<vmem>>, %arg6: memref<1x128xf32, #tpu.memory_space<vmem>>, %arg7: memref<128x64xf32, #tpu.memory_space<vmem>>, %arg8: memref<1x64xf32, #tpu.memory_space<vmem>>, %arg9: memref<64x64xf32, #tpu.memory_space<vmem>>, %arg10: memref<1x64xf32, #tpu.memory_space<vmem>>, %arg11: memref<8x64xf32, #tpu.memory_space<vmem>>, %arg12: memref<8x128xf32, #tpu.memory_space<vmem>>, %arg13: memref<8x128xf32, #tpu.memory_space<vmem>>, %arg14: memref<8x128xf32, #tpu.memory_space<vmem>>, %arg15: memref<8x128xf32, #tpu.memory_space<vmem>>, %arg16: memref<8x512xf32, #tpu.memory_space<vmem>>, %arg17: memref<64x512xf32, #tpu.memory_space<vmem>>) attributes {dimension_semantics = [#tpu.dimension_semantics<arbitrary>], iteration_bounds = array<i64: 1>, scalar_prefetch = 0 : i64, scratch_operands = 6 : i64, tpu.core_type = #tpu.core_type<tc>, window_params = [{transform_indices = @transform_0, window_bounds = array<i64: 64, 7>}, {pipeline_mode = #tpu.pipeline_mode<synchronous>, transform_indices = @transform_1, window_bounds = array<i64: 7, 512>}, {pipeline_mode = #tpu.pipeline_mode<synchronous>, transform_indices = @transform_2, window_bounds = array<i64: 256, 1024>}, {pipeline_mode = #tpu.pipeline_mode<synchronous>, transform_indices = @transform_3, window_bounds = array<i64: 1, 512>}, {pipeline_mode = #tpu.pipeline_mode<synchronous>, transform_indices = @transform_4, window_bounds = array<i64: 128, 128>}, {pipeline_mode = #tpu.pipeline_mode<synchronous>, transform_indices = @transform_5, window_bounds = array<i64: 1, 128>}, {pipeline_mode = #tpu.pipeline_mode<synchronous>, transform_indices = @transform_6, window_bounds = array<i64: 128, 64>}, {pipeline_mode = #tpu.pipeline_mode<synchronous>, transform_indices = @transform_7, window_bounds = array<i64: 1, 64>}, {pipeline_mode = #tpu.pipeline_mode<synchronous>, transform_indices = @transform_8, window_bounds = array<i64: 64, 64>}, {pipeline_mode = #tpu.pipeline_mode<synchronous>, transform_indices = @transform_9, window_bounds = array<i64: 1, 64>}, {pipeline_mode = #tpu.pipeline_mode<synchronous>, transform_indices = @transform_10, window_bounds = array<i64: 8, 64>}]} {
    %c0_i32 = arith.constant 0 : i32
    %0 = arith.cmpi eq, %arg0, %c0_i32 : i32
    %1 = arith.extui %0 : i1 to i32
    %c0_i32_0 = arith.constant 0 : i32
    %2 = arith.cmpi ne, %1, %c0_i32_0 : i32
    scf.if %2 {
      %cst_73 = arith.constant 0.000000e+00 : f32
      %368 = vector.broadcast %cst_73 : f32 to vector<8x128xf32>
      %c0_74 = arith.constant 0 : index
      %c0_75 = arith.constant 0 : index
      %369 = vector.load %arg12[%c0_74, %c0_75] : memref<8x128xf32, #tpu.memory_space<vmem>>, vector<8x128xf32>
      tpu.vector_store %arg12[%c0_74, %c0_75], %368 {strides = array<i32>} : memref<8x128xf32, #tpu.memory_space<vmem>>, vector<8x128xf32>,
      %c0_76 = arith.constant 0 : index
      %c0_77 = arith.constant 0 : index
      %370 = vector.load %arg13[%c0_76, %c0_77] : memref<8x128xf32, #tpu.memory_space<vmem>>, vector<8x128xf32>
      tpu.vector_store %arg13[%c0_76, %c0_77], %368 {strides = array<i32>} : memref<8x128xf32, #tpu.memory_space<vmem>>, vector<8x128xf32>,
      %c0_78 = arith.constant 0 : index
      %c0_79 = arith.constant 0 : index
      %371 = vector.load %arg14[%c0_78, %c0_79] : memref<8x128xf32, #tpu.memory_space<vmem>>, vector<8x128xf32>
      tpu.vector_store %arg14[%c0_78, %c0_79], %368 {strides = array<i32>} : memref<8x128xf32, #tpu.memory_space<vmem>>, vector<8x128xf32>,
      %c0_80 = arith.constant 0 : index
      %c0_81 = arith.constant 0 : index
      %372 = vector.load %arg15[%c0_80, %c0_81] : memref<8x128xf32, #tpu.memory_space<vmem>>, vector<8x128xf32>
      tpu.vector_store %arg15[%c0_80, %c0_81], %368 {strides = array<i32>} : memref<8x128xf32, #tpu.memory_space<vmem>>, vector<8x128xf32>,
      %cst_82 = arith.constant 0.000000e+00 : f32
      %373 = vector.broadcast %cst_82 : f32 to vector<8x512xf32>
      %c0_83 = arith.constant 0 : index
      %c0_84 = arith.constant 0 : index
      %374 = vector.load %arg16[%c0_83, %c0_84] : memref<8x512xf32, #tpu.memory_space<vmem>>, vector<8x512xf32>
      tpu.vector_store %arg16[%c0_83, %c0_84], %373 {strides = array<i32>} : memref<8x512xf32, #tpu.memory_space<vmem>>, vector<8x512xf32>,
    } else {
    }
    %c0 = arith.constant 0 : index
    %c0_1 = arith.constant 0 : index
    %3 = vector.load %arg1[%c0, %c0_1] : memref<64x7xf32, #tpu.memory_space<vmem>>, vector<64x7xf32>
    %c0_2 = arith.constant 0 : index
    %c0_3 = arith.constant 0 : index
    %4 = vector.load %arg2[%c0_2, %c0_3] : memref<7x512xf32, #tpu.memory_space<vmem>>, vector<7x512xf32>
    %cst = arith.constant dense<0.000000e+00> : vector<64x512xf32>
    %5 = tpu.matmul %3, %4, %cst {dimension_numbers = #tpu.dot_dimension_numbers<[1], [0], [0], [1], [0, 0, 1, 1], [], []>} : vector<64x7xf32>, vector<7x512xf32>, vector<64x512xf32> -> vector<64x512xf32>
    %c0_4 = arith.constant 0 : index
    %c0_5 = arith.constant 0 : index
    %6 = vector.load %arg17[%c0_4, %c0_5] : memref<64x512xf32, #tpu.memory_space<vmem>>, vector<64x512xf32>
    tpu.vector_store %arg17[%c0_4, %c0_5], %5 {strides = array<i32>} : memref<64x512xf32, #tpu.memory_space<vmem>>, vector<64x512xf32>,
    %c0_6 = arith.constant 0 : index
    %c0_7 = arith.constant 0 : index
    %7 = vector.load %arg3[%c0_6, %c0_7] : memref<256x1024xbf16, #tpu.memory_space<vmem>>, vector<256x1024xbf16>
    %c0_8 = arith.constant 0 : index
    %c0_9 = arith.constant 0 : index
    %8 = vector.load %arg4[%c0_8, %c0_9] : memref<1x512xf32, #tpu.memory_space<vmem>>, vector<1x512xf32>
    %9 = vector.shape_cast %8 : vector<1x512xf32> to vector<1x512xf32>
    %10 = vector.broadcast %9 : vector<1x512xf32> to vector<8x512xf32>
    %c0_10 = arith.constant 0 : index
    %c0_11 = arith.constant 0 : index
    %11 = vector.load %arg12[%c0_10, %c0_11] : memref<8x128xf32, #tpu.memory_space<vmem>>, vector<8x128xf32>
    %c0_12 = arith.constant 0 : index
    %c0_13 = arith.constant 0 : index
    %12 = vector.load %arg13[%c0_12, %c0_13] : memref<8x128xf32, #tpu.memory_space<vmem>>, vector<8x128xf32>
    %c0_14 = arith.constant 0 : index
    %c0_15 = arith.constant 0 : index
    %13 = vector.load %arg14[%c0_14, %c0_15] : memref<8x128xf32, #tpu.memory_space<vmem>>, vector<8x128xf32>
    %c0_16 = arith.constant 0 : index
    %c0_17 = arith.constant 0 : index
    %14 = vector.load %arg15[%c0_16, %c0_17] : memref<8x128xf32, #tpu.memory_space<vmem>>, vector<8x128xf32>
    %c0_18 = arith.constant 0 : index
    %c0_19 = arith.constant 0 : index
    %15 = vector.load %arg16[%c0_18, %c0_19] : memref<8x512xf32, #tpu.memory_space<vmem>>, vector<8x512xf32>
    %c0_i32_20 = arith.constant 0 : i32
    %c8_i32 = arith.constant 8 : i32
    %16 = arith.muli %c0_i32_20, %c8_i32 : i32
    %17 = tpu.assume_multiple %16, 8 : i32
    %18 = arith.index_cast %17 : i32 to index
    %c0_21 = arith.constant 0 : index
    %19 = vector.load %arg17[%18, %c0_21] : memref<64x512xf32, #tpu.memory_space<vmem>>, vector<8x512xf32>
    %20 = arith.addf %19, %15 : vector<8x512xf32>
    %21 = vector.extract_strided_slice %20 {offsets = [0, 0], sizes = [8, 384], strides = [1, 1]} : vector<8x512xf32> to vector<8x384xf32>
    %22 = arith.negf %21 : vector<8x384xf32>
    %23 = math.exp %22 : vector<8x384xf32>
    %cst_22 = arith.constant 1.000000e+00 : f32
    %24 = vector.broadcast %cst_22 : f32 to vector<8x384xf32>
    %25 = arith.addf %24, %23 : vector<8x384xf32>
    %26 = arith.divf %24, %25 : vector<8x384xf32>
    %27 = vector.extract_strided_slice %20 {offsets = [0, 384], sizes = [8, 128], strides = [1, 1]} : vector<8x512xf32> to vector<8x128xf32>
    %28 = math.tanh %27 : vector<8x128xf32>
    %29 = vector.extract_strided_slice %26 {offsets = [0, 128], sizes = [8, 128], strides = [1, 1]} : vector<8x384xf32> to vector<8x128xf32>
    %30 = arith.mulf %29, %12 : vector<8x128xf32>
    %31 = vector.extract_strided_slice %26 {offsets = [0, 0], sizes = [8, 128], strides = [1, 1]} : vector<8x384xf32> to vector<8x128xf32>
    %32 = arith.mulf %31, %28 : vector<8x128xf32>
    %33 = arith.addf %30, %32 : vector<8x128xf32>
    %34 = vector.extract_strided_slice %26 {offsets = [0, 256], sizes = [8, 128], strides = [1, 1]} : vector<8x384xf32> to vector<8x128xf32>
    %35 = math.tanh %33 : vector<8x128xf32>
    %36 = arith.mulf %34, %35 : vector<8x128xf32>
    %37 = tpu.concatenate %36, %13 in 1 : vector<8x128xf32>, vector<8x128xf32> -> vector<8x256xf32>
    %38 = arith.truncf %37 : vector<8x256xf32> to vector<8x256xbf16>
    %cst_23 = arith.constant dense<0.000000e+00> : vector<8x1024xf32>
    %39 = tpu.matmul %38, %7, %cst_23 {dimension_numbers = #tpu.dot_dimension_numbers<[1], [0], [0], [1], [0, 0, 1, 1], [], []>} : vector<8x256xbf16>, vector<256x1024xbf16>, vector<8x1024xf32> -> vector<8x1024xf32>
    %40 = vector.extract_strided_slice %39 {offsets = [0, 0], sizes = [8, 512], strides = [1, 1]} : vector<8x1024xf32> to vector<8x512xf32>
    %41 = arith.addf %40, %10 : vector<8x512xf32>
    %42 = vector.extract_strided_slice %39 {offsets = [0, 512], sizes = [8, 512], strides = [1, 1]} : vector<8x1024xf32> to vector<8x512xf32>
    %43 = vector.extract_strided_slice %41 {offsets = [0, 0], sizes = [8, 384], strides = [1, 1]} : vector<8x512xf32> to vector<8x384xf32>
    %44 = arith.negf %43 : vector<8x384xf32>
    %45 = math.exp %44 : vector<8x384xf32>
    %cst_24 = arith.constant 1.000000e+00 : f32
    %46 = vector.broadcast %cst_24 : f32 to vector<8x384xf32>
    %47 = arith.addf %46, %45 : vector<8x384xf32>
    %48 = arith.divf %46, %47 : vector<8x384xf32>
    %49 = vector.extract_strided_slice %41 {offsets = [0, 384], sizes = [8, 128], strides = [1, 1]} : vector<8x512xf32> to vector<8x128xf32>
    %50 = math.tanh %49 : vector<8x128xf32>
    %51 = vector.extract_strided_slice %48 {offsets = [0, 128], sizes = [8, 128], strides = [1, 1]} : vector<8x384xf32> to vector<8x128xf32>
    %52 = arith.mulf %51, %14 : vector<8x128xf32>
    %53 = vector.extract_strided_slice %48 {offsets = [0, 0], sizes = [8, 128], strides = [1, 1]} : vector<8x384xf32> to vector<8x128xf32>
    %54 = arith.mulf %53, %50 : vector<8x128xf32>
    %55 = arith.addf %52, %54 : vector<8x128xf32>
    %56 = vector.extract_strided_slice %48 {offsets = [0, 256], sizes = [8, 128], strides = [1, 1]} : vector<8x384xf32> to vector<8x128xf32>
    %57 = math.tanh %55 : vector<8x128xf32>
    %58 = arith.mulf %56, %57 : vector<8x128xf32>
    %c1_i32 = arith.constant 1 : i32
    %c8_i32_25 = arith.constant 8 : i32
    %59 = arith.muli %c1_i32, %c8_i32_25 : i32
    %60 = tpu.assume_multiple %59, 8 : i32
    %61 = arith.index_cast %60 : i32 to index
    %c0_26 = arith.constant 0 : index
    %62 = vector.load %arg17[%61, %c0_26] : memref<64x512xf32, #tpu.memory_space<vmem>>, vector<8x512xf32>
    %63 = arith.addf %62, %42 : vector<8x512xf32>
    %64 = vector.extract_strided_slice %63 {offsets = [0, 0], sizes = [8, 384], strides = [1, 1]} : vector<8x512xf32> to vector<8x384xf32>
    %65 = arith.negf %64 : vector<8x384xf32>
    %66 = math.exp %65 : vector<8x384xf32>
    %cst_27 = arith.constant 1.000000e+00 : f32
    %67 = vector.broadcast %cst_27 : f32 to vector<8x384xf32>
    %68 = arith.addf %67, %66 : vector<8x384xf32>
    %69 = arith.divf %67, %68 : vector<8x384xf32>
    %70 = vector.extract_strided_slice %63 {offsets = [0, 384], sizes = [8, 128], strides = [1, 1]} : vector<8x512xf32> to vector<8x128xf32>
    %71 = math.tanh %70 : vector<8x128xf32>
    %72 = vector.extract_strided_slice %69 {offsets = [0, 128], sizes = [8, 128], strides = [1, 1]} : vector<8x384xf32> to vector<8x128xf32>
    %73 = arith.mulf %72, %33 : vector<8x128xf32>
    %74 = vector.extract_strided_slice %69 {offsets = [0, 0], sizes = [8, 128], strides = [1, 1]} : vector<8x384xf32> to vector<8x128xf32>
    %75 = arith.mulf %74, %71 : vector<8x128xf32>
    %76 = arith.addf %73, %75 : vector<8x128xf32>
    %77 = vector.extract_strided_slice %69 {offsets = [0, 256], sizes = [8, 128], strides = [1, 1]} : vector<8x384xf32> to vector<8x128xf32>
    %78 = math.tanh %76 : vector<8x128xf32>
    %79 = arith.mulf %77, %78 : vector<8x128xf32>
    %80 = tpu.concatenate %79, %58 in 1 : vector<8x128xf32>, vector<8x128xf32> -> vector<8x256xf32>
    %81 = arith.truncf %80 : vector<8x256xf32> to vector<8x256xbf16>
    %cst_28 = arith.constant dense<0.000000e+00> : vector<8x1024xf32>
    %82 = tpu.matmul %81, %7, %cst_28 {dimension_numbers = #tpu.dot_dimension_numbers<[1], [0], [0], [1], [0, 0, 1, 1], [], []>} : vector<8x256xbf16>, vector<256x1024xbf16>, vector<8x1024xf32> -> vector<8x1024xf32>
    %83 = vector.extract_strided_slice %82 {offsets = [0, 0], sizes = [8, 512], strides = [1, 1]} : vector<8x1024xf32> to vector<8x512xf32>
    %84 = arith.addf %83, %10 : vector<8x512xf32>
    %85 = vector.extract_strided_slice %82 {offsets = [0, 512], sizes = [8, 512], strides = [1, 1]} : vector<8x1024xf32> to vector<8x512xf32>
    %86 = vector.extract_strided_slice %84 {offsets = [0, 0], sizes = [8, 384], strides = [1, 1]} : vector<8x512xf32> to vector<8x384xf32>
    %87 = arith.negf %86 : vector<8x384xf32>
    %88 = math.exp %87 : vector<8x384xf32>
    %cst_29 = arith.constant 1.000000e+00 : f32
    %89 = vector.broadcast %cst_29 : f32 to vector<8x384xf32>
    %90 = arith.addf %89, %88 : vector<8x384xf32>
    %91 = arith.divf %89, %90 : vector<8x384xf32>
    %92 = vector.extract_strided_slice %84 {offsets = [0, 384], sizes = [8, 128], strides = [1, 1]} : vector<8x512xf32> to vector<8x128xf32>
    %93 = math.tanh %92 : vector<8x128xf32>
    %94 = vector.extract_strided_slice %91 {offsets = [0, 128], sizes = [8, 128], strides = [1, 1]} : vector<8x384xf32> to vector<8x128xf32>
    %95 = arith.mulf %94, %55 : vector<8x128xf32>
    %96 = vector.extract_strided_slice %91 {offsets = [0, 0], sizes = [8, 128], strides = [1, 1]} : vector<8x384xf32> to vector<8x128xf32>
    %97 = arith.mulf %96, %93 : vector<8x128xf32>
    %98 = arith.addf %95, %97 : vector<8x128xf32>
    %99 = vector.extract_strided_slice %91 {offsets = [0, 256], sizes = [8, 128], strides = [1, 1]} : vector<8x384xf32> to vector<8x128xf32>
    %100 = math.tanh %98 : vector<8x128xf32>
    %101 = arith.mulf %99, %100 : vector<8x128xf32>
    %c2_i32 = arith.constant 2 : i32
    %c8_i32_30 = arith.constant 8 : i32
    %102 = arith.muli %c2_i32, %c8_i32_30 : i32
    %103 = tpu.assume_multiple %102, 8 : i32
    %104 = arith.index_cast %103 : i32 to index
    %c0_31 = arith.constant 0 : index
    %105 = vector.load %arg17[%104, %c0_31] : memref<64x512xf32, #tpu.memory_space<vmem>>, vector<8x512xf32>
    %106 = arith.addf %105, %85 : vector<8x512xf32>
    %107 = vector.extract_strided_slice %106 {offsets = [0, 0], sizes = [8, 384], strides = [1, 1]} : vector<8x512xf32> to vector<8x384xf32>
    %108 = arith.negf %107 : vector<8x384xf32>
    %109 = math.exp %108 : vector<8x384xf32>
    %cst_32 = arith.constant 1.000000e+00 : f32
    %110 = vector.broadcast %cst_32 : f32 to vector<8x384xf32>
    %111 = arith.addf %110, %109 : vector<8x384xf32>
    %112 = arith.divf %110, %111 : vector<8x384xf32>
    %113 = vector.extract_strided_slice %106 {offsets = [0, 384], sizes = [8, 128], strides = [1, 1]} : vector<8x512xf32> to vector<8x128xf32>
    %114 = math.tanh %113 : vector<8x128xf32>
    %115 = vector.extract_strided_slice %112 {offsets = [0, 128], sizes = [8, 128], strides = [1, 1]} : vector<8x384xf32> to vector<8x128xf32>
    %116 = arith.mulf %115, %76 : vector<8x128xf32>
    %117 = vector.extract_strided_slice %112 {offsets = [0, 0], sizes = [8, 128], strides = [1, 1]} : vector<8x384xf32> to vector<8x128xf32>
    %118 = arith.mulf %117, %114 : vector<8x128xf32>
    %119 = arith.addf %116, %118 : vector<8x128xf32>
    %120 = vector.extract_strided_slice %112 {offsets = [0, 256], sizes = [8, 128], strides = [1, 1]} : vector<8x384xf32> to vector<8x128xf32>
    %121 = math.tanh %119 : vector<8x128xf32>
    %122 = arith.mulf %120, %121 : vector<8x128xf32>
    %123 = tpu.concatenate %122, %101 in 1 : vector<8x128xf32>, vector<8x128xf32> -> vector<8x256xf32>
    %124 = arith.truncf %123 : vector<8x256xf32> to vector<8x256xbf16>
    %cst_33 = arith.constant dense<0.000000e+00> : vector<8x1024xf32>
    %125 = tpu.matmul %124, %7, %cst_33 {dimension_numbers = #tpu.dot_dimension_numbers<[1], [0], [0], [1], [0, 0, 1, 1], [], []>} : vector<8x256xbf16>, vector<256x1024xbf16>, vector<8x1024xf32> -> vector<8x1024xf32>
    %126 = vector.extract_strided_slice %125 {offsets = [0, 0], sizes = [8, 512], strides = [1, 1]} : vector<8x1024xf32> to vector<8x512xf32>
    %127 = arith.addf %126, %10 : vector<8x512xf32>
    %128 = vector.extract_strided_slice %125 {offsets = [0, 512], sizes = [8, 512], strides = [1, 1]} : vector<8x1024xf32> to vector<8x512xf32>
    %129 = vector.extract_strided_slice %127 {offsets = [0, 0], sizes = [8, 384], strides = [1, 1]} : vector<8x512xf32> to vector<8x384xf32>
    %130 = arith.negf %129 : vector<8x384xf32>
    %131 = math.exp %130 : vector<8x384xf32>
    %cst_34 = arith.constant 1.000000e+00 : f32
    %132 = vector.broadcast %cst_34 : f32 to vector<8x384xf32>
    %133 = arith.addf %132, %131 : vector<8x384xf32>
    %134 = arith.divf %132, %133 : vector<8x384xf32>
    %135 = vector.extract_strided_slice %127 {offsets = [0, 384], sizes = [8, 128], strides = [1, 1]} : vector<8x512xf32> to vector<8x128xf32>
    %136 = math.tanh %135 : vector<8x128xf32>
    %137 = vector.extract_strided_slice %134 {offsets = [0, 128], sizes = [8, 128], strides = [1, 1]} : vector<8x384xf32> to vector<8x128xf32>
    %138 = arith.mulf %137, %98 : vector<8x128xf32>
    %139 = vector.extract_strided_slice %134 {offsets = [0, 0], sizes = [8, 128], strides = [1, 1]} : vector<8x384xf32> to vector<8x128xf32>
    %140 = arith.mulf %139, %136 : vector<8x128xf32>
    %141 = arith.addf %138, %140 : vector<8x128xf32>
    %142 = vector.extract_strided_slice %134 {offsets = [0, 256], sizes = [8, 128], strides = [1, 1]} : vector<8x384xf32> to vector<8x128xf32>
    %143 = math.tanh %141 : vector<8x128xf32>
    %144 = arith.mulf %142, %143 : vector<8x128xf32>
    %c3_i32 = arith.constant 3 : i32
    %c8_i32_35 = arith.constant 8 : i32
    %145 = arith.muli %c3_i32, %c8_i32_35 : i32
    %146 = tpu.assume_multiple %145, 8 : i32
    %147 = arith.index_cast %146 : i32 to index
    %c0_36 = arith.constant 0 : index
    %148 = vector.load %arg17[%147, %c0_36] : memref<64x512xf32, #tpu.memory_space<vmem>>, vector<8x512xf32>
    %149 = arith.addf %148, %128 : vector<8x512xf32>
    %150 = vector.extract_strided_slice %149 {offsets = [0, 0], sizes = [8, 384], strides = [1, 1]} : vector<8x512xf32> to vector<8x384xf32>
    %151 = arith.negf %150 : vector<8x384xf32>
    %152 = math.exp %151 : vector<8x384xf32>
    %cst_37 = arith.constant 1.000000e+00 : f32
    %153 = vector.broadcast %cst_37 : f32 to vector<8x384xf32>
    %154 = arith.addf %153, %152 : vector<8x384xf32>
    %155 = arith.divf %153, %154 : vector<8x384xf32>
    %156 = vector.extract_strided_slice %149 {offsets = [0, 384], sizes = [8, 128], strides = [1, 1]} : vector<8x512xf32> to vector<8x128xf32>
    %157 = math.tanh %156 : vector<8x128xf32>
    %158 = vector.extract_strided_slice %155 {offsets = [0, 128], sizes = [8, 128], strides = [1, 1]} : vector<8x384xf32> to vector<8x128xf32>
    %159 = arith.mulf %158, %119 : vector<8x128xf32>
    %160 = vector.extract_strided_slice %155 {offsets = [0, 0], sizes = [8, 128], strides = [1, 1]} : vector<8x384xf32> to vector<8x128xf32>
    %161 = arith.mulf %160, %157 : vector<8x128xf32>
    %162 = arith.addf %159, %161 : vector<8x128xf32>
    %163 = vector.extract_strided_slice %155 {offsets = [0, 256], sizes = [8, 128], strides = [1, 1]} : vector<8x384xf32> to vector<8x128xf32>
    %164 = math.tanh %162 : vector<8x128xf32>
    %165 = arith.mulf %163, %164 : vector<8x128xf32>
    %166 = tpu.concatenate %165, %144 in 1 : vector<8x128xf32>, vector<8x128xf32> -> vector<8x256xf32>
    %167 = arith.truncf %166 : vector<8x256xf32> to vector<8x256xbf16>
    %cst_38 = arith.constant dense<0.000000e+00> : vector<8x1024xf32>
    %168 = tpu.matmul %167, %7, %cst_38 {dimension_numbers = #tpu.dot_dimension_numbers<[1], [0], [0], [1], [0, 0, 1, 1], [], []>} : vector<8x256xbf16>, vector<256x1024xbf16>, vector<8x1024xf32> -> vector<8x1024xf32>
    %169 = vector.extract_strided_slice %168 {offsets = [0, 0], sizes = [8, 512], strides = [1, 1]} : vector<8x1024xf32> to vector<8x512xf32>
    %170 = arith.addf %169, %10 : vector<8x512xf32>
    %171 = vector.extract_strided_slice %168 {offsets = [0, 512], sizes = [8, 512], strides = [1, 1]} : vector<8x1024xf32> to vector<8x512xf32>
    %172 = vector.extract_strided_slice %170 {offsets = [0, 0], sizes = [8, 384], strides = [1, 1]} : vector<8x512xf32> to vector<8x384xf32>
    %173 = arith.negf %172 : vector<8x384xf32>
    %174 = math.exp %173 : vector<8x384xf32>
    %cst_39 = arith.constant 1.000000e+00 : f32
    %175 = vector.broadcast %cst_39 : f32 to vector<8x384xf32>
    %176 = arith.addf %175, %174 : vector<8x384xf32>
    %177 = arith.divf %175, %176 : vector<8x384xf32>
    %178 = vector.extract_strided_slice %170 {offsets = [0, 384], sizes = [8, 128], strides = [1, 1]} : vector<8x512xf32> to vector<8x128xf32>
    %179 = math.tanh %178 : vector<8x128xf32>
    %180 = vector.extract_strided_slice %177 {offsets = [0, 128], sizes = [8, 128], strides = [1, 1]} : vector<8x384xf32> to vector<8x128xf32>
    %181 = arith.mulf %180, %141 : vector<8x128xf32>
    %182 = vector.extract_strided_slice %177 {offsets = [0, 0], sizes = [8, 128], strides = [1, 1]} : vector<8x384xf32> to vector<8x128xf32>
    %183 = arith.mulf %182, %179 : vector<8x128xf32>
    %184 = arith.addf %181, %183 : vector<8x128xf32>
    %185 = vector.extract_strided_slice %177 {offsets = [0, 256], sizes = [8, 128], strides = [1, 1]} : vector<8x384xf32> to vector<8x128xf32>
    %186 = math.tanh %184 : vector<8x128xf32>
    %187 = arith.mulf %185, %186 : vector<8x128xf32>
    %c4_i32 = arith.constant 4 : i32
    %c8_i32_40 = arith.constant 8 : i32
    %188 = arith.muli %c4_i32, %c8_i32_40 : i32
    %189 = tpu.assume_multiple %188, 8 : i32
    %190 = arith.index_cast %189 : i32 to index
    %c0_41 = arith.constant 0 : index
    %191 = vector.load %arg17[%190, %c0_41] : memref<64x512xf32, #tpu.memory_space<vmem>>, vector<8x512xf32>
    %192 = arith.addf %191, %171 : vector<8x512xf32>
    %193 = vector.extract_strided_slice %192 {offsets = [0, 0], sizes = [8, 384], strides = [1, 1]} : vector<8x512xf32> to vector<8x384xf32>
    %194 = arith.negf %193 : vector<8x384xf32>
    %195 = math.exp %194 : vector<8x384xf32>
    %cst_42 = arith.constant 1.000000e+00 : f32
    %196 = vector.broadcast %cst_42 : f32 to vector<8x384xf32>
    %197 = arith.addf %196, %195 : vector<8x384xf32>
    %198 = arith.divf %196, %197 : vector<8x384xf32>
    %199 = vector.extract_strided_slice %192 {offsets = [0, 384], sizes = [8, 128], strides = [1, 1]} : vector<8x512xf32> to vector<8x128xf32>
    %200 = math.tanh %199 : vector<8x128xf32>
    %201 = vector.extract_strided_slice %198 {offsets = [0, 128], sizes = [8, 128], strides = [1, 1]} : vector<8x384xf32> to vector<8x128xf32>
    %202 = arith.mulf %201, %162 : vector<8x128xf32>
    %203 = vector.extract_strided_slice %198 {offsets = [0, 0], sizes = [8, 128], strides = [1, 1]} : vector<8x384xf32> to vector<8x128xf32>
    %204 = arith.mulf %203, %200 : vector<8x128xf32>
    %205 = arith.addf %202, %204 : vector<8x128xf32>
    %206 = vector.extract_strided_slice %198 {offsets = [0, 256], sizes = [8, 128], strides = [1, 1]} : vector<8x384xf32> to vector<8x128xf32>
    %207 = math.tanh %205 : vector<8x128xf32>
    %208 = arith.mulf %206, %207 : vector<8x128xf32>
    %209 = tpu.concatenate %208, %187 in 1 : vector<8x128xf32>, vector<8x128xf32> -> vector<8x256xf32>
    %210 = arith.truncf %209 : vector<8x256xf32> to vector<8x256xbf16>
    %cst_43 = arith.constant dense<0.000000e+00> : vector<8x1024xf32>
    %211 = tpu.matmul %210, %7, %cst_43 {dimension_numbers = #tpu.dot_dimension_numbers<[1], [0], [0], [1], [0, 0, 1, 1], [], []>} : vector<8x256xbf16>, vector<256x1024xbf16>, vector<8x1024xf32> -> vector<8x1024xf32>
    %212 = vector.extract_strided_slice %211 {offsets = [0, 0], sizes = [8, 512], strides = [1, 1]} : vector<8x1024xf32> to vector<8x512xf32>
    %213 = arith.addf %212, %10 : vector<8x512xf32>
    %214 = vector.extract_strided_slice %211 {offsets = [0, 512], sizes = [8, 512], strides = [1, 1]} : vector<8x1024xf32> to vector<8x512xf32>
    %215 = vector.extract_strided_slice %213 {offsets = [0, 0], sizes = [8, 384], strides = [1, 1]} : vector<8x512xf32> to vector<8x384xf32>
    %216 = arith.negf %215 : vector<8x384xf32>
    %217 = math.exp %216 : vector<8x384xf32>
    %cst_44 = arith.constant 1.000000e+00 : f32
    %218 = vector.broadcast %cst_44 : f32 to vector<8x384xf32>
    %219 = arith.addf %218, %217 : vector<8x384xf32>
    %220 = arith.divf %218, %219 : vector<8x384xf32>
    %221 = vector.extract_strided_slice %213 {offsets = [0, 384], sizes = [8, 128], strides = [1, 1]} : vector<8x512xf32> to vector<8x128xf32>
    %222 = math.tanh %221 : vector<8x128xf32>
    %223 = vector.extract_strided_slice %220 {offsets = [0, 128], sizes = [8, 128], strides = [1, 1]} : vector<8x384xf32> to vector<8x128xf32>
    %224 = arith.mulf %223, %184 : vector<8x128xf32>
    %225 = vector.extract_strided_slice %220 {offsets = [0, 0], sizes = [8, 128], strides = [1, 1]} : vector<8x384xf32> to vector<8x128xf32>
    %226 = arith.mulf %225, %222 : vector<8x128xf32>
    %227 = arith.addf %224, %226 : vector<8x128xf32>
    %228 = vector.extract_strided_slice %220 {offsets = [0, 256], sizes = [8, 128], strides = [1, 1]} : vector<8x384xf32> to vector<8x128xf32>
    %229 = math.tanh %227 : vector<8x128xf32>
    %230 = arith.mulf %228, %229 : vector<8x128xf32>
    %c5_i32 = arith.constant 5 : i32
    %c8_i32_45 = arith.constant 8 : i32
    %231 = arith.muli %c5_i32, %c8_i32_45 : i32
    %232 = tpu.assume_multiple %231, 8 : i32
    %233 = arith.index_cast %232 : i32 to index
    %c0_46 = arith.constant 0 : index
    %234 = vector.load %arg17[%233, %c0_46] : memref<64x512xf32, #tpu.memory_space<vmem>>, vector<8x512xf32>
    %235 = arith.addf %234, %214 : vector<8x512xf32>
    %236 = vector.extract_strided_slice %235 {offsets = [0, 0], sizes = [8, 384], strides = [1, 1]} : vector<8x512xf32> to vector<8x384xf32>
    %237 = arith.negf %236 : vector<8x384xf32>
    %238 = math.exp %237 : vector<8x384xf32>
    %cst_47 = arith.constant 1.000000e+00 : f32
    %239 = vector.broadcast %cst_47 : f32 to vector<8x384xf32>
    %240 = arith.addf %239, %238 : vector<8x384xf32>
    %241 = arith.divf %239, %240 : vector<8x384xf32>
    %242 = vector.extract_strided_slice %235 {offsets = [0, 384], sizes = [8, 128], strides = [1, 1]} : vector<8x512xf32> to vector<8x128xf32>
    %243 = math.tanh %242 : vector<8x128xf32>
    %244 = vector.extract_strided_slice %241 {offsets = [0, 128], sizes = [8, 128], strides = [1, 1]} : vector<8x384xf32> to vector<8x128xf32>
    %245 = arith.mulf %244, %205 : vector<8x128xf32>
    %246 = vector.extract_strided_slice %241 {offsets = [0, 0], sizes = [8, 128], strides = [1, 1]} : vector<8x384xf32> to vector<8x128xf32>
    %247 = arith.mulf %246, %243 : vector<8x128xf32>
    %248 = arith.addf %245, %247 : vector<8x128xf32>
    %249 = vector.extract_strided_slice %241 {offsets = [0, 256], sizes = [8, 128], strides = [1, 1]} : vector<8x384xf32> to vector<8x128xf32>
    %250 = math.tanh %248 : vector<8x128xf32>
    %251 = arith.mulf %249, %250 : vector<8x128xf32>
    %252 = tpu.concatenate %251, %230 in 1 : vector<8x128xf32>, vector<8x128xf32> -> vector<8x256xf32>
    %253 = arith.truncf %252 : vector<8x256xf32> to vector<8x256xbf16>
    %cst_48 = arith.constant dense<0.000000e+00> : vector<8x1024xf32>
    %254 = tpu.matmul %253, %7, %cst_48 {dimension_numbers = #tpu.dot_dimension_numbers<[1], [0], [0], [1], [0, 0, 1, 1], [], []>} : vector<8x256xbf16>, vector<256x1024xbf16>, vector<8x1024xf32> -> vector<8x1024xf32>
    %255 = vector.extract_strided_slice %254 {offsets = [0, 0], sizes = [8, 512], strides = [1, 1]} : vector<8x1024xf32> to vector<8x512xf32>
    %256 = arith.addf %255, %10 : vector<8x512xf32>
    %257 = vector.extract_strided_slice %254 {offsets = [0, 512], sizes = [8, 512], strides = [1, 1]} : vector<8x1024xf32> to vector<8x512xf32>
    %258 = vector.extract_strided_slice %256 {offsets = [0, 0], sizes = [8, 384], strides = [1, 1]} : vector<8x512xf32> to vector<8x384xf32>
    %259 = arith.negf %258 : vector<8x384xf32>
    %260 = math.exp %259 : vector<8x384xf32>
    %cst_49 = arith.constant 1.000000e+00 : f32
    %261 = vector.broadcast %cst_49 : f32 to vector<8x384xf32>
    %262 = arith.addf %261, %260 : vector<8x384xf32>
    %263 = arith.divf %261, %262 : vector<8x384xf32>
    %264 = vector.extract_strided_slice %256 {offsets = [0, 384], sizes = [8, 128], strides = [1, 1]} : vector<8x512xf32> to vector<8x128xf32>
    %265 = math.tanh %264 : vector<8x128xf32>
    %266 = vector.extract_strided_slice %263 {offsets = [0, 128], sizes = [8, 128], strides = [1, 1]} : vector<8x384xf32> to vector<8x128xf32>
    %267 = arith.mulf %266, %227 : vector<8x128xf32>
    %268 = vector.extract_strided_slice %263 {offsets = [0, 0], sizes = [8, 128], strides = [1, 1]} : vector<8x384xf32> to vector<8x128xf32>
    %269 = arith.mulf %268, %265 : vector<8x128xf32>
    %270 = arith.addf %267, %269 : vector<8x128xf32>
    %271 = vector.extract_strided_slice %263 {offsets = [0, 256], sizes = [8, 128], strides = [1, 1]} : vector<8x384xf32> to vector<8x128xf32>
    %272 = math.tanh %270 : vector<8x128xf32>
    %273 = arith.mulf %271, %272 : vector<8x128xf32>
    %c6_i32 = arith.constant 6 : i32
    %c8_i32_50 = arith.constant 8 : i32
    %274 = arith.muli %c6_i32, %c8_i32_50 : i32
    %275 = tpu.assume_multiple %274, 8 : i32
    %276 = arith.index_cast %275 : i32 to index
    %c0_51 = arith.constant 0 : index
    %277 = vector.load %arg17[%276, %c0_51] : memref<64x512xf32, #tpu.memory_space<vmem>>, vector<8x512xf32>
    %278 = arith.addf %277, %257 : vector<8x512xf32>
    %279 = vector.extract_strided_slice %278 {offsets = [0, 0], sizes = [8, 384], strides = [1, 1]} : vector<8x512xf32> to vector<8x384xf32>
    %280 = arith.negf %279 : vector<8x384xf32>
    %281 = math.exp %280 : vector<8x384xf32>
    %cst_52 = arith.constant 1.000000e+00 : f32
    %282 = vector.broadcast %cst_52 : f32 to vector<8x384xf32>
    %283 = arith.addf %282, %281 : vector<8x384xf32>
    %284 = arith.divf %282, %283 : vector<8x384xf32>
    %285 = vector.extract_strided_slice %278 {offsets = [0, 384], sizes = [8, 128], strides = [1, 1]} : vector<8x512xf32> to vector<8x128xf32>
    %286 = math.tanh %285 : vector<8x128xf32>
    %287 = vector.extract_strided_slice %284 {offsets = [0, 128], sizes = [8, 128], strides = [1, 1]} : vector<8x384xf32> to vector<8x128xf32>
    %288 = arith.mulf %287, %248 : vector<8x128xf32>
    %289 = vector.extract_strided_slice %284 {offsets = [0, 0], sizes = [8, 128], strides = [1, 1]} : vector<8x384xf32> to vector<8x128xf32>
    %290 = arith.mulf %289, %286 : vector<8x128xf32>
    %291 = arith.addf %288, %290 : vector<8x128xf32>
    %292 = vector.extract_strided_slice %284 {offsets = [0, 256], sizes = [8, 128], strides = [1, 1]} : vector<8x384xf32> to vector<8x128xf32>
    %293 = math.tanh %291 : vector<8x128xf32>
    %294 = arith.mulf %292, %293 : vector<8x128xf32>
    %295 = tpu.concatenate %294, %273 in 1 : vector<8x128xf32>, vector<8x128xf32> -> vector<8x256xf32>
    %296 = arith.truncf %295 : vector<8x256xf32> to vector<8x256xbf16>
    %cst_53 = arith.constant dense<0.000000e+00> : vector<8x1024xf32>
    %297 = tpu.matmul %296, %7, %cst_53 {dimension_numbers = #tpu.dot_dimension_numbers<[1], [0], [0], [1], [0, 0, 1, 1], [], []>} : vector<8x256xbf16>, vector<256x1024xbf16>, vector<8x1024xf32> -> vector<8x1024xf32>
    %298 = vector.extract_strided_slice %297 {offsets = [0, 0], sizes = [8, 512], strides = [1, 1]} : vector<8x1024xf32> to vector<8x512xf32>
    %299 = arith.addf %298, %10 : vector<8x512xf32>
    %300 = vector.extract_strided_slice %297 {offsets = [0, 512], sizes = [8, 512], strides = [1, 1]} : vector<8x1024xf32> to vector<8x512xf32>
    %301 = vector.extract_strided_slice %299 {offsets = [0, 0], sizes = [8, 384], strides = [1, 1]} : vector<8x512xf32> to vector<8x384xf32>
    %302 = arith.negf %301 : vector<8x384xf32>
    %303 = math.exp %302 : vector<8x384xf32>
    %cst_54 = arith.constant 1.000000e+00 : f32
    %304 = vector.broadcast %cst_54 : f32 to vector<8x384xf32>
    %305 = arith.addf %304, %303 : vector<8x384xf32>
    %306 = arith.divf %304, %305 : vector<8x384xf32>
    %307 = vector.extract_strided_slice %299 {offsets = [0, 384], sizes = [8, 128], strides = [1, 1]} : vector<8x512xf32> to vector<8x128xf32>
    %308 = math.tanh %307 : vector<8x128xf32>
    %309 = vector.extract_strided_slice %306 {offsets = [0, 128], sizes = [8, 128], strides = [1, 1]} : vector<8x384xf32> to vector<8x128xf32>
    %310 = arith.mulf %309, %270 : vector<8x128xf32>
    %311 = vector.extract_strided_slice %306 {offsets = [0, 0], sizes = [8, 128], strides = [1, 1]} : vector<8x384xf32> to vector<8x128xf32>
    %312 = arith.mulf %311, %308 : vector<8x128xf32>
    %313 = arith.addf %310, %312 : vector<8x128xf32>
    %314 = vector.extract_strided_slice %306 {offsets = [0, 256], sizes = [8, 128], strides = [1, 1]} : vector<8x384xf32> to vector<8x128xf32>
    %315 = math.tanh %313 : vector<8x128xf32>
    %316 = arith.mulf %314, %315 : vector<8x128xf32>
    %c7_i32 = arith.constant 7 : i32
    %c8_i32_55 = arith.constant 8 : i32
    %317 = arith.muli %c7_i32, %c8_i32_55 : i32
    %318 = tpu.assume_multiple %317, 8 : i32
    %319 = arith.index_cast %318 : i32 to index
    %c0_56 = arith.constant 0 : index
    %320 = vector.load %arg17[%319, %c0_56] : memref<64x512xf32, #tpu.memory_space<vmem>>, vector<8x512xf32>
    %321 = arith.addf %320, %300 : vector<8x512xf32>
    %322 = vector.extract_strided_slice %321 {offsets = [0, 0], sizes = [8, 384], strides = [1, 1]} : vector<8x512xf32> to vector<8x384xf32>
    %323 = arith.negf %322 : vector<8x384xf32>
    %324 = math.exp %323 : vector<8x384xf32>
    %cst_57 = arith.constant 1.000000e+00 : f32
    %325 = vector.broadcast %cst_57 : f32 to vector<8x384xf32>
    %326 = arith.addf %325, %324 : vector<8x384xf32>
    %327 = arith.divf %325, %326 : vector<8x384xf32>
    %328 = vector.extract_strided_slice %321 {offsets = [0, 384], sizes = [8, 128], strides = [1, 1]} : vector<8x512xf32> to vector<8x128xf32>
    %329 = math.tanh %328 : vector<8x128xf32>
    %330 = vector.extract_strided_slice %327 {offsets = [0, 128], sizes = [8, 128], strides = [1, 1]} : vector<8x384xf32> to vector<8x128xf32>
    %331 = arith.mulf %330, %291 : vector<8x128xf32>
    %332 = vector.extract_strided_slice %327 {offsets = [0, 0], sizes = [8, 128], strides = [1, 1]} : vector<8x384xf32> to vector<8x128xf32>
    %333 = arith.mulf %332, %329 : vector<8x128xf32>
    %334 = arith.addf %331, %333 : vector<8x128xf32>
    %335 = vector.extract_strided_slice %327 {offsets = [0, 256], sizes = [8, 128], strides = [1, 1]} : vector<8x384xf32> to vector<8x128xf32>
    %336 = math.tanh %334 : vector<8x128xf32>
    %337 = arith.mulf %335, %336 : vector<8x128xf32>
    %338 = tpu.concatenate %337, %316 in 1 : vector<8x128xf32>, vector<8x128xf32> -> vector<8x256xf32>
    %339 = arith.truncf %338 : vector<8x256xf32> to vector<8x256xbf16>
    %cst_58 = arith.constant dense<0.000000e+00> : vector<8x1024xf32>
    %340 = tpu.matmul %339, %7, %cst_58 {dimension_numbers = #tpu.dot_dimension_numbers<[1], [0], [0], [1], [0, 0, 1, 1], [], []>} : vector<8x256xbf16>, vector<256x1024xbf16>, vector<8x1024xf32> -> vector<8x1024xf32>
    %341 = vector.extract_strided_slice %340 {offsets = [0, 0], sizes = [8, 512], strides = [1, 1]} : vector<8x1024xf32> to vector<8x512xf32>
    %342 = arith.addf %341, %10 : vector<8x512xf32>
    %343 = vector.extract_strided_slice %340 {offsets = [0, 512], sizes = [8, 512], strides = [1, 1]} : vector<8x1024xf32> to vector<8x512xf32>
    %344 = vector.extract_strided_slice %342 {offsets = [0, 0], sizes = [8, 384], strides = [1, 1]} : vector<8x512xf32> to vector<8x384xf32>
    %345 = arith.negf %344 : vector<8x384xf32>
    %346 = math.exp %345 : vector<8x384xf32>
    %cst_59 = arith.constant 1.000000e+00 : f32
    %347 = vector.broadcast %cst_59 : f32 to vector<8x384xf32>
    %348 = arith.addf %347, %346 : vector<8x384xf32>
    %349 = arith.divf %347, %348 : vector<8x384xf32>
    %350 = vector.extract_strided_slice %342 {offsets = [0, 384], sizes = [8, 128], strides = [1, 1]} : vector<8x512xf32> to vector<8x128xf32>
    %351 = math.tanh %350 : vector<8x128xf32>
    %352 = vector.extract_strided_slice %349 {offsets = [0, 128], sizes = [8, 128], strides = [1, 1]} : vector<8x384xf32> to vector<8x128xf32>
    %353 = arith.mulf %352, %313 : vector<8x128xf32>
    %354 = vector.extract_strided_slice %349 {offsets = [0, 0], sizes = [8, 128], strides = [1, 1]} : vector<8x384xf32> to vector<8x128xf32>
    %355 = arith.mulf %354, %351 : vector<8x128xf32>
    %356 = arith.addf %353, %355 : vector<8x128xf32>
    %357 = vector.extract_strided_slice %349 {offsets = [0, 256], sizes = [8, 128], strides = [1, 1]} : vector<8x384xf32> to vector<8x128xf32>
    %358 = math.tanh %356 : vector<8x128xf32>
    %359 = arith.mulf %357, %358 : vector<8x128xf32>
    %c8_i32_60 = arith.constant 8 : i32
    %c0_61 = arith.constant 0 : index
    %c0_62 = arith.constant 0 : index
    %360 = vector.load %arg12[%c0_61, %c0_62] : memref<8x128xf32, #tpu.memory_space<vmem>>, vector<8x128xf32>
    tpu.vector_store %arg12[%c0_61, %c0_62], %337 {strides = array<i32>} : memref<8x128xf32, #tpu.memory_space<vmem>>, vector<8x128xf32>,
    %c0_63 = arith.constant 0 : index
    %c0_64 = arith.constant 0 : index
    %361 = vector.load %arg13[%c0_63, %c0_64] : memref<8x128xf32, #tpu.memory_space<vmem>>, vector<8x128xf32>
    tpu.vector_store %arg13[%c0_63, %c0_64], %334 {strides = array<i32>} : memref<8x128xf32, #tpu.memory_space<vmem>>, vector<8x128xf32>,
    %c0_65 = arith.constant 0 : index
    %c0_66 = arith.constant 0 : index
    %362 = vector.load %arg14[%c0_65, %c0_66] : memref<8x128xf32, #tpu.memory_space<vmem>>, vector<8x128xf32>
    tpu.vector_store %arg14[%c0_65, %c0_66], %359 {strides = array<i32>} : memref<8x128xf32, #tpu.memory_space<vmem>>, vector<8x128xf32>,
    %c0_67 = arith.constant 0 : index
    %c0_68 = arith.constant 0 : index
    %363 = vector.load %arg15[%c0_67, %c0_68] : memref<8x128xf32, #tpu.memory_space<vmem>>, vector<8x128xf32>
    tpu.vector_store %arg15[%c0_67, %c0_68], %356 {strides = array<i32>} : memref<8x128xf32, #tpu.memory_space<vmem>>, vector<8x128xf32>,
    %c0_69 = arith.constant 0 : index
    %c0_70 = arith.constant 0 : index
    %364 = vector.load %arg16[%c0_69, %c0_70] : memref<8x512xf32, #tpu.memory_space<vmem>>, vector<8x512xf32>
    tpu.vector_store %arg16[%c0_69, %c0_70], %343 {strides = array<i32>} : memref<8x512xf32, #tpu.memory_space<vmem>>, vector<8x512xf32>,
    %c0_i32_71 = arith.constant 0 : i32
    %365 = arith.cmpi eq, %arg0, %c0_i32_71 : i32
    %366 = arith.extui %365 : i1 to i32
    %c0_i32_72 = arith.constant 0 : i32
    %367 = arith.cmpi ne, %366, %c0_i32_72 : i32
    scf.if %367 {
      %c0_73 = arith.constant 0 : index
      %c0_74 = arith.constant 0 : index
      %368 = vector.load %arg14[%c0_73, %c0_74] : memref<8x128xf32, #tpu.memory_space<vmem>>, vector<8x128xf32>
      %c0_75 = arith.constant 0 : index
      %c0_76 = arith.constant 0 : index
      %369 = vector.load %arg5[%c0_75, %c0_76] : memref<128x128xf32, #tpu.memory_space<vmem>>, vector<128x128xf32>
      %cst_77 = arith.constant dense<0.000000e+00> : vector<8x128xf32>
      %370 = tpu.matmul %368, %369, %cst_77 {dimension_numbers = #tpu.dot_dimension_numbers<[1], [0], [0], [1], [0, 0, 1, 1], [], []>} : vector<8x128xf32>, vector<128x128xf32>, vector<8x128xf32> -> vector<8x128xf32>
      %c0_78 = arith.constant 0 : index
      %c0_79 = arith.constant 0 : index
      %371 = vector.load %arg6[%c0_78, %c0_79] : memref<1x128xf32, #tpu.memory_space<vmem>>, vector<1x128xf32>
      %372 = vector.broadcast %371 : vector<1x128xf32> to vector<8x128xf32>
      %373 = arith.addf %370, %372 : vector<8x128xf32>
      %cst_80 = arith.constant 0.000000e+00 : f32
      %374 = vector.broadcast %cst_80 : f32 to vector<8x128xf32>
      %375 = arith.maximumf %373, %374 : vector<8x128xf32>
      %c0_81 = arith.constant 0 : index
      %c0_82 = arith.constant 0 : index
      %376 = vector.load %arg7[%c0_81, %c0_82] : memref<128x64xf32, #tpu.memory_space<vmem>>, vector<128x64xf32>
      %cst_83 = arith.constant dense<0.000000e+00> : vector<8x64xf32>
      %377 = tpu.matmul %375, %376, %cst_83 {dimension_numbers = #tpu.dot_dimension_numbers<[1], [0], [0], [1], [0, 0, 1, 1], [], []>} : vector<8x128xf32>, vector<128x64xf32>, vector<8x64xf32> -> vector<8x64xf32>
      %c0_84 = arith.constant 0 : index
      %c0_85 = arith.constant 0 : index
      %378 = vector.load %arg8[%c0_84, %c0_85] : memref<1x64xf32, #tpu.memory_space<vmem>>, vector<1x64xf32>
      %379 = vector.broadcast %378 : vector<1x64xf32> to vector<8x64xf32>
      %380 = arith.addf %377, %379 : vector<8x64xf32>
      %cst_86 = arith.constant 0.000000e+00 : f32
      %381 = vector.broadcast %cst_86 : f32 to vector<8x64xf32>
      %382 = arith.maximumf %380, %381 : vector<8x64xf32>
      %c0_87 = arith.constant 0 : index
      %c0_88 = arith.constant 0 : index
      %383 = vector.load %arg9[%c0_87, %c0_88] : memref<64x64xf32, #tpu.memory_space<vmem>>, vector<64x64xf32>
      %cst_89 = arith.constant dense<0.000000e+00> : vector<8x64xf32>
      %384 = tpu.matmul %382, %383, %cst_89 {dimension_numbers = #tpu.dot_dimension_numbers<[1], [0], [0], [1], [0, 0, 1, 1], [], []>} : vector<8x64xf32>, vector<64x64xf32>, vector<8x64xf32> -> vector<8x64xf32>
      %c0_90 = arith.constant 0 : index
      %c0_91 = arith.constant 0 : index
      %385 = vector.load %arg10[%c0_90, %c0_91] : memref<1x64xf32, #tpu.memory_space<vmem>>, vector<1x64xf32>
      %386 = vector.broadcast %385 : vector<1x64xf32> to vector<8x64xf32>
      %387 = arith.addf %384, %386 : vector<8x64xf32>
      %c0_92 = arith.constant 0 : index
      %c0_93 = arith.constant 0 : index
      %388 = vector.load %arg11[%c0_92, %c0_93] : memref<8x64xf32, #tpu.memory_space<vmem>>, vector<8x64xf32>
      tpu.vector_store %arg11[%c0_92, %c0_93], %387 {strides = array<i32>} : memref<8x64xf32, #tpu.memory_space<vmem>>, vector<8x64xf32>,
    } else {
    }
    return
  }
  func.func @transform_0(%arg0: i32) -> (i32, i32) {
    %c0_i32 = arith.constant 0 : i32
    %c0_i32_0 = arith.constant 0 : i32
    return %arg0, %c0_i32 : i32, i32
  }
  func.func @transform_1(%arg0: i32) -> (i32, i32) {
    %c0_i32 = arith.constant 0 : i32
    %c0_i32_0 = arith.constant 0 : i32
    %c0_i32_1 = arith.constant 0 : i32
    return %c0_i32, %c0_i32_0 : i32, i32
  }
  func.func @transform_2(%arg0: i32) -> (i32, i32) {
    %c0_i32 = arith.constant 0 : i32
    %c0_i32_0 = arith.constant 0 : i32
    %c0_i32_1 = arith.constant 0 : i32
    return %c0_i32, %c0_i32_0 : i32, i32
  }
  func.func @transform_3(%arg0: i32) -> (i32, i32) {
    %c0_i32 = arith.constant 0 : i32
    %c0_i32_0 = arith.constant 0 : i32
    %c0_i32_1 = arith.constant 0 : i32
    return %c0_i32, %c0_i32_0 : i32, i32
  }
  func.func @transform_4(%arg0: i32) -> (i32, i32) {
    %c0_i32 = arith.constant 0 : i32
    %c0_i32_0 = arith.constant 0 : i32
    %c0_i32_1 = arith.constant 0 : i32
    return %c0_i32, %c0_i32_0 : i32, i32
  }
  func.func @transform_5(%arg0: i32) -> (i32, i32) {
    %c0_i32 = arith.constant 0 : i32
    %c0_i32_0 = arith.constant 0 : i32
    %c0_i32_1 = arith.constant 0 : i32
    return %c0_i32, %c0_i32_0 : i32, i32
  }
  func.func @transform_6(%arg0: i32) -> (i32, i32) {
    %c0_i32 = arith.constant 0 : i32
    %c0_i32_0 = arith.constant 0 : i32
    %c0_i32_1 = arith.constant 0 : i32
    return %c0_i32, %c0_i32_0 : i32, i32
  }
  func.func @transform_7(%arg0: i32) -> (i32, i32) {
    %c0_i32 = arith.constant 0 : i32
    %c0_i32_0 = arith.constant 0 : i32
    %c0_i32_1 = arith.constant 0 : i32
    return %c0_i32, %c0_i32_0 : i32, i32
  }
  func.func @transform_8(%arg0: i32) -> (i32, i32) {
    %c0_i32 = arith.constant 0 : i32
    %c0_i32_0 = arith.constant 0 : i32
    %c0_i32_1 = arith.constant 0 : i32
    return %c0_i32, %c0_i32_0 : i32, i32
  }
  func.func @transform_9(%arg0: i32) -> (i32, i32) {
    %c0_i32 = arith.constant 0 : i32
    %c0_i32_0 = arith.constant 0 : i32
    %c0_i32_1 = arith.constant 0 : i32
    return %c0_i32, %c0_i32_0 : i32, i32
  }
  func.func @transform_10(%arg0: i32) -> (i32, i32) {
    %c0_i32 = arith.constant 0 : i32
    %c0_i32_0 = arith.constant 0 : i32
    %c0_i32_1 = arith.constant 0 : i32
    return %c0_i32, %c0_i32_0 : i32, i32
  }
}

</mosaic_0001>

<bundles_post_ra>
// kernel: tpu_custom_call.1
= control target key start
LH: loop header
LB: loop body
LE: loop exit
PB: predicated region body
PF: predicated region fallthrough
CT: control target
= control target key end

     0   :  { %15 = vsyncpa [#allocation9], 0  ;;  %s5884_s0 = inlined_call_operand.vmem [shape: f32[64,7], index: 0, kind: input, shape index: {}]   ;;  %s5885_s1 = inlined_call_operand.hbm [shape: f32[7,512], index: 1, kind: input, shape index: {}]   ;;  %s5886_s2 = inlined_call_operand.hbm [shape: bf16[256,1024], index: 2, kind: input, shape index: {}]   ;;  %s5887_s3 = inlined_call_operand.vmem [shape: f32[1,512], index: 3, kind: input, shape index: {}]   ;;  %s5888_s4 = inlined_call_operand.vmem [shape: f32[128,128], index: 4, kind: input, shape index: {}]   ;;  %s5889_s5 = inlined_call_operand.vmem [shape: f32[1,128], index: 5, kind: input, shape index: {}]   ;;  %s5890_s6 = inlined_call_operand.vmem [shape: f32[128,64], index: 6, kind: input, shape index: {}]   ;;  %s5891_s7 = inlined_call_operand.vmem [shape: f32[1,64], index: 7, kind: input, shape index: {}]   ;;  %s5892_s8 = inlined_call_operand.vmem [shape: f32[64,64], index: 8, kind: input, shape index: {}]   ;;  %s5893_s9 = inlined_call_operand.vmem [shape: f32[1,64], index: 9, kind: input, shape index: {}]   ;;  %s5894_s10 = inlined_call_operand.hbm [shape: f32[8,64], index: 10, kind: output, shape index: {}]  }
   0x1   :  { %16 = vsyncpa [#allocation12], 0 }
   0x2   :  { %17 = vsyncpa [#allocation10], 0  ;;  %s4052_s13 = smov [#allocation8]   ;;  %s4053_s15 = smov [#allocation11]  }
   0x3   :  { %s26_s14 = sshll.u32 %s4052_s13, 4  ;;  %s35_s16 = sshll.u32 %s4053_s15, 4  ;;  %s27_s14 = int_to_ptr.vmem [resolvable:$true] %s26_s14  ;;  %s4115_s16 = int_to_ptr.vmem [resolvable:$true] %s35_s16 }
   0x4   :  { %s3980_s19 = scalar_lea.hbm %s5885_s1, 512 }
   0x5   :  { %p3981_p0 = scmp.ne.s32.totalorder %s5885_s1, %s3980_s19  ;;  %p3984_p1 = scmp.lt.u32.totalorder %s3980_s19, %s5885_s1 }
   0x7   :  { %p3986_p2 = pnand %p3984_p1, %p3981_p0 }
   0x9   :  { %3989 = shalt.err (!%p3986_p2)
}
   0xa   :  { %s3990_s24 = scalar_lea.vmem %s27_s14, 512  ;;  %p3995_p4 = scmp.lt.s32.totalorder %s27_s14, %s27_s14 }
   0xb   :  { %p3991_p3 = scmp.ne.s32.totalorder %s27_s14, %s3990_s24  ;;  %p3996_p5 = scmp.lt.s32.totalorder %s3990_s24, %s3990_s24 }
   0xd   :  { %p3997_p6 = por %p3996_p5, %p3995_p4 }
   0xf   :  { %p3998_p7 = pnand %p3997_p6, %p3991_p3 }
  0x11   :  { %4001 = shalt.err (!%p3998_p7)
}
  0x12   :  { %29 = dma.hbm_to_vmem [thread:$0]  %s5885_s1, 512, %s27_s14, [#allocation9]  }
  0x13   :  { %s4002_s29 = scalar_lea.hbm %s5886_s2, 16384 }
  0x14   :  { %p4003_p8 = scmp.ne.s32.totalorder %s5886_s2, %s4002_s29  ;;  %p4006_p9 = scmp.lt.u32.totalorder %s4002_s29, %s5886_s2 }
  0x16   :  { %p4008_p10 = pnand %p4006_p9, %p4003_p8 }
  0x18   :  { %4011 = shalt.err (!%p4008_p10)
}
  0x19   :  { %s4012_s15 = scalar_lea.vmem %s4115_s16, 16384  ;;  %p4017_p12 = scmp.lt.s32.totalorder %s4115_s16, %s4115_s16 }
  0x1a   :  { %p4013_p11 = scmp.ne.s32.totalorder %s4115_s16, %s4012_s15  ;;  %p4018_p13 = scmp.lt.s32.totalorder %s4012_s15, %s4012_s15 }
  0x1c   :  { %p4019_p0 = por %p4018_p13, %p4017_p12 }
  0x1e   :  { %p4020_p1 = pnand %p4019_p0, %p4013_p11 }
  0x20   :  { %4023 = shalt.err (!%p4020_p1)
}
  0x21   :  { %s4054_s1 = smov 512   ;;  %s4055_s14 = smov 32  }
  0x22   :  { %41 = dma.hbm_to_vmem [thread:$0]  %s5886_s2, 16384, %s4115_s16, [#allocation12], %s4054_s1, %s4054_s1, %s4055_s14  }
  0x23   :  { %4046 = dma.done.wait [#allocation9], 512  }
  0x24   :  { %4047 = vsyncadd [#allocation9], 4294966784 }
  0x25   :  { %4048 = dma.done.wait [#allocation12], 16384  }
  0x26   :  { %4049 = vsyncadd [#allocation12], 4294950912  ;;  %v5901_v0 = vmov 0.0   ;;  %vm111_vm0 = vcmask 1046528   ;;  %v83_v1 = vld [vmem:[#allocation8 + $0x8] sm:$0x7f] }
  0x27   :  { %188 = vmatprep.mubr.f32.mxu0 %v5901_v0  ;;  %301 = vmatprep.mubr.f32.mxu1 %v5901_v0  ;;  %v82_v2 = vld [vmem:[#allocation8] sm:$0x7f]  ;;  %vm86_vm1 = vcmask 56320   ;;  %v85_v4 = vld [vmem:[#allocation8 + $0x18] sm:$0x7f]  ;;  %v383_v8 = vld [vmem:[#allocation11 + $0x8] sm:$0xff] }
  0x28   :  { %v74_v3 = vld [vmem:[%s5884_s0] sm:$0xff]  ;;  %3324 = vmatprep.subr.msk.mxu0 %vm111_vm0, %v83_v1  ;;  %v84_v5 = vld [vmem:[#allocation8 + $0x10] sm:$0x7f]  ;;  %3334 = vmatprep.subr.msk.mxu1 %vm111_vm0, %v85_v4  ;;  %v387_v9 = vld [vmem:[#allocation11 + $0x28] sm:$0xff]  ;;  %vm4058_vm2 = vmmov 0   ;;  %vm3226_vm3 = vcmask 523264  }
  0x29   :  { %v382_v6 = vld [vmem:[#allocation11] sm:$0xff]  ;;  %3325 = vmatpush1.msk.msra.mxu0 %vm111_vm0, %v82_v2  ;;  %3335 = vmatpush1.msk.msra.mxu1 %vm111_vm0, %v84_v5  ;;  %v4154_v11 = vcombine.high %v383_v8, %v387_v9  ;;  %v391_v15 = vld [vmem:[#allocation11 + $0x48] sm:$0xff]  ;;  %v4159_v16 = vcombine.low %v383_v8, %v387_v9  ;;  %s4059_s21 = smov [#allocation13]  }
  0x2a   :  { %v386_v7 = vld [vmem:[#allocation11 + $0x20] sm:$0xff]  ;;  %3326 = vmatmul.mubr.msk.f32.vlgmr.msra.gmra.mrb[0].mxu0 %vm86_vm1, %v74_v3  ;;  %3336 = vmatmul.mubr.msk.f32.vlgmr.msra.gmra.mrb[0].mxu1 %vm86_vm1, %v74_v3  ;;  %v395_v18 = vld [vmem:[#allocation11 + $0x68] sm:$0xff]  ;;  %s3307_s22 = sshll.u32 %s4059_s21, 4  ;;  %s3308_s22 = int_to_ptr.vmem [resolvable:$true] %s3307_s22 }
  0x2b   :  { %v4152_v10 = vcombine.high %v382_v6, %v386_v7  ;;  %6184 = vst [vmem:[#allocation18_spill] sm:$0xff] %v4154_v11  ;;  %v4156_v12 = vcombine.low %v382_v6, %v386_v7  ;;  %v390_v13 = vld [vmem:[#allocation11 + $0x40] sm:$0xff]  ;;  %6186 = vst [vmem:[#allocation20_spill] sm:$0xff] %v4159_v16  ;;  %194 = vmatprep.mubr.f32.mxu0 %v5901_v0  ;;  %1257 = vmatprep.subr.bf16.mxu1 %v4154_v11  ;;  %v399_v22 = vld [vmem:[#allocation11 + $0x88] sm:$0xff]  ;;  %p4029_p3 = scmp.lt.s32.totalorder %s3308_s22, %s3308_s22 }
  0x2c   :  { %v394_v14 = vld [vmem:[#allocation11 + $0x60] sm:$0xff]  ;;  %v4166_v21 = vcombine.high %v391_v15, %v395_v18  ;;  %v403_v23 = vld [vmem:[#allocation11 + $0xa8] sm:$0xff]  ;;  %1258 = vmatpush1.bf16.msra.mxu1 %v4159_v16  ;;  %v4172_v25 = vcombine.low %v391_v15, %v395_v18  ;;  %307 = vmatprep.mubr.f32.mxu1 %v5901_v0 }
  0x2d   :  { %6183 = vst [vmem:[#allocation17_spill] sm:$0xff] %v4152_v10  ;;  %6185 = vst [vmem:[#allocation19_spill] sm:$0xff] %v4156_v12  ;;  %v4161_v17 = vcombine.high %v390_v13, %v394_v14  ;;  %v398_v19 = vld [vmem:[#allocation11 + $0x80] sm:$0xff]  ;;  %1216 = vmatprep.subr.bf16.mxu0 %v4152_v10  ;;  %v4170_v24 = vcombine.low %v390_v13, %v394_v14  ;;  %v4178_v27 = vcombine.high %v399_v22, %v403_v23  ;;  %v407_v30 = vld [vmem:[#allocation11 + $0xc8] sm:$0xff] }
  0x2e   :  { %v402_v20 = vld [vmem:[#allocation11 + $0xa0] sm:$0xff]  ;;  %6188 = vst [vmem:[#allocation22_spill] sm:$0xff] %v4166_v21  ;;  %1217 = vmatpush1.bf16.msra.mxu0 %v4156_v12  ;;  %6190 = vst [vmem:[#allocation24_spill] sm:$0xff] %v4172_v25  ;;  %1259 = vmatprep.subr.bf16.mxu1 %v4166_v21  ;;  %v411_v31 = vld [vmem:[#allocation11 + $0xe8] sm:$0xff]  ;;  %v4185_v33 = vcombine.low %v399_v22, %v403_v23 }
  0x2f   :  { %6187 = vst [vmem:[#allocation21_spill] sm:$0xff] %v4161_v17  ;;  %6189 = vst [vmem:[#allocation23_spill] sm:$0xff] %v4170_v24  ;;  %1218 = vmatprep.subr.bf16.mxu0 %v4161_v17  ;;  %v4176_v26 = vcombine.high %v398_v19, %v402_v20  ;;  %v406_v28 = vld [vmem:[#allocation11 + $0xc0] sm:$0xff]  ;;  %v4183_v32 = vcombine.low %v398_v19, %v402_v20  ;;  %v4191_v35 = vcombine.high %v407_v30, %v411_v31  ;;  %v415_v38 = vld [vmem:[#allocation11 + $0x108] sm:$0xff] }
  0x30   :  { %6192 = vst [vmem:[#allocation26_spill] sm:$0xff] %v4178_v27  ;;  %v410_v29 = vld [vmem:[#allocation11 + $0xe0] sm:$0xff]  ;;  %1260 = vmatpush1.bf16.msra.mxu1 %v4172_v25  ;;  %6194 = vst [vmem:[#allocation28_spill] sm:$0xff] %v4185_v33  ;;  %v419_v39 = vld [vmem:[#allocation11 + $0x128] sm:$0xff]  ;;  %v4197_v41 = vcombine.low %v407_v30, %v411_v31 }
  0x31   :  { %6191 = vst [vmem:[#allocation25_spill] sm:$0xff] %v4176_v26  ;;  %6193 = vst [vmem:[#allocation27_spill] sm:$0xff] %v4183_v32  ;;  %1261 = vmatprep.subr.bf16.mxu1 %v4178_v27  ;;  %v4189_v34 = vcombine.high %v406_v28, %v410_v29  ;;  %v414_v36 = vld [vmem:[#allocation11 + $0x100] sm:$0xff]  ;;  %v4195_v40 = vcombine.low %v406_v28, %v410_v29  ;;  %v4203_v43 = vcombine.high %v415_v38, %v419_v39  ;;  %v423_v48 = vld [vmem:[#allocation11 + $0x148] sm:$0xff] }
  0x32   :  { %1219 = vmatpush1.bf16.msra.mxu0 %v4170_v24  ;;  %6196 = vst [vmem:[#allocation30_spill] sm:$0xff] %v4191_v35  ;;  %v418_v37 = vld [vmem:[#allocation11 + $0x120] sm:$0xff]  ;;  %6198 = vst [vmem:[#allocation32_spill] sm:$0xff] %v4197_v41  ;;  %v4209_v45 = vcombine.low %v415_v38, %v419_v39  ;;  %v427_v50 = vld [vmem:[#allocation11 + $0x168] sm:$0xff] }
  0x33   :  { %1220 = vmatprep.subr.bf16.mxu0 %v4176_v26  ;;  %6195 = vst [vmem:[#allocation29_spill] sm:$0xff] %v4189_v34  ;;  %6197 = vst [vmem:[#allocation31_spill] sm:$0xff] %v4195_v40  ;;  %v4201_v42 = vcombine.high %v414_v36, %v418_v37  ;;  %v4207_v44 = vcombine.low %v414_v36, %v418_v37  ;;  %v422_v46 = vld [vmem:[#allocation11 + $0x140] sm:$0xff]  ;;  %v4217_v51 = vcombine.high %v423_v48, %v427_v50  ;;  %v431_v56 = vld [vmem:[#allocation11 + $0x188] sm:$0xff] }
  0x34   :  { %1262 = vmatpush1.bf16.msra.mxu1 %v4185_v33  ;;  %6200 = vst [vmem:[#allocation34_spill] sm:$0xff] %v4203_v43  ;;  %6202 = vst [vmem:[#allocation36_spill] sm:$0xff] %v4209_v45  ;;  %v426_v47 = vld [vmem:[#allocation11 + $0x160] sm:$0xff]  ;;  %v4221_v53 = vcombine.low %v423_v48, %v427_v50  ;;  %v435_v58 = vld [vmem:[#allocation11 + $0x1a8] sm:$0xff] }
  0x35   :  { %1263 = vmatprep.subr.bf16.mxu1 %v4191_v35  ;;  %6199 = vst [vmem:[#allocation33_spill] sm:$0xff] %v4201_v42  ;;  %6201 = vst [vmem:[#allocation35_spill] sm:$0xff] %v4207_v44  ;;  %v4215_v49 = vcombine.high %v422_v46, %v426_v47  ;;  %v4219_v52 = vcombine.low %v422_v46, %v426_v47  ;;  %v430_v54 = vld [vmem:[#allocation11 + $0x180] sm:$0xff]  ;;  %v4229_v59 = vcombine.high %v431_v56, %v435_v58  ;;  %v439_v1 = vld [vmem:[#allocation11 + $0x1c8] sm:$0xff] }
  0x36   :  { %1221 = vmatpush1.bf16.msra.mxu0 %v4183_v32  ;;  %6204 = vst [vmem:[#allocation38_spill] sm:$0xff] %v4217_v51  ;;  %6206 = vst [vmem:[#allocation40_spill] sm:$0xff] %v4221_v53  ;;  %v434_v55 = vld [vmem:[#allocation11 + $0x1a0] sm:$0xff]  ;;  %v4233_v61 = vcombine.low %v431_v56, %v435_v58  ;;  %v443_v3 = vld [vmem:[#allocation11 + $0x1e8] sm:$0xff] }
  0x37   :  { %1222 = vmatprep.subr.bf16.mxu0 %v4189_v34  ;;  %6203 = vst [vmem:[#allocation37_spill] sm:$0xff] %v4215_v49  ;;  %6205 = vst [vmem:[#allocation39_spill] sm:$0xff] %v4219_v52  ;;  %v4227_v57 = vcombine.high %v430_v54, %v434_v55  ;;  %v4231_v60 = vcombine.low %v430_v54, %v434_v55  ;;  %v438_v62 = vld [vmem:[#allocation11 + $0x1c0] sm:$0xff]  ;;  %v4241_v4 = vcombine.high %v439_v1, %v443_v3  ;;  %v447_v9 = vld [vmem:[#allocation11 + $0x208] sm:$0xff] }
  0x38   :  { %1264 = vmatpush1.bf16.msra.mxu1 %v4197_v41  ;;  %6208 = vst [vmem:[#allocation42_spill] sm:$0xff] %v4229_v59  ;;  %6210 = vst [vmem:[#allocation44_spill] sm:$0xff] %v4233_v61  ;;  %v442_v63 = vld [vmem:[#allocation11 + $0x1e0] sm:$0xff]  ;;  %v4245_v6 = vcombine.low %v439_v1, %v443_v3  ;;  %v451_v14 = vld [vmem:[#allocation11 + $0x228] sm:$0xff] }
  0x39   :  { %1265 = vmatprep.subr.bf16.mxu1 %v4203_v43  ;;  %6207 = vst [vmem:[#allocation41_spill] sm:$0xff] %v4227_v57  ;;  %6209 = vst [vmem:[#allocation43_spill] sm:$0xff] %v4231_v60  ;;  %v4239_v2 = vcombine.high %v438_v62, %v442_v63  ;;  %v4243_v5 = vcombine.low %v438_v62, %v442_v63  ;;  %v446_v7 = vld [vmem:[#allocation11 + $0x200] sm:$0xff]  ;;  %v4253_v15 = vcombine.high %v447_v9, %v451_v14  ;;  %v455_v23 = vld [vmem:[#allocation11 + $0x248] sm:$0xff] }
  0x3a   :  { %1223 = vmatpush1.bf16.msra.mxu0 %v4195_v40  ;;  %6212 = vst [vmem:[#allocation46_spill] sm:$0xff] %v4241_v4  ;;  %6214 = vst [vmem:[#allocation48_spill] sm:$0xff] %v4245_v6  ;;  %v450_v8 = vld [vmem:[#allocation11 + $0x220] sm:$0xff]  ;;  %v4257_v19 = vcombine.low %v447_v9, %v451_v14  ;;  %v459_v29 = vld [vmem:[#allocation11 + $0x268] sm:$0xff] }
  0x3b   :  { %1224 = vmatprep.subr.bf16.mxu0 %v4201_v42  ;;  %6211 = vst [vmem:[#allocation45_spill] sm:$0xff] %v4239_v2  ;;  %6213 = vst [vmem:[#allocation47_spill] sm:$0xff] %v4243_v5  ;;  %v4251_v13 = vcombine.high %v446_v7, %v450_v8  ;;  %v4255_v18 = vcombine.low %v446_v7, %v450_v8  ;;  %v454_v20 = vld [vmem:[#allocation11 + $0x240] sm:$0xff]  ;;  %v75_v30 = vld [vmem:[%s5884_s0 + $0x8] sm:$0xff]  ;;  %v4268_v31 = vcombine.high %v455_v23, %v459_v29 }
  0x3c   :  { %1266 = vmatpush1.bf16.msra.mxu1 %v4209_v45  ;;  %6216 = vst [vmem:[#allocation50_spill] sm:$0xff] %v4253_v15  ;;  %6218 = vst [vmem:[#allocation52_spill] sm:$0xff] %v4257_v19  ;;  %v458_v22 = vld [vmem:[#allocation11 + $0x260] sm:$0xff]  ;;  %v4272_v37 = vcombine.low %v455_v23, %v459_v29  ;;  %3327 = vmatmul.mubr.msk.f32.gmra.mrb[2].mxu0 %vm86_vm1, %v75_v30  ;;  %v463_v46 = vld [vmem:[#allocation11 + $0x288] sm:$0xff] }
  0x3d   :  { %1267 = vmatprep.subr.bf16.mxu1 %v4217_v51  ;;  %6215 = vst [vmem:[#allocation49_spill] sm:$0xff] %v4251_v13  ;;  %6217 = vst [vmem:[#allocation51_spill] sm:$0xff] %v4255_v18  ;;  %v4263_v28 = vcombine.high %v454_v20, %v458_v22  ;;  %v4270_v36 = vcombine.low %v454_v20, %v458_v22  ;;  %3337 = vmatmul.mubr.msk.f32.gmra.mrb[2].mxu1 %vm86_vm1, %v75_v30  ;;  %v462_v38 = vld [vmem:[#allocation11 + $0x280] sm:$0xff]  ;;  %v467_v48 = vld [vmem:[#allocation11 + $0x2a8] sm:$0xff] }
  0x3e   :  { %1225 = vmatpush1.bf16.msra.mxu0 %v4207_v44  ;;  %6220 = vst [vmem:[#allocation54_spill] sm:$0xff] %v4268_v31  ;;  %6222 = vst [vmem:[#allocation56_spill] sm:$0xff] %v4272_v37  ;;  %v466_v39 = vld [vmem:[#allocation11 + $0x2a0] sm:$0xff]  ;;  %200 = vmatprep.mubr.f32.mxu0 %v5901_v0  ;;  %v76_v50 = vld [vmem:[%s5884_s0 + $0x10] sm:$0xff]  ;;  %v4287_v54 = vcombine.high %v463_v46, %v467_v48  ;;  %v4291_v56 = vcombine.low %v463_v46, %v467_v48 }
  0x3f   :  { %1226 = vmatprep.subr.bf16.mxu0 %v4215_v49  ;;  %6219 = vst [vmem:[#allocation53_spill] sm:$0xff] %v4263_v28  ;;  %6221 = vst [vmem:[#allocation55_spill] sm:$0xff] %v4270_v36  ;;  %v4280_v47 = vcombine.high %v462_v38, %v466_v39  ;;  %313 = vmatprep.mubr.f32.mxu1 %v5901_v0  ;;  %v4289_v55 = vcombine.low %v462_v38, %v466_v39  ;;  %v470_v58 = vld [vmem:[#allocation11 + $0x2c0] sm:$0xff]  ;;  %v471_v63 = vld [vmem:[#allocation11 + $0x2c8] sm:$0xff] }
  0x40   :  { %1268 = vmatpush1.bf16.msra.mxu1 %v4221_v53  ;;  %6224 = vst [vmem:[#allocation58_spill] sm:$0xff] %v4287_v54  ;;  %6226 = vst [vmem:[#allocation60_spill] sm:$0xff] %v4291_v56  ;;  %3328 = vmatmul.mubr.msk.f32.gmra.mrb[4].mxu0 %vm86_vm1, %v76_v50  ;;  %v474_v62 = vld [vmem:[#allocation11 + $0x2e0] sm:$0xff]  ;;  %v475_v3 = vld [vmem:[#allocation11 + $0x2e8] sm:$0xff] }
  0x41   :  { %1269 = vmatprep.subr.bf16.mxu1 %v4229_v59  ;;  %6223 = vst [vmem:[#allocation57_spill] sm:$0xff] %v4280_v47  ;;  %6225 = vst [vmem:[#allocation59_spill] sm:$0xff] %v4289_v55  ;;  %3338 = vmatmul.mubr.msk.f32.gmra.mrb[4].mxu1 %vm86_vm1, %v76_v50  ;;  %v4299_v1 = vcombine.high %v470_v58, %v474_v62  ;;  %v77_v7 = vld [vmem:[%s5884_s0 + $0x18] sm:$0xff]  ;;  %v4306_v8 = vcombine.high %v471_v63, %v475_v3  ;;  %v478_v20 = vld [vmem:[#allocation11 + $0x300] sm:$0xff] }
  0x42   :  { %1227 = vmatpush1.bf16.msra.mxu0 %v4219_v52  ;;  %206 = vmatprep.mubr.f32.mxu0 %v5901_v0  ;;  %v4308_v9 = vcombine.low %v470_v58, %v474_v62  ;;  %v4310_v14 = vcombine.low %v471_v63, %v475_v3  ;;  %v482_v22 = vld [vmem:[#allocation11 + $0x320] sm:$0xff]  ;;  %v479_v23 = vld [vmem:[#allocation11 + $0x308] sm:$0xff] }
  0x43   :  { %1228 = vmatprep.subr.bf16.mxu0 %v4227_v57  ;;  %6227 = vst [vmem:[#allocation61_spill] sm:$0xff] %v4299_v1  ;;  %319 = vmatprep.mubr.f32.mxu1 %v5901_v0  ;;  %6228 = vst [vmem:[#allocation62_spill] sm:$0xff] %v4306_v8  ;;  %v4318_v29 = vcombine.high %v478_v20, %v482_v22  ;;  %v483_v30 = vld [vmem:[#allocation11 + $0x328] sm:$0xff]  ;;  %v78_v38 = vld [vmem:[%s5884_s0 + $0x20] sm:$0xff]  ;;  %v4327_v46 = vcombine.low %v478_v20, %v482_v22 }
  0x44   :  { %1270 = vmatpush1.bf16.msra.mxu1 %v4233_v61  ;;  %6229 = vst [vmem:[#allocation63_spill] sm:$0xff] %v4308_v9  ;;  %6230 = vst [vmem:[#allocation64_spill] sm:$0xff] %v4310_v14  ;;  %3329 = vmatmul.mubr.msk.f32.gmra.mrb[6].mxu0 %vm86_vm1, %v77_v7  ;;  %v4325_v39 = vcombine.high %v479_v23, %v483_v30  ;;  %v4329_v48 = vcombine.low %v479_v23, %v483_v30  ;;  %v486_v50 = vld [vmem:[#allocation11 + $0x340] sm:$0xff]  ;;  %v487_v62 = vld [vmem:[#allocation11 + $0x348] sm:$0xff] }
  0x45   :  { %1271 = vmatprep.subr.bf16.mxu1 %v4241_v4  ;;  %3339 = vmatmul.mubr.msk.f32.gmra.mrb[6].mxu1 %vm86_vm1, %v77_v7  ;;  %6231 = vst [vmem:[#allocation65_spill] sm:$0xff] %v4318_v29  ;;  %6233 = vst [vmem:[#allocation67_spill] sm:$0xff] %v4327_v46  ;;  %v490_v58 = vld [vmem:[#allocation11 + $0x360] sm:$0xff]  ;;  %v79_v63 = vld [vmem:[%s5884_s0 + $0x28] sm:$0xff] }
  0x46   :  { %1229 = vmatpush1.bf16.msra.mxu0 %v4231_v60  ;;  %212 = vmatprep.mubr.f32.mxu0 %v5901_v0  ;;  %6232 = vst [vmem:[#allocation66_spill] sm:$0xff] %v4325_v39  ;;  %6234 = vst [vmem:[#allocation68_spill] sm:$0xff] %v4329_v48  ;;  %v4340_v3 = vcombine.high %v486_v50, %v490_v58  ;;  %v491_v7 = vld [vmem:[#allocation11 + $0x368] sm:$0xff]  ;;  %v4342_v20 = vcombine.low %v486_v50, %v490_v58  ;;  %v494_v30 = vld [vmem:[#allocation11 + $0x380] sm:$0xff] }
  0x47   :  { %1230 = vmatprep.subr.bf16.mxu0 %v4239_v2  ;;  %325 = vmatprep.mubr.f32.mxu1 %v5901_v0  ;;  %v4346_v22 = vcombine.high %v487_v62, %v491_v7  ;;  %v4348_v23 = vcombine.low %v487_v62, %v491_v7  ;;  %v80_v50 = vld [vmem:[%s5884_s0 + $0x30] sm:$0xff]  ;;  %v502_v62 = vld [vmem:[#allocation11 + $0x3c0] sm:$0xff] }
  0x48   :  { %1272 = vmatpush1.bf16.msra.mxu1 %v4245_v6  ;;  %3330 = vmatmul.mubr.msk.f32.gmra.mrb[8].mxu0 %vm86_vm1, %v78_v38  ;;  %6235 = vst [vmem:[#allocation69_spill] sm:$0xff] %v4340_v3  ;;  %6236 = vst [vmem:[#allocation70_spill] sm:$0xff] %v4342_v20  ;;  %v506_v7 = vld [vmem:[#allocation11 + $0x3e0] sm:$0xff] }
  0x49   :  { %1273 = vmatprep.subr.bf16.mxu1 %v4253_v15  ;;  %3340 = vmatmul.mubr.msk.f32.gmra.mrb[8].mxu1 %vm86_vm1, %v78_v38  ;;  %6237 = vst [vmem:[#allocation71_spill] sm:$0xff] %v4346_v22  ;;  %6238 = vst [vmem:[#allocation72_spill] sm:$0xff] %v4348_v23  ;;  %v498_v38 = vld [vmem:[#allocation11 + $0x3a0] sm:$0xff] }
  0x4a   :  { %1231 = vmatpush1.bf16.msra.mxu0 %v4243_v5  ;;  %218 = vmatprep.mubr.f32.mxu0 %v5901_v0 }
  0x4b   :  { %1232 = vmatprep.subr.bf16.mxu0 %v4251_v13  ;;  %331 = vmatprep.mubr.f32.mxu1 %v5901_v0  ;;  %v4363_v0 = vcombine.low %v494_v30, %v498_v38 }
  0x4c   :  { %1274 = vmatpush1.bf16.msra.mxu1 %v4257_v19  ;;  %3331 = vmatmul.mubr.msk.f32.gmra.mrb[10].mxu0 %vm86_vm1, %v79_v63 }
  0x4d   :  { %1275 = vmatprep.subr.bf16.mxu1 %v4268_v31  ;;  %3341 = vmatmul.mubr.msk.f32.gmra.mrb[10].mxu1 %vm86_vm1, %v79_v63  ;;  %6241 = vst [vmem:[#allocation75_spill] sm:$0xff] %v4363_v0  ;;  %v81_v63 = vld [vmem:[%s5884_s0 + $0x38] sm:$0xff] }
  0x4e   :  { %1233 = vmatpush1.bf16.msra.mxu0 %v4255_v18 }
  0x4f   :  { %1234 = vmatprep.subr.bf16.mxu0 %v4263_v28 }
  0x50   :  { %1276 = vmatpush1.bf16.msra.mxu1 %v4272_v37 }
  0x51   :  { %1277 = vmatprep.subr.bf16.mxu1 %v4287_v54 }
  0x52   :  { %1235 = vmatpush1.bf16.msra.mxu0 %v4270_v36 }
  0x53   :  { %1236 = vmatprep.subr.bf16.mxu0 %v4280_v47 }
  0x54   :  { %1278 = vmatpush1.bf16.msra.mxu1 %v4291_v56  ;;  %v413_v56 = vld [vmem:[#allocation11 + $0xf8] sm:$0xff] }
  0x55   :  { %1279 = vmatprep.subr.bf16.mxu1 %v4306_v8 }
  0x56   :  { %1237 = vmatpush1.bf16.msra.mxu0 %v4289_v55  ;;  %v6258_v55 = vmov 0.0|0.0  }
  0x57   :  { %1238 = vmatprep.subr.bf16.mxu0 %v4299_v1  ;;  %v409_v1 = vld [vmem:[#allocation11 + $0xd8] sm:$0xff] }
  0x58   :  { %1280 = vmatpush1.bf16.msra.mxu1 %v4310_v14  ;;  %v6243_v14 = vmov 0.0  }
  0x59   :  { %1281 = vmatprep.subr.bf16.mxu1 %v4325_v39  ;;  %v499_v39 = vld [vmem:[#allocation11 + $0x3a8] sm:$0xff]  ;;  %224 = vmatprep.mubr.f32.mxu0 %v6243_v14 }
  0x5a   :  { %1239 = vmatpush1.bf16.msra.mxu0 %v4308_v9  ;;  %337 = vmatprep.mubr.f32.mxu1 %v6243_v14 }
  0x5b   :  { %1240 = vmatprep.subr.bf16.mxu0 %v4318_v29  ;;  %v503_v29 = vld [vmem:[#allocation11 + $0x3c8] sm:$0xff]  ;;  %3332 = vmatmul.mubr.msk.f32.gmra.mrb[12].mxu0 %vm86_vm1, %v80_v50 }
  0x5c   :  { %1282 = vmatpush1.bf16.msra.mxu1 %v4329_v48  ;;  %v495_v48 = vld [vmem:[#allocation11 + $0x388] sm:$0xff]  ;;  %230 = vmatprep.mubr.f32.mxu0 %v6243_v14 }
  0x5d   :  { %1283 = vmatprep.subr.bf16.mxu1 %v4346_v22  ;;  %v4359_v58 = vcombine.high %v495_v48, %v499_v39  ;;  %v507_v22 = vld [vmem:[#allocation11 + $0x3e8] sm:$0xff]  ;;  %3342 = vmatmul.mubr.msk.f32.gmra.mrb[12].mxu1 %vm86_vm1, %v80_v50 }
  0x5e   :  { %1241 = vmatpush1.bf16.msra.mxu0 %v4327_v46  ;;  %v4352_v46 = vcombine.high %v494_v30, %v498_v38  ;;  %v384_v30 = vld [vmem:[#allocation11 + $0x10] sm:$0xff]  ;;  %v385_v38 = vld [vmem:[#allocation11 + $0x18] sm:$0xff]  ;;  %v4384_v9 = vcombine.low %v503_v29, %v507_v22  ;;  %343 = vmatprep.mubr.f32.mxu1 %v6243_v14 }
  0x5f   :  { %1242 = vmatprep.subr.bf16.mxu0 %v4340_v3  ;;  %6240 = vst [vmem:[#allocation74_spill] sm:$0xff] %v4359_v58  ;;  %v4365_v3 = vcombine.low %v495_v48, %v499_v39  ;;  %v4378_v39 = vcombine.high %v503_v29, %v507_v22  ;;  %v388_v48 = vld [vmem:[#allocation11 + $0x30] sm:$0xff]  ;;  %3333 = vmatmul.mubr.msk.f32.gmra.mrb[14].mxu0 %vm86_vm1, %v81_v63  ;;  %v5932_v29 = vmov 0.0|0.0  }
  0x60   :  { %6239 = vst [vmem:[#allocation73_spill] sm:$0xff] %v4352_v46  ;;  %1284 = vmatpush1.bf16.msra.mxu1 %v4348_v23  ;;  %v389_v23 = vld [vmem:[#allocation11 + $0x38] sm:$0xff]  ;;  %6247 = vst [vmem:[#allocation80_spill] sm:$0xff] %v4384_v9  ;;  %v4390_v50 = vcombine.high %v384_v30, %v388_v48  ;;  %1248 = vmatprep.mubr.bf16.mxu0 %v5932_v29  ;;  %v4400_v22 = vcombine.low %v384_v30, %v388_v48 }
  0x61   :  { %6242 = vst [vmem:[#allocation76_spill] sm:$0xff] %v4365_v3  ;;  %1285 = vmatprep.subr.bf16.mxu1 %v4359_v58  ;;  %6245 = vst [vmem:[#allocation78_spill] sm:$0xff] %v4378_v39  ;;  %v4392_v58 = vcombine.high %v385_v38, %v389_v23  ;;  %3343 = vmatmul.mubr.msk.f32.gmra.mrb[14].mxu1 %vm86_vm1, %v81_v63 }
  0x62   :  { %1243 = vmatpush1.bf16.msra.mxu0 %v4342_v20  ;;  %v4374_v20 = vcombine.high %v502_v62, %v506_v7  ;;  %6248 = vst [vmem:[#allocation81_spill] sm:$0xff] %v4390_v50  ;;  %1289 = vmatprep.mubr.bf16.mxu1 %v5932_v29 }
  0x63   :  { %1244 = vmatprep.subr.bf16.mxu0 %v4352_v46  ;;  %v4382_v46 = vcombine.low %v502_v62, %v506_v7  ;;  %6249 = vst [vmem:[#allocation82_spill] sm:$0xff] %v4392_v58  ;;  %v4404_v62 = vcombine.low %v385_v38, %v389_v23 }
  0x64   :  { %6244 = vst [vmem:[#allocation77_spill] sm:$0xff] %v4374_v20  ;;  %1286 = vmatpush1.bf16.msra.mxu1 %v4365_v3 }
  0x65   :  { %6246 = vst [vmem:[#allocation79_spill] sm:$0xff] %v4382_v46  ;;  %1287 = vmatprep.subr.bf16.mxu1 %v4378_v39  ;;  %6250 = vst [vmem:[#allocation83_spill] sm:$0xff] %v4404_v62 }
  0x66   :  { %1245 = vmatpush1.bf16.msra.mxu0 %v4363_v0 }
  0x67   :  { %1246 = vmatprep.subr.bf16.mxu0 %v4374_v20 }
  0x68   :  { %1288 = vmatpush1.bf16.msra.mxu1 %v4384_v9 }
  0x69   :  { %1339 = vmatprep.subr.bf16.mxu1 %v4392_v58 }
  0x6a   :  { %1247 = vmatpush1.bf16.msra.mxu0 %v4382_v46 }
  0x6b   :  { %1298 = vmatprep.subr.bf16.mxu0 %v4390_v50 }
  0xfd   :  { %v190_v7 = vpop.f32.mrb[0].mxu0  ;;  %v303_v39 = vpop.f32.mrb[0].mxu1 }
  0xfe   :  { %v3344_v14 = vmul.f32 -1.442695, %v190_v7  ;;  %v192_v63 = vpop.f32.mrb[1].mxu0  ;;  %v305_v20 = vpop.f32.mrb[1].mxu1  ;;  %v3346_v9 = vmul.f32 -1.442695, %v303_v39 }
  0xff   :  { %v3345_v46 = vmul.f32 -1.442695, %v192_v63  ;;  %v397_v39 = vld [vmem:[#allocation11 + $0x78] sm:$0xff] }
 0x100   :  { %3724 = vpow2.f32 %v3344_v14 }
 0x101   :  { %3726 = vpow2.f32 %v3345_v46 }
 0x102   :  { %3728 = vpow2.f32 %v3346_v9  ;;  %v392_v9 = vld [vmem:[#allocation11 + $0x50] sm:$0xff] }
 0x103   :  { %3730 = vtanh.f32 %v305_v20  ;;  %v393_v20 = vld [vmem:[#allocation11 + $0x58] sm:$0xff] }
 0x10a   :  { %v3725_v3 = vpop.eup %3724 }
 0x10b   :  { %v3727_v29 = vpop.eup %3726  ;;  %v559_v30 = vadd.f32 1.0, %v3725_v3  ;;  %v396_v3 = vld [vmem:[#allocation11 + $0x70] sm:$0xff] }
 0x10c   :  { %v560_v48 = vadd.f32 1.0, %v3727_v29  ;;  %v3729_v58 = vpop.eup %3728 }
 0x10d   :  { %3732 = vrcp.f32 %v559_v30  ;;  %v3731_v23 = vpop.eup %3730  ;;  %v561_v50 = vadd.f32 1.0, %v3729_v58  ;;  %v4413_v58 = vcombine.high %v393_v20, %v397_v39 }
 0x10e   :  { %3734 = vrcp.f32 %v560_v48  ;;  %v4411_v48 = vcombine.high %v392_v9, %v396_v3 }
 0x10f   :  { %3736 = vrcp.f32 %v561_v50  ;;  %6253 = vst [vmem:[#allocation86_spill] sm:$0xff] %v4413_v58  ;;  %v401_v50 = vld [vmem:[#allocation11 + $0x98] sm:$0xff] }
 0x110   :  { %6252 = vst [vmem:[#allocation85_spill] sm:$0xff] %v4411_v48 }
 0x117   :  { %v3733_v38 = vpop.eup %3732 }
 0x118   :  { %v3735_v7 = vpop.eup %3734  ;;  %v570_v0 = vmul.f32 %v3733_v38, %v3731_v23  ;;  %v400_v23 = vld [vmem:[#allocation11 + $0x90] sm:$0xff] }
 0x119   :  { %v569_v8 = vmul.f32 0.0, %v3735_v7  ;;  %v3737_v14 = vpop.eup %3736  ;;  %v404_v38 = vld [vmem:[#allocation11 + $0xb0] sm:$0xff]  ;;  %v4421_v7 = vcombine.low %v393_v20, %v397_v39  ;;  %v4441_v39 = vcombine.high %v409_v1, %v413_v56 }
 0x11b   :  { %v4406_v63 = vadd.f32 %v570_v0, %v569_v8  ;;  %v405_v0 = vld [vmem:[#allocation11 + $0xb8] sm:$0xff]  ;;  %v4419_v8 = vcombine.low %v392_v9, %v396_v3  ;;  %6255 = vst [vmem:[#allocation88_spill] sm:$0xff] %v4421_v7  ;;  %v4433_v9 = vcombine.low %v400_v23, %v404_v38  ;;  %6262 = vst [vmem:[#allocation94_spill] sm:$0xff] %v4441_v39 }
 0x11c   :  { %v4435_v3 = vcombine.low %v401_v50, %v405_v0 }
 0x11d   :  { %6251 = vst [vmem:[#allocation84_spill] sm:$0xff] %v4406_v63  ;;  %3738 = vtanh.f32 %v4406_v63  ;;  %6254 = vst [vmem:[#allocation87_spill] sm:$0xff] %v4419_v8  ;;  %v412_v63 = vld [vmem:[#allocation11 + $0xf0] sm:$0xff] }
 0x11e   :  { %6259 = vst [vmem:[#allocation91_spill] sm:$0xff] %v4433_v9  ;;  %6260 = vst [vmem:[#allocation92_spill] sm:$0xff] %v4435_v3 }
 0x127   :  { %v3739_v46 = vpop.eup %3738 }
 0x128   :  { %v573_v29 = vmul.f32 %v3739_v46, %v3737_v14  ;;  %v4425_v14 = vcombine.high %v400_v23, %v404_v38  ;;  %v4427_v46 = vcombine.high %v401_v50, %v405_v0  ;;  %v4447_v38 = vcombine.low %v409_v1, %v413_v56 }
 0x12a   :  { %v4409_v30 = vpack.c.bf16 %v573_v29, %v573_v29  ;;  %6256 = vst [vmem:[#allocation89_spill] sm:$0xff] %v4425_v14  ;;  %6257 = vst [vmem:[#allocation90_spill] sm:$0xff] %v4427_v46  ;;  %v408_v29 = vld [vmem:[#allocation11 + $0xd0] sm:$0xff] }
 0x12b   :  { %v4439_v20 = vcombine.high %v408_v29, %v412_v63  ;;  %v4445_v23 = vcombine.low %v408_v29, %v412_v63  ;;  %6264 = vst [vmem:[#allocation96_spill] sm:$0xff] %v4447_v38 }
 0x12c   :  { %1249 = vmatmul.mubr.bf16.vlgmr.msra.gmra.mrb[16].mxu0 %v4409_v30  ;;  %1290 = vmatmul.mubr.bf16.vlgmr.msra.gmra.mrb[16].mxu1 %v4409_v30 }
 0x12d   :  { %1299 = vmatpush1.bf16.msra.mxu0 %v4400_v22  ;;  %1340 = vmatpush1.bf16.msra.mxu1 %v4404_v62  ;;  %6261 = vst [vmem:[#allocation93_spill] sm:$0xff] %v4439_v20  ;;  %v417_v62 = vld [vmem:[#allocation11 + $0x118] sm:$0xff]  ;;  %6263 = vst [vmem:[#allocation95_spill] sm:$0xff] %v4445_v23 }
 0x12e   :  { %1300 = vmatprep.subr.bf16.mxu0 %v4411_v48  ;;  %1341 = vmatprep.subr.bf16.mxu1 %v4413_v58  ;;  %v416_v58 = vld [vmem:[#allocation11 + $0x110] sm:$0xff] }
 0x12f   :  { %1330 = vmatprep.mubr.bf16.mxu0 %v6258_v55  ;;  %1371 = vmatprep.mubr.bf16.mxu1 %v6258_v55  ;;  %v420_v48 = vld [vmem:[#allocation11 + $0x130] sm:$0xff]  ;;  %v421_v55 = vld [vmem:[#allocation11 + $0x138] sm:$0xff] }
 0x130   :  { %v4451_v50 = vcombine.high %v416_v58, %v420_v48  ;;  %v4453_v0 = vcombine.high %v417_v62, %v421_v55  ;;  %v4457_v63 = vcombine.low %v416_v58, %v420_v48  ;;  %v4459_v56 = vcombine.low %v417_v62, %v421_v55 }
 0x131   :  { %1301 = vmatpush1.bf16.msra.mxu0 %v4419_v8  ;;  %1342 = vmatpush1.bf16.msra.mxu1 %v4421_v7  ;;  %v425_v7 = vld [vmem:[#allocation11 + $0x158] sm:$0xff] }
 0x132   :  { %1302 = vmatprep.subr.bf16.mxu0 %v4425_v14  ;;  %1343 = vmatprep.subr.bf16.mxu1 %v4427_v46  ;;  %6265 = vst [vmem:[#allocation97_spill] sm:$0xff] %v4451_v50  ;;  %6266 = vst [vmem:[#allocation98_spill] sm:$0xff] %v4453_v0  ;;  %v424_v46 = vld [vmem:[#allocation11 + $0x150] sm:$0xff]  ;;  %v429_v8 = vld [vmem:[#allocation11 + $0x178] sm:$0xff] }
 0x133   :  { %v428_v14 = vld [vmem:[#allocation11 + $0x170] sm:$0xff]  ;;  %6267 = vst [vmem:[#allocation99_spill] sm:$0xff] %v4457_v63  ;;  %6268 = vst [vmem:[#allocation100_spill] sm:$0xff] %v4459_v56  ;;  %v4465_v29 = vcombine.high %v425_v7, %v429_v8  ;;  %v4471_v55 = vcombine.low %v425_v7, %v429_v8 }
 0x134   :  { %v4463_v1 = vcombine.high %v424_v46, %v428_v14  ;;  %v4469_v48 = vcombine.low %v424_v46, %v428_v14 }
 0x135   :  { %1303 = vmatpush1.bf16.msra.mxu0 %v4433_v9  ;;  %1344 = vmatpush1.bf16.msra.mxu1 %v4435_v3  ;;  %6270 = vst [vmem:[#allocation102_spill] sm:$0xff] %v4465_v29  ;;  %v433_v3 = vld [vmem:[#allocation11 + $0x198] sm:$0xff]  ;;  %6272 = vst [vmem:[#allocation104_spill] sm:$0xff] %v4471_v55 }
 0x136   :  { %1304 = vmatprep.subr.bf16.mxu0 %v4439_v20  ;;  %1345 = vmatprep.subr.bf16.mxu1 %v4441_v39  ;;  %6269 = vst [vmem:[#allocation101_spill] sm:$0xff] %v4463_v1  ;;  %v432_v39 = vld [vmem:[#allocation11 + $0x190] sm:$0xff]  ;;  %v437_v9 = vld [vmem:[#allocation11 + $0x1b8] sm:$0xff]  ;;  %6271 = vst [vmem:[#allocation103_spill] sm:$0xff] %v4469_v48 }
 0x137   :  { %v436_v20 = vld [vmem:[#allocation11 + $0x1b0] sm:$0xff]  ;;  %v4477_v58 = vcombine.high %v433_v3, %v437_v9  ;;  %v4483_v8 = vcombine.low %v433_v3, %v437_v9 }
 0x138   :  { %v4475_v62 = vcombine.high %v432_v39, %v436_v20  ;;  %v4481_v14 = vcombine.low %v432_v39, %v436_v20 }
 0x139   :  { %1305 = vmatpush1.bf16.msra.mxu0 %v4445_v23  ;;  %1346 = vmatpush1.bf16.msra.mxu1 %v4447_v38  ;;  %6274 = vst [vmem:[#allocation106_spill] sm:$0xff] %v4477_v58  ;;  %v441_v38 = vld [vmem:[#allocation11 + $0x1d8] sm:$0xff]  ;;  %6276 = vst [vmem:[#allocation108_spill] sm:$0xff] %v4483_v8 }
 0x13a   :  { %1306 = vmatprep.subr.bf16.mxu0 %v4451_v50  ;;  %1347 = vmatprep.subr.bf16.mxu1 %v4453_v0  ;;  %6273 = vst [vmem:[#allocation105_spill] sm:$0xff] %v4475_v62  ;;  %v440_v0 = vld [vmem:[#allocation11 + $0x1d0] sm:$0xff]  ;;  %v445_v23 = vld [vmem:[#allocation11 + $0x1f8] sm:$0xff]  ;;  %6275 = vst [vmem:[#allocation107_spill] sm:$0xff] %v4481_v14 }
 0x13b   :  { %v444_v50 = vld [vmem:[#allocation11 + $0x1f0] sm:$0xff]  ;;  %v4489_v46 = vcombine.high %v441_v38, %v445_v23  ;;  %v4495_v9 = vcombine.low %v441_v38, %v445_v23 }
 0x13c   :  { %v4487_v7 = vcombine.high %v440_v0, %v444_v50  ;;  %v4493_v20 = vcombine.low %v440_v0, %v444_v50 }
 0x13d   :  { %1307 = vmatpush1.bf16.msra.mxu0 %v4457_v63  ;;  %1348 = vmatpush1.bf16.msra.mxu1 %v4459_v56  ;;  %6278 = vst [vmem:[#allocation110_spill] sm:$0xff] %v4489_v46  ;;  %v449_v56 = vld [vmem:[#allocation11 + $0x218] sm:$0xff]  ;;  %6280 = vst [vmem:[#allocation112_spill] sm:$0xff] %v4495_v9 }
 0x13e   :  { %1308 = vmatprep.subr.bf16.mxu0 %v4463_v1  ;;  %1349 = vmatprep.subr.bf16.mxu1 %v4465_v29  ;;  %6277 = vst [vmem:[#allocation109_spill] sm:$0xff] %v4487_v7  ;;  %v448_v29 = vld [vmem:[#allocation11 + $0x210] sm:$0xff]  ;;  %v453_v63 = vld [vmem:[#allocation11 + $0x238] sm:$0xff]  ;;  %6279 = vst [vmem:[#allocation111_spill] sm:$0xff] %v4493_v20 }
 0x13f   :  { %v452_v1 = vld [vmem:[#allocation11 + $0x230] sm:$0xff]  ;;  %v4501_v39 = vcombine.high %v449_v56, %v453_v63  ;;  %v4507_v23 = vcombine.low %v449_v56, %v453_v63 }
 0x140   :  { %v4499_v3 = vcombine.high %v448_v29, %v452_v1  ;;  %v4505_v50 = vcombine.low %v448_v29, %v452_v1 }
 0x141   :  { %1309 = vmatpush1.bf16.msra.mxu0 %v4469_v48  ;;  %1350 = vmatpush1.bf16.msra.mxu1 %v4471_v55  ;;  %6282 = vst [vmem:[#allocation114_spill] sm:$0xff] %v4501_v39  ;;  %v457_v55 = vld [vmem:[#allocation11 + $0x258] sm:$0xff]  ;;  %6284 = vst [vmem:[#allocation116_spill] sm:$0xff] %v4507_v23 }
 0x142   :  { %1310 = vmatprep.subr.bf16.mxu0 %v4475_v62  ;;  %1351 = vmatprep.subr.bf16.mxu1 %v4477_v58  ;;  %6281 = vst [vmem:[#allocation113_spill] sm:$0xff] %v4499_v3  ;;  %v456_v58 = vld [vmem:[#allocation11 + $0x250] sm:$0xff]  ;;  %v461_v48 = vld [vmem:[#allocation11 + $0x278] sm:$0xff]  ;;  %6283 = vst [vmem:[#allocation115_spill] sm:$0xff] %v4505_v50 }
 0x143   :  { %v460_v62 = vld [vmem:[#allocation11 + $0x270] sm:$0xff]  ;;  %v4513_v0 = vcombine.high %v457_v55, %v461_v48  ;;  %v4519_v63 = vcombine.low %v457_v55, %v461_v48 }
 0x144   :  { %v4511_v38 = vcombine.high %v456_v58, %v460_v62  ;;  %v4517_v1 = vcombine.low %v456_v58, %v460_v62 }
 0x145   :  { %1311 = vmatpush1.bf16.msra.mxu0 %v4481_v14  ;;  %1352 = vmatpush1.bf16.msra.mxu1 %v4483_v8  ;;  %6286 = vst [vmem:[#allocation118_spill] sm:$0xff] %v4513_v0  ;;  %v465_v8 = vld [vmem:[#allocation11 + $0x298] sm:$0xff]  ;;  %6288 = vst [vmem:[#allocation120_spill] sm:$0xff] %v4519_v63 }
 0x146   :  { %1312 = vmatprep.subr.bf16.mxu0 %v4487_v7  ;;  %1353 = vmatprep.subr.bf16.mxu1 %v4489_v46  ;;  %6285 = vst [vmem:[#allocation117_spill] sm:$0xff] %v4511_v38  ;;  %v464_v46 = vld [vmem:[#allocation11 + $0x290] sm:$0xff]  ;;  %v469_v14 = vld [vmem:[#allocation11 + $0x2b8] sm:$0xff]  ;;  %6287 = vst [vmem:[#allocation119_spill] sm:$0xff] %v4517_v1 }
 0x147   :  { %v468_v7 = vld [vmem:[#allocation11 + $0x2b0] sm:$0xff]  ;;  %v4525_v29 = vcombine.high %v465_v8, %v469_v14  ;;  %v4531_v48 = vcombine.low %v465_v8, %v469_v14 }
 0x148   :  { %v4523_v56 = vcombine.high %v464_v46, %v468_v7  ;;  %v4529_v62 = vcombine.low %v464_v46, %v468_v7 }
 0x149   :  { %1313 = vmatpush1.bf16.msra.mxu0 %v4493_v20  ;;  %1354 = vmatpush1.bf16.msra.mxu1 %v4495_v9  ;;  %6290 = vst [vmem:[#allocation122_spill] sm:$0xff] %v4525_v29  ;;  %v473_v9 = vld [vmem:[#allocation11 + $0x2d8] sm:$0xff]  ;;  %6292 = vst [vmem:[#allocation124_spill] sm:$0xff] %v4531_v48 }
 0x14a   :  { %1314 = vmatprep.subr.bf16.mxu0 %v4499_v3  ;;  %1355 = vmatprep.subr.bf16.mxu1 %v4501_v39  ;;  %6289 = vst [vmem:[#allocation121_spill] sm:$0xff] %v4523_v56  ;;  %v472_v39 = vld [vmem:[#allocation11 + $0x2d0] sm:$0xff]  ;;  %v477_v20 = vld [vmem:[#allocation11 + $0x2f8] sm:$0xff]  ;;  %6291 = vst [vmem:[#allocation123_spill] sm:$0xff] %v4529_v62 }
 0x14b   :  { %v476_v3 = vld [vmem:[#allocation11 + $0x2f0] sm:$0xff]  ;;  %v4537_v58 = vcombine.high %v473_v9, %v477_v20  ;;  %v4543_v14 = vcombine.low %v473_v9, %v477_v20 }
 0x14c   :  { %v4535_v55 = vcombine.high %v472_v39, %v476_v3  ;;  %v4541_v7 = vcombine.low %v472_v39, %v476_v3 }
 0x14d   :  { %1315 = vmatpush1.bf16.msra.mxu0 %v4505_v50  ;;  %1356 = vmatpush1.bf16.msra.mxu1 %v4507_v23  ;;  %6294 = vst [vmem:[#allocation126_spill] sm:$0xff] %v4537_v58  ;;  %v481_v23 = vld [vmem:[#allocation11 + $0x318] sm:$0xff]  ;;  %6296 = vst [vmem:[#allocation128_spill] sm:$0xff] %v4543_v14 }
 0x14e   :  { %1316 = vmatprep.subr.bf16.mxu0 %v4511_v38  ;;  %1357 = vmatprep.subr.bf16.mxu1 %v4513_v0  ;;  %6293 = vst [vmem:[#allocation125_spill] sm:$0xff] %v4535_v55  ;;  %v480_v0 = vld [vmem:[#allocation11 + $0x310] sm:$0xff]  ;;  %v485_v50 = vld [vmem:[#allocation11 + $0x338] sm:$0xff]  ;;  %6295 = vst [vmem:[#allocation127_spill] sm:$0xff] %v4541_v7 }
 0x14f   :  { %v484_v38 = vld [vmem:[#allocation11 + $0x330] sm:$0xff]  ;;  %v4549_v46 = vcombine.high %v481_v23, %v485_v50  ;;  %v4555_v20 = vcombine.low %v481_v23, %v485_v50 }
 0x150   :  { %v4547_v8 = vcombine.high %v480_v0, %v484_v38  ;;  %v4553_v3 = vcombine.low %v480_v0, %v484_v38 }
 0x151   :  { %1317 = vmatpush1.bf16.msra.mxu0 %v4517_v1  ;;  %1358 = vmatpush1.bf16.msra.mxu1 %v4519_v63  ;;  %6298 = vst [vmem:[#allocation130_spill] sm:$0xff] %v4549_v46  ;;  %v489_v63 = vld [vmem:[#allocation11 + $0x358] sm:$0xff]  ;;  %6300 = vst [vmem:[#allocation132_spill] sm:$0xff] %v4555_v20 }
 0x152   :  { %1318 = vmatprep.subr.bf16.mxu0 %v4523_v56  ;;  %1359 = vmatprep.subr.bf16.mxu1 %v4525_v29  ;;  %6297 = vst [vmem:[#allocation129_spill] sm:$0xff] %v4547_v8  ;;  %v488_v29 = vld [vmem:[#allocation11 + $0x350] sm:$0xff]  ;;  %v493_v1 = vld [vmem:[#allocation11 + $0x378] sm:$0xff]  ;;  %6299 = vst [vmem:[#allocation131_spill] sm:$0xff] %v4553_v3 }
 0x153   :  { %v492_v56 = vld [vmem:[#allocation11 + $0x370] sm:$0xff]  ;;  %v4561_v39 = vcombine.high %v489_v63, %v493_v1  ;;  %v4567_v50 = vcombine.low %v489_v63, %v493_v1 }
 0x154   :  { %v4559_v9 = vcombine.high %v488_v29, %v492_v56  ;;  %v4565_v38 = vcombine.low %v488_v29, %v492_v56 }
 0x155   :  { %1319 = vmatpush1.bf16.msra.mxu0 %v4529_v62  ;;  %1360 = vmatpush1.bf16.msra.mxu1 %v4531_v48  ;;  %6302 = vst [vmem:[#allocation134_spill] sm:$0xff] %v4561_v39  ;;  %v497_v48 = vld [vmem:[#allocation11 + $0x398] sm:$0xff]  ;;  %6304 = vst [vmem:[#allocation136_spill] sm:$0xff] %v4567_v50 }
 0x156   :  { %1320 = vmatprep.subr.bf16.mxu0 %v4535_v55  ;;  %1361 = vmatprep.subr.bf16.mxu1 %v4537_v58  ;;  %6301 = vst [vmem:[#allocation133_spill] sm:$0xff] %v4559_v9  ;;  %v496_v58 = vld [vmem:[#allocation11 + $0x390] sm:$0xff]  ;;  %v501_v62 = vld [vmem:[#allocation11 + $0x3b8] sm:$0xff]  ;;  %6303 = vst [vmem:[#allocation135_spill] sm:$0xff] %v4565_v38 }
 0x157   :  { %v500_v55 = vld [vmem:[#allocation11 + $0x3b0] sm:$0xff]  ;;  %v4573_v0 = vcombine.high %v497_v48, %v501_v62  ;;  %v4579_v1 = vcombine.low %v497_v48, %v501_v62 }
 0x158   :  { %v4571_v23 = vcombine.high %v496_v58, %v500_v55  ;;  %v4577_v56 = vcombine.low %v496_v58, %v500_v55 }
 0x159   :  { %1321 = vmatpush1.bf16.msra.mxu0 %v4541_v7  ;;  %1362 = vmatpush1.bf16.msra.mxu1 %v4543_v14  ;;  %6306 = vst [vmem:[#allocation138_spill] sm:$0xff] %v4573_v0  ;;  %v505_v14 = vld [vmem:[#allocation11 + $0x3d8] sm:$0xff]  ;;  %6308 = vst [vmem:[#allocation140_spill] sm:$0xff] %v4579_v1 }
 0x15a   :  { %1322 = vmatprep.subr.bf16.mxu0 %v4547_v8  ;;  %1363 = vmatprep.subr.bf16.mxu1 %v4549_v46  ;;  %6305 = vst [vmem:[#allocation137_spill] sm:$0xff] %v4571_v23  ;;  %v504_v46 = vld [vmem:[#allocation11 + $0x3d0] sm:$0xff]  ;;  %v509_v7 = vld [vmem:[#allocation11 + $0x3f8] sm:$0xff]  ;;  %6307 = vst [vmem:[#allocation139_spill] sm:$0xff] %v4577_v56 }
 0x15b   :  { %v508_v8 = vld [vmem:[#allocation11 + $0x3f0] sm:$0xff]  ;;  %v4585_v29 = vcombine.high %v505_v14, %v509_v7  ;;  %v4599_v48 = vcombine.low %v505_v14, %v509_v7 }
 0x15c   :  { %v4583_v63 = vcombine.high %v504_v46, %v508_v8  ;;  %v4597_v62 = vcombine.low %v504_v46, %v508_v8 }
 0x15d   :  { %1323 = vmatpush1.bf16.msra.mxu0 %v4553_v3  ;;  %1364 = vmatpush1.bf16.msra.mxu1 %v4555_v20  ;;  %6310 = vst [vmem:[#allocation142_spill] sm:$0xff] %v4585_v29  ;;  %v4591_v20 = vpop.f32.mrb[2].mxu1  ;;  %6312 = vst [vmem:[#allocation144_spill] sm:$0xff] %v4599_v48 }
 0x15e   :  { %1324 = vmatprep.subr.bf16.mxu0 %v4559_v9  ;;  %1365 = vmatprep.subr.bf16.mxu1 %v4561_v39  ;;  %6309 = vst [vmem:[#allocation141_spill] sm:$0xff] %v4583_v63  ;;  %v4587_v39 = vpop.f32.mrb[2].mxu0  ;;  %6311 = vst [vmem:[#allocation143_spill] sm:$0xff] %v4597_v62 }
 0x15f   :  { %v4589_v9 = vpop.f32.mrb[3].mxu0 }
 0x160   :  { %v4603_v55 = vpop.f32.mrb[4].mxu0 }
 0x161   :  { %1325 = vmatpush1.bf16.msra.mxu0 %v4565_v38  ;;  %1366 = vmatpush1.bf16.msra.mxu1 %v4567_v50  ;;  %v4593_v38 = vpop.f32.mrb[3].mxu1  ;;  %6313 = vst [vmem:[#allocation145_spill] sm:$0xff] %v4603_v55  ;;  %v4605_v58 = vpop.f32.mrb[5].mxu0  ;;  %v6345_v55 = vld [vmem:[#allocation67_spill] sm:$0xff] }
 0x162   :  { %1326 = vmatprep.subr.bf16.mxu0 %v4571_v23  ;;  %1367 = vmatprep.subr.bf16.mxu1 %v4573_v0  ;;  %6314 = vst [vmem:[#allocation146_spill] sm:$0xff] %v4605_v58  ;;  %v4607_v0 = vpop.f32.mrb[4].mxu1  ;;  %v4613_v8 = vpop.f32.mrb[6].mxu0 }
 0x163   :  { %6315 = vst [vmem:[#allocation147_spill] sm:$0xff] %v4607_v0  ;;  %v4609_v23 = vpop.f32.mrb[5].mxu1  ;;  %6317 = vst [vmem:[#allocation149_spill] sm:$0xff] %v4613_v8  ;;  %v4617_v7 = vpop.f32.mrb[7].mxu0  ;;  %v6344_v0 = vld [vmem:[#allocation66_spill] sm:$0xff] }
 0x164   :  { %6316 = vst [vmem:[#allocation148_spill] sm:$0xff] %v4609_v23  ;;  %6318 = vst [vmem:[#allocation150_spill] sm:$0xff] %v4617_v7  ;;  %v4619_v14 = vpop.f32.mrb[6].mxu1  ;;  %v4627_v23 = vpop.f32.mrb[8].mxu0 }
 0x165   :  { %1327 = vmatpush1.bf16.msra.mxu0 %v4577_v56  ;;  %1368 = vmatpush1.bf16.msra.mxu1 %v4579_v1  ;;  %6319 = vst [vmem:[#allocation151_spill] sm:$0xff] %v4619_v14  ;;  %v4623_v46 = vpop.f32.mrb[7].mxu1  ;;  %6321 = vst [vmem:[#allocation153_spill] sm:$0xff] %v4627_v23  ;;  %v4631_v8 = vpop.f32.mrb[9].mxu0 }
 0x166   :  { %1328 = vmatprep.subr.bf16.mxu0 %v4583_v63  ;;  %1369 = vmatprep.subr.bf16.mxu1 %v4585_v29  ;;  %6320 = vst [vmem:[#allocation152_spill] sm:$0xff] %v4623_v46  ;;  %6322 = vst [vmem:[#allocation154_spill] sm:$0xff] %v4631_v8  ;;  %v4633_v7 = vpop.f32.mrb[8].mxu1 }
 0x167   :  { %6323 = vst [vmem:[#allocation155_spill] sm:$0xff] %v4633_v7  ;;  %v4635_v14 = vpop.f32.mrb[9].mxu1 }
 0x168   :  { %6324 = vst [vmem:[#allocation156_spill] sm:$0xff] %v4635_v14  ;;  %v4645_v46 = vpop.f32.mrb[10].mxu1 }
 0x169   :  { %1329 = vmatpush1.bf16.msra.mxu0 %v4597_v62  ;;  %1370 = vmatpush1.bf16.msra.mxu1 %v4599_v48  ;;  %6327 = vst [vmem:[#allocation159_spill] sm:$0xff] %v4645_v46  ;;  %v4647_v58 = vpop.f32.mrb[11].mxu1 }
 0x16a   :  { %1445 = vmatprep.subr.bf16.mxu0 %v4152_v10  ;;  %1486 = vmatprep.subr.bf16.mxu1 %v4154_v11  ;;  %6328 = vst [vmem:[#allocation160_spill] sm:$0xff] %v4647_v58  ;;  %v4657_v8 = vpop.f32.mrb[12].mxu1 }
 0x16b   :  { %6331 = vst [vmem:[#allocation163_spill] sm:$0xff] %v4657_v8  ;;  %v4659_v7 = vpop.f32.mrb[13].mxu1  ;;  %v6343_v8 = vld [vmem:[#allocation65_spill] sm:$0xff] }
 0x16c   :  { %1331 = vmatmul.mubr.bf16.vlgmr.msra.gmra.mrb[20].mxu0 %v4409_v30  ;;  %1372 = vmatmul.mubr.bf16.vlgmr.msra.gmra.mrb[20].mxu1 %v4409_v30  ;;  %v4639_v30 = vpop.f32.mrb[10].mxu0  ;;  %6332 = vst [vmem:[#allocation164_spill] sm:$0xff] %v4659_v7  ;;  %v6341_v7 = vld [vmem:[#allocation63_spill] sm:$0xff] }
 0x16d   :  { %1446 = vmatpush1.bf16.msra.mxu0 %v4156_v12  ;;  %1487 = vmatpush1.bf16.msra.mxu1 %v4159_v16  ;;  %6325 = vst [vmem:[#allocation157_spill] sm:$0xff] %v4639_v30  ;;  %v4643_v23 = vpop.f32.mrb[11].mxu0 }
 0x16e   :  { %1447 = vmatprep.subr.bf16.mxu0 %v4161_v17  ;;  %1488 = vmatprep.subr.bf16.mxu1 %v4166_v21  ;;  %6326 = vst [vmem:[#allocation158_spill] sm:$0xff] %v4643_v23  ;;  %v4651_v14 = vpop.f32.mrb[12].mxu0  ;;  %v4669_v23 = vpop.f32.mrb[14].mxu1 }
 0x16f   :  { %6329 = vst [vmem:[#allocation161_spill] sm:$0xff] %v4651_v14  ;;  %v4655_v30 = vpop.f32.mrb[13].mxu0  ;;  %6335 = vst [vmem:[#allocation167_spill] sm:$0xff] %v4669_v23  ;;  %v4671_v46 = vpop.f32.mrb[15].mxu1  ;;  %v6339_v23 = vld [vmem:[#allocation61_spill] sm:$0xff] }
 0x170   :  { %6330 = vst [vmem:[#allocation162_spill] sm:$0xff] %v4655_v30  ;;  %v4663_v58 = vpop.f32.mrb[14].mxu0  ;;  %6336 = vst [vmem:[#allocation168_spill] sm:$0xff] %v4671_v46  ;;  %v6337_v46 = vld [vmem:[#allocation59_spill] sm:$0xff]  ;;  %v6342_v30 = vld [vmem:[#allocation64_spill] sm:$0xff] }
 0x171   :  { %1448 = vmatpush1.bf16.msra.mxu0 %v4170_v24  ;;  %1489 = vmatpush1.bf16.msra.mxu1 %v4172_v25  ;;  %6333 = vst [vmem:[#allocation165_spill] sm:$0xff] %v4663_v58  ;;  %v4667_v14 = vpop.f32.mrb[15].mxu0  ;;  %v6340_v58 = vld [vmem:[#allocation62_spill] sm:$0xff] }
 0x172   :  { %1449 = vmatprep.subr.bf16.mxu0 %v4176_v26  ;;  %1490 = vmatprep.subr.bf16.mxu1 %v4178_v27  ;;  %6334 = vst [vmem:[#allocation166_spill] sm:$0xff] %v4667_v14  ;;  %v6338_v14 = vld [vmem:[#allocation60_spill] sm:$0xff] }
 0x175   :  { %1450 = vmatpush1.bf16.msra.mxu0 %v4183_v32  ;;  %1491 = vmatpush1.bf16.msra.mxu1 %v4185_v33 }
 0x176   :  { %1451 = vmatprep.subr.bf16.mxu0 %v4189_v34  ;;  %1492 = vmatprep.subr.bf16.mxu1 %v4191_v35 }
 0x179   :  { %1452 = vmatpush1.bf16.msra.mxu0 %v4195_v40  ;;  %1493 = vmatpush1.bf16.msra.mxu1 %v4197_v41 }
 0x17a   :  { %1453 = vmatprep.subr.bf16.mxu0 %v4201_v42  ;;  %1494 = vmatprep.subr.bf16.mxu1 %v4203_v43 }
 0x17d   :  { %1454 = vmatpush1.bf16.msra.mxu0 %v4207_v44  ;;  %1495 = vmatpush1.bf16.msra.mxu1 %v4209_v45 }
 0x17e   :  { %1455 = vmatprep.subr.bf16.mxu0 %v4215_v49  ;;  %1496 = vmatprep.subr.bf16.mxu1 %v4217_v51 }
 0x181   :  { %1456 = vmatpush1.bf16.msra.mxu0 %v4219_v52  ;;  %1497 = vmatpush1.bf16.msra.mxu1 %v4221_v53 }
 0x182   :  { %1457 = vmatprep.subr.bf16.mxu0 %v4227_v57  ;;  %1498 = vmatprep.subr.bf16.mxu1 %v4229_v59 }
 0x185   :  { %1458 = vmatpush1.bf16.msra.mxu0 %v4231_v60  ;;  %1499 = vmatpush1.bf16.msra.mxu1 %v4233_v61 }
 0x186   :  { %1459 = vmatprep.subr.bf16.mxu0 %v4239_v2  ;;  %1500 = vmatprep.subr.bf16.mxu1 %v4241_v4 }
 0x189   :  { %1460 = vmatpush1.bf16.msra.mxu0 %v4243_v5  ;;  %1501 = vmatpush1.bf16.msra.mxu1 %v4245_v6 }
 0x18a   :  { %1461 = vmatprep.subr.bf16.mxu0 %v4251_v13  ;;  %1502 = vmatprep.subr.bf16.mxu1 %v4253_v15 }
 0x18d   :  { %1462 = vmatpush1.bf16.msra.mxu0 %v4255_v18  ;;  %1503 = vmatpush1.bf16.msra.mxu1 %v4257_v19 }
 0x18e   :  { %1463 = vmatprep.subr.bf16.mxu0 %v4263_v28  ;;  %1504 = vmatprep.subr.bf16.mxu1 %v4268_v31 }
 0x191   :  { %1464 = vmatpush1.bf16.msra.mxu0 %v4270_v36  ;;  %1505 = vmatpush1.bf16.msra.mxu1 %v4272_v37 }
 0x192   :  { %1465 = vmatprep.subr.bf16.mxu0 %v4280_v47  ;;  %1506 = vmatprep.subr.bf16.mxu1 %v4287_v54  ;;  %v6346_v47 = vld [vmem:[#allocation68_spill] sm:$0xff]  ;;  %v6347_v54 = vld [vmem:[#allocation69_spill] sm:$0xff] }
 0x195   :  { %1466 = vmatpush1.bf16.msra.mxu0 %v6337_v46  ;;  %1507 = vmatpush1.bf16.msra.mxu1 %v6338_v14  ;;  %v6348_v46 = vld [vmem:[#allocation71_spill] sm:$0xff]  ;;  %v6349_v14 = vld [vmem:[#allocation70_spill] sm:$0xff] }
 0x196   :  { %1467 = vmatprep.subr.bf16.mxu0 %v6339_v23  ;;  %1508 = vmatprep.subr.bf16.mxu1 %v6340_v58  ;;  %v6350_v23 = vld [vmem:[#allocation72_spill] sm:$0xff]  ;;  %v6351_v58 = vld [vmem:[#allocation73_spill] sm:$0xff] }
 0x199   :  { %1468 = vmatpush1.bf16.msra.mxu0 %v6341_v7  ;;  %1509 = vmatpush1.bf16.msra.mxu1 %v6342_v30  ;;  %v6352_v7 = vld [vmem:[#allocation74_spill] sm:$0xff]  ;;  %v6353_v30 = vld [vmem:[#allocation75_spill] sm:$0xff] }
 0x19a   :  { %1469 = vmatprep.subr.bf16.mxu0 %v6343_v8  ;;  %1510 = vmatprep.subr.bf16.mxu1 %v6344_v0  ;;  %v6354_v8 = vld [vmem:[#allocation76_spill] sm:$0xff]  ;;  %v6355_v0 = vld [vmem:[#allocation77_spill] sm:$0xff] }
 0x19d   :  { %1470 = vmatpush1.bf16.msra.mxu0 %v6345_v55  ;;  %1511 = vmatpush1.bf16.msra.mxu1 %v6346_v47  ;;  %v6356_v55 = vld [vmem:[#allocation78_spill] sm:$0xff]  ;;  %v6357_v47 = vld [vmem:[#allocation79_spill] sm:$0xff] }
 0x19e   :  { %1471 = vmatprep.subr.bf16.mxu0 %v6347_v54  ;;  %1512 = vmatprep.subr.bf16.mxu1 %v6348_v46  ;;  %v6358_v54 = vld [vmem:[#allocation80_spill] sm:$0xff]  ;;  %v6359_v46 = vld [vmem:[#allocation81_spill] sm:$0xff] }
 0x1a1   :  { %1472 = vmatpush1.bf16.msra.mxu0 %v6349_v14  ;;  %1513 = vmatpush1.bf16.msra.mxu1 %v6350_v23  ;;  %v6360_v14 = vld [vmem:[#allocation82_spill] sm:$0xff]  ;;  %v512_v23 = vlaneseq }
 0x1a2   :  { %1473 = vmatprep.subr.bf16.mxu0 %v6351_v58  ;;  %1514 = vmatprep.subr.bf16.mxu1 %v6352_v7 }
 0x1a3   :  { %v513_v58 = vshrl.u32 %v512_v23, 7 }
 0x1a5   :  { %1474 = vmatpush1.bf16.msra.mxu0 %v6353_v30  ;;  %1515 = vmatpush1.bf16.msra.mxu1 %v6354_v8  ;;  %v514_v37 = vsub.s32 0, %v513_v58  ;;  %v510_v30 = vld [vmem:[%s5887_s3] sm:$0xf]  ;;  %v518_v8 = vsub.s32 1, %v513_v58  ;;  %v522_v36 = vsub.s32 2, %v513_v58  ;;  %v526_v6 = vsub.s32 3, %v513_v58 }
 0x1a6   :  { %1475 = vmatprep.subr.bf16.mxu0 %v6355_v0  ;;  %1516 = vmatprep.subr.bf16.mxu1 %v6356_v55 }
 0x1a7   :  { %v4724_v7 = vrot.slane %v510_v30, %v514_v37  ;;  %v4726_v0 = vrot.slane %v510_v30, %v518_v8  ;;  %v4730_v37 = vrot.slane %v510_v30, %v522_v36  ;;  %v4732_v8 = vrot.slane %v510_v30, %v526_v6 }
 0x1a9   :  { %1476 = vmatpush1.bf16.msra.mxu0 %v6357_v47  ;;  %1517 = vmatpush1.bf16.msra.mxu1 %v6358_v54  ;;  %6361 = vst [vmem:[#allocation169_spill] sm:$0xff] %v4724_v7  ;;  %6362 = vst [vmem:[#allocation170_spill] sm:$0xff] %v4726_v0 }
 0x1aa   :  { %1527 = vmatprep.subr.bf16.mxu0 %v6359_v46  ;;  %1568 = vmatprep.subr.bf16.mxu1 %v6360_v14  ;;  %6363 = vst [vmem:[#allocation171_spill] sm:$0xff] %v4730_v37  ;;  %6364 = vst [vmem:[#allocation172_spill] sm:$0xff] %v4732_v8 }
 0x1ff   :  { %v1250_v55 = vpop.f32.mrb[16].mxu0  ;;  %v1291_v47 = vpop.f32.mrb[16].mxu1 }
 0x200   :  { %v1380_v54 = vadd.f32 %v1250_v55, %v4724_v7  ;;  %v1252_v46 = vpop.f32.mrb[17].mxu0  ;;  %v1293_v31 = vpop.f32.mrb[17].mxu1  ;;  %v1382_v55 = vadd.f32 %v1291_v47, %v4730_v37 }
 0x201   :  { %v1381_v14 = vadd.f32 %v1252_v46, %v4726_v0  ;;  %v1254_v23 = vpop.f32.mrb[18].mxu0  ;;  %v1295_v28 = vpop.f32.mrb[18].mxu1  ;;  %v1383_v7 = vadd.f32 %v1293_v31, %v4732_v8 }
 0x202   :  { %v3475_v19 = vmul.f32 -1.442695, %v1380_v54  ;;  %v1255_v18 = vpop.f32.mrb[19].mxu0  ;;  %v1296_v15 = vpop.f32.mrb[19].mxu1  ;;  %v3477_v5 = vmul.f32 -1.442695, %v1382_v55 }
 0x203   :  { %v3476_v13 = vmul.f32 -1.442695, %v1381_v14 }
 0x204   :  { %3740 = vpow2.f32 %v3475_v19 }
 0x205   :  { %3742 = vpow2.f32 %v3476_v13 }
 0x206   :  { %3744 = vtanh.f32 %v1383_v7 }
 0x207   :  { %3746 = vpow2.f32 %v3477_v5 }
 0x20e   :  { %v3741_v4 = vpop.eup %3740 }
 0x20f   :  { %v1393_v46 = vadd.f32 1.0, %v3741_v4  ;;  %v3743_v28 = vpop.eup %3742 }
 0x210   :  { %v1394_v15 = vadd.f32 1.0, %v3743_v28  ;;  %v3745_v18 = vpop.eup %3744 }
 0x211   :  { %3748 = vrcp.f32 %v1393_v46  ;;  %v3747_v19 = vpop.eup %3746 }
 0x212   :  { %3750 = vrcp.f32 %v1394_v15  ;;  %v1395_v6 = vadd.f32 1.0, %v3747_v19 }
 0x214   :  { %3752 = vrcp.f32 %v1395_v6 }
 0x21b   :  { %v3749_v36 = vpop.eup %3748 }
 0x21c   :  { %v1404_v54 = vmul.f32 %v3749_v36, %v3745_v18  ;;  %v3751_v13 = vpop.eup %3750 }
 0x21d   :  { %v1403_v58 = vmul.f32 0.0, %v3751_v13 }
 0x21e   :  { %v3753_v31 = vpop.eup %3752 }
 0x21f   :  { %v4736_v14 = vadd.f32 %v1404_v54, %v1403_v58 }
 0x221   :  { %3754 = vtanh.f32 %v4736_v14 }
 0x22b   :  { %v3755_v4 = vpop.eup %3754 }
 0x22c   :  { %v1407_v47 = vmul.f32 %v3755_v4, %v3753_v31 }
 0x22e   :  { %v1444_v7 = vpack.c.bf16 %v1407_v47, %v1407_v47 }
 0x230   :  { %1477 = vmatprep.mubr.bf16.mxu0 %v1444_v7  ;;  %1518 = vmatprep.mubr.bf16.mxu1 %v1444_v7 }
 0x23f   :  { %v1332_v5 = vpop.f32.mrb[20].mxu0  ;;  %v1373_v30 = vpop.f32.mrb[20].mxu1 }
 0x240   :  { %v1415_v23 = vadd.f32 %v1332_v5, %v4587_v39  ;;  %v1417_v55 = vadd.f32 %v1373_v30, %v4591_v20  ;;  %v1334_v46 = vpop.f32.mrb[21].mxu0  ;;  %v1375_v28 = vpop.f32.mrb[21].mxu1 }
 0x241   :  { %v1416_v15 = vadd.f32 %v1334_v46, %v4589_v9  ;;  %v1418_v18 = vadd.f32 %v1375_v28, %v4593_v38  ;;  %v1336_v19 = vpop.f32.mrb[22].mxu0  ;;  %v1377_v36 = vpop.f32.mrb[22].mxu1  ;;  %v6365_v28 = vld [vmem:[#allocation84_spill] sm:$0xff] }
 0x242   :  { %v3478_v54 = vmul.f32 -1.442695, %v1415_v23  ;;  %v1337_v13 = vpop.f32.mrb[23].mxu0  ;;  %v1378_v6 = vpop.f32.mrb[23].mxu1  ;;  %v3480_v31 = vmul.f32 -1.442695, %v1417_v55 }
 0x243   :  { %v3479_v58 = vmul.f32 -1.442695, %v1416_v15  ;;  %v6366_v13 = vld [vmem:[#allocation83_spill] sm:$0xff]  ;;  %v6367_v6 = vld [vmem:[#allocation85_spill] sm:$0xff] }
 0x244   :  { %3756 = vpow2.f32 %v3478_v54 }
 0x245   :  { %3758 = vpow2.f32 %v3479_v58  ;;  %v6368_v58 = vld [vmem:[#allocation86_spill] sm:$0xff] }
 0x246   :  { %3760 = vtanh.f32 %v1418_v18 }
 0x247   :  { %3762 = vpow2.f32 %v3480_v31  ;;  %v6369_v31 = vld [vmem:[#allocation87_spill] sm:$0xff] }
 0x24e   :  { %v3757_v4 = vpop.eup %3756 }
 0x24f   :  { %v1428_v47 = vadd.f32 1.0, %v3757_v4  ;;  %v3759_v39 = vpop.eup %3758  ;;  %v6370_v4 = vld [vmem:[#allocation88_spill] sm:$0xff] }
 0x250   :  { %v1429_v20 = vadd.f32 1.0, %v3759_v39  ;;  %v3761_v9 = vpop.eup %3760  ;;  %v6372_v39 = vld [vmem:[#allocation90_spill] sm:$0xff] }
 0x251   :  { %3764 = vrcp.f32 %v1428_v47  ;;  %v3763_v5 = vpop.eup %3762  ;;  %v6371_v47 = vld [vmem:[#allocation89_spill] sm:$0xff] }
 0x252   :  { %3766 = vrcp.f32 %v1429_v20  ;;  %v1430_v23 = vadd.f32 1.0, %v3763_v5  ;;  %v6373_v20 = vld [vmem:[#allocation91_spill] sm:$0xff]  ;;  %v6375_v5 = vld [vmem:[#allocation93_spill] sm:$0xff] }
 0x254   :  { %3768 = vrcp.f32 %v1430_v23  ;;  %v6380_v23 = vld [vmem:[#allocation98_spill] sm:$0xff] }
 0x25b   :  { %v3765_v38 = vpop.eup %3764 }
 0x25c   :  { %v1439_v30 = vmul.f32 %v3765_v38, %v3761_v9  ;;  %v3767_v46 = vpop.eup %3766  ;;  %v6374_v9 = vld [vmem:[#allocation92_spill] sm:$0xff]  ;;  %v6376_v38 = vld [vmem:[#allocation94_spill] sm:$0xff] }
 0x25d   :  { %v1438_v19 = vmul.f32 %v3767_v46, %v6365_v28  ;;  %v6379_v46 = vld [vmem:[#allocation97_spill] sm:$0xff]  ;;  %v6381_v28 = vld [vmem:[#allocation99_spill] sm:$0xff] }
 0x25e   :  { %v3769_v55 = vpop.eup %3768 }
 0x25f   :  { %v4744_v15 = vadd.f32 %v1439_v30, %v1438_v19  ;;  %v6378_v30 = vld [vmem:[#allocation96_spill] sm:$0xff] }
 0x260   :  { %v6382_v19 = vld [vmem:[#allocation100_spill] sm:$0xff] }
 0x261   :  { %3770 = vtanh.f32 %v4744_v15 }
 0x26b   :  { %v3771_v18 = vpop.eup %3770 }
 0x26c   :  { %v1442_v36 = vmul.f32 %v3771_v18, %v3769_v55  ;;  %v6383_v55 = vld [vmem:[#allocation101_spill] sm:$0xff]  ;;  %v6384_v18 = vld [vmem:[#allocation102_spill] sm:$0xff] }
 0x26e   :  { %v4747_v54 = vpack.c.bf16 %v1442_v36, %v1442_v36  ;;  %v6385_v36 = vld [vmem:[#allocation103_spill] sm:$0xff] }
 0x270   :  { %1478 = vmatmul.mubr.bf16.vlgmr.msra.gmra.mrb[24].mxu0 %v4747_v54  ;;  %1519 = vmatmul.mubr.bf16.vlgmr.msra.gmra.mrb[24].mxu1 %v4747_v54 }
 0x271   :  { %1528 = vmatpush1.bf16.msra.mxu0 %v4400_v22  ;;  %1569 = vmatpush1.bf16.msra.mxu1 %v6366_v13 }
 0x272   :  { %1559 = vmatprep.mubr.bf16.mxu0 %v1444_v7  ;;  %1600 = vmatprep.mubr.bf16.mxu1 %v1444_v7  ;;  %v6377_v7 = vld [vmem:[#allocation95_spill] sm:$0xff] }
 0x273   :  { %1529 = vmatprep.subr.bf16.mxu0 %v6367_v6  ;;  %1570 = vmatprep.subr.bf16.mxu1 %v6368_v58 }
 0x275   :  { %1530 = vmatpush1.bf16.msra.mxu0 %v6369_v31  ;;  %1571 = vmatpush1.bf16.msra.mxu1 %v6370_v4 }
 0x276   :  { %1531 = vmatprep.subr.bf16.mxu0 %v6371_v47  ;;  %1572 = vmatprep.subr.bf16.mxu1 %v6372_v39 }
 0x279   :  { %1532 = vmatpush1.bf16.msra.mxu0 %v6373_v20  ;;  %1573 = vmatpush1.bf16.msra.mxu1 %v6374_v9 }
 0x27a   :  { %1533 = vmatprep.subr.bf16.mxu0 %v6375_v5  ;;  %1574 = vmatprep.subr.bf16.mxu1 %v6376_v38  ;;  %v6386_v5 = vld [vmem:[#allocation104_spill] sm:$0xff]  ;;  %v6387_v38 = vld [vmem:[#allocation105_spill] sm:$0xff] }
 0x27d   :  { %1534 = vmatpush1.bf16.msra.mxu0 %v6377_v7  ;;  %1575 = vmatpush1.bf16.msra.mxu1 %v6378_v30  ;;  %v6388_v7 = vld [vmem:[#allocation106_spill] sm:$0xff]  ;;  %v6389_v30 = vld [vmem:[#allocation107_spill] sm:$0xff] }
 0x27e   :  { %1535 = vmatprep.subr.bf16.mxu0 %v6379_v46  ;;  %1576 = vmatprep.subr.bf16.mxu1 %v6380_v23  ;;  %v6390_v46 = vld [vmem:[#allocation108_spill] sm:$0xff]  ;;  %v6391_v23 = vld [vmem:[#allocation109_spill] sm:$0xff] }
 0x281   :  { %1536 = vmatpush1.bf16.msra.mxu0 %v6381_v28  ;;  %1577 = vmatpush1.bf16.msra.mxu1 %v6382_v19  ;;  %v6392_v28 = vld [vmem:[#allocation110_spill] sm:$0xff]  ;;  %v6393_v19 = vld [vmem:[#allocation111_spill] sm:$0xff] }
 0x282   :  { %1537 = vmatprep.subr.bf16.mxu0 %v6383_v55  ;;  %1578 = vmatprep.subr.bf16.mxu1 %v6384_v18  ;;  %v6394_v55 = vld [vmem:[#allocation112_spill] sm:$0xff]  ;;  %v6395_v18 = vld [vmem:[#allocation113_spill] sm:$0xff] }
 0x285   :  { %1538 = vmatpush1.bf16.msra.mxu0 %v6385_v36  ;;  %1579 = vmatpush1.bf16.msra.mxu1 %v6386_v5  ;;  %v6396_v36 = vld [vmem:[#allocation114_spill] sm:$0xff]  ;;  %v6397_v5 = vld [vmem:[#allocation115_spill] sm:$0xff] }
 0x286   :  { %1539 = vmatprep.subr.bf16.mxu0 %v6387_v38  ;;  %1580 = vmatprep.subr.bf16.mxu1 %v6388_v7  ;;  %v6398_v38 = vld [vmem:[#allocation116_spill] sm:$0xff]  ;;  %v6399_v7 = vld [vmem:[#allocation117_spill] sm:$0xff] }
 0x289   :  { %1540 = vmatpush1.bf16.msra.mxu0 %v6389_v30  ;;  %1581 = vmatpush1.bf16.msra.mxu1 %v6390_v46  ;;  %v6400_v30 = vld [vmem:[#allocation118_spill] sm:$0xff]  ;;  %v6401_v46 = vld [vmem:[#allocation119_spill] sm:$0xff] }
 0x28a   :  { %1541 = vmatprep.subr.bf16.mxu0 %v6391_v23  ;;  %1582 = vmatprep.subr.bf16.mxu1 %v6392_v28  ;;  %v6402_v23 = vld [vmem:[#allocation120_spill] sm:$0xff]  ;;  %v6403_v28 = vld [vmem:[#allocation121_spill] sm:$0xff] }
 0x28d   :  { %1542 = vmatpush1.bf16.msra.mxu0 %v6393_v19  ;;  %1583 = vmatpush1.bf16.msra.mxu1 %v6394_v55  ;;  %v6404_v19 = vld [vmem:[#allocation122_spill] sm:$0xff]  ;;  %v6405_v55 = vld [vmem:[#allocation123_spill] sm:$0xff] }
 0x28e   :  { %1543 = vmatprep.subr.bf16.mxu0 %v6395_v18  ;;  %1584 = vmatprep.subr.bf16.mxu1 %v6396_v36  ;;  %v6406_v18 = vld [vmem:[#allocation124_spill] sm:$0xff]  ;;  %v6407_v36 = vld [vmem:[#allocation125_spill] sm:$0xff] }
 0x291   :  { %1544 = vmatpush1.bf16.msra.mxu0 %v6397_v5  ;;  %1585 = vmatpush1.bf16.msra.mxu1 %v6398_v38  ;;  %v6408_v5 = vld [vmem:[#allocation126_spill] sm:$0xff]  ;;  %v6409_v38 = vld [vmem:[#allocation127_spill] sm:$0xff] }
 0x292   :  { %1545 = vmatprep.subr.bf16.mxu0 %v6399_v7  ;;  %1586 = vmatprep.subr.bf16.mxu1 %v6400_v30  ;;  %v6410_v7 = vld [vmem:[#allocation128_spill] sm:$0xff]  ;;  %v6411_v30 = vld [vmem:[#allocation129_spill] sm:$0xff] }
 0x295   :  { %1546 = vmatpush1.bf16.msra.mxu0 %v6401_v46  ;;  %1587 = vmatpush1.bf16.msra.mxu1 %v6402_v23  ;;  %v6412_v46 = vld [vmem:[#allocation130_spill] sm:$0xff] }
 0x296   :  { %1547 = vmatprep.subr.bf16.mxu0 %v6403_v28  ;;  %1588 = vmatprep.subr.bf16.mxu1 %v6404_v19  ;;  %v6413_v28 = vld [vmem:[#allocation132_spill] sm:$0xff]  ;;  %v6414_v19 = vld [vmem:[#allocation133_spill] sm:$0xff] }
 0x299   :  { %1548 = vmatpush1.bf16.msra.mxu0 %v6405_v55  ;;  %1589 = vmatpush1.bf16.msra.mxu1 %v6406_v18  ;;  %v6415_v55 = vld [vmem:[#allocation134_spill] sm:$0xff]  ;;  %v6416_v18 = vld [vmem:[#allocation135_spill] sm:$0xff] }
 0x29a   :  { %1549 = vmatprep.subr.bf16.mxu0 %v6407_v36  ;;  %1590 = vmatprep.subr.bf16.mxu1 %v6408_v5  ;;  %v6417_v5 = vld [vmem:[#allocation137_spill] sm:$0xff] }
 0x29d   :  { %1550 = vmatpush1.bf16.msra.mxu0 %v6409_v38  ;;  %1591 = vmatpush1.bf16.msra.mxu1 %v6410_v7  ;;  %v6418_v38 = vld [vmem:[#allocation138_spill] sm:$0xff] }
 0x29e   :  { %1551 = vmatprep.subr.bf16.mxu0 %v6411_v30  ;;  %1592 = vmatprep.subr.bf16.mxu1 %v6412_v46 }
 0x2a1   :  { %1552 = vmatpush1.bf16.msra.mxu0 %v4553_v3  ;;  %1593 = vmatpush1.bf16.msra.mxu1 %v6413_v28 }
 0x2a2   :  { %1553 = vmatprep.subr.bf16.mxu0 %v6414_v19  ;;  %1594 = vmatprep.subr.bf16.mxu1 %v6415_v55 }
 0x2a5   :  { %1554 = vmatpush1.bf16.msra.mxu0 %v6416_v18  ;;  %1595 = vmatpush1.bf16.msra.mxu1 %v4567_v50 }
 0x2a6   :  { %1555 = vmatprep.subr.bf16.mxu0 %v6417_v5  ;;  %1596 = vmatprep.subr.bf16.mxu1 %v6418_v38 }
 0x2a9   :  { %1556 = vmatpush1.bf16.msra.mxu0 %v4577_v56  ;;  %1597 = vmatpush1.bf16.msra.mxu1 %v4579_v1 }
 0x2aa   :  { %1557 = vmatprep.subr.bf16.mxu0 %v4583_v63  ;;  %1598 = vmatprep.subr.bf16.mxu1 %v4585_v29 }
 0x2ad   :  { %1558 = vmatpush1.bf16.msra.mxu0 %v4597_v62  ;;  %1599 = vmatpush1.bf16.msra.mxu1 %v4599_v48 }
 0x2ae   :  { %1674 = vmatprep.subr.bf16.mxu0 %v4152_v10  ;;  %1715 = vmatprep.subr.bf16.mxu1 %v4154_v11 }
 0x2b0   :  { %1560 = vmatmul.mubr.bf16.vlgmr.msra.gmra.mrb[28].mxu0 %v4747_v54  ;;  %1601 = vmatmul.mubr.bf16.vlgmr.msra.gmra.mrb[28].mxu1 %v4747_v54  ;;  %v6419_v54 = vld [vmem:[#allocation46_spill] sm:$0xff] }
 0x2b1   :  { %1675 = vmatpush1.bf16.msra.mxu0 %v4156_v12  ;;  %1716 = vmatpush1.bf16.msra.mxu1 %v4159_v16 }
 0x2b2   :  { %1676 = vmatprep.subr.bf16.mxu0 %v4161_v17  ;;  %1717 = vmatprep.subr.bf16.mxu1 %v4166_v21 }
 0x2b5   :  { %1677 = vmatpush1.bf16.msra.mxu0 %v4170_v24  ;;  %1718 = vmatpush1.bf16.msra.mxu1 %v4172_v25 }
 0x2b6   :  { %1678 = vmatprep.subr.bf16.mxu0 %v4176_v26  ;;  %1719 = vmatprep.subr.bf16.mxu1 %v4178_v27 }
 0x2b9   :  { %1679 = vmatpush1.bf16.msra.mxu0 %v4183_v32  ;;  %1720 = vmatpush1.bf16.msra.mxu1 %v4185_v33 }
 0x2ba   :  { %1680 = vmatprep.subr.bf16.mxu0 %v4189_v34  ;;  %1721 = vmatprep.subr.bf16.mxu1 %v4191_v35 }
 0x2bd   :  { %1681 = vmatpush1.bf16.msra.mxu0 %v4195_v40  ;;  %1722 = vmatpush1.bf16.msra.mxu1 %v4197_v41 }
 0x2be   :  { %1682 = vmatprep.subr.bf16.mxu0 %v4201_v42  ;;  %1723 = vmatprep.subr.bf16.mxu1 %v4203_v43 }
 0x2c1   :  { %1683 = vmatpush1.bf16.msra.mxu0 %v4207_v44  ;;  %1724 = vmatpush1.bf16.msra.mxu1 %v4209_v45  ;;  %v6420_v45 = vld [vmem:[#allocation47_spill] sm:$0xff]  ;;  %v6456_v44 = vld [vmem:[#allocation169_spill] sm:$0xff] }
 0x2c2   :  { %1684 = vmatprep.subr.bf16.mxu0 %v4215_v49  ;;  %1725 = vmatprep.subr.bf16.mxu1 %v4217_v51  ;;  %v6421_v49 = vld [vmem:[#allocation48_spill] sm:$0xff]  ;;  %v6422_v51 = vld [vmem:[#allocation49_spill] sm:$0xff] }
 0x2c5   :  { %1685 = vmatpush1.bf16.msra.mxu0 %v4219_v52  ;;  %1726 = vmatpush1.bf16.msra.mxu1 %v4221_v53  ;;  %v6423_v52 = vld [vmem:[#allocation50_spill] sm:$0xff]  ;;  %v6424_v53 = vld [vmem:[#allocation51_spill] sm:$0xff] }
 0x2c6   :  { %1686 = vmatprep.subr.bf16.mxu0 %v4227_v57  ;;  %1727 = vmatprep.subr.bf16.mxu1 %v4229_v59  ;;  %v6425_v57 = vld [vmem:[#allocation52_spill] sm:$0xff]  ;;  %v6426_v59 = vld [vmem:[#allocation53_spill] sm:$0xff] }
 0x2c9   :  { %1687 = vmatpush1.bf16.msra.mxu0 %v4231_v60  ;;  %1728 = vmatpush1.bf16.msra.mxu1 %v4233_v61  ;;  %v6427_v60 = vld [vmem:[#allocation54_spill] sm:$0xff]  ;;  %v6428_v61 = vld [vmem:[#allocation55_spill] sm:$0xff] }
 0x2ca   :  { %1688 = vmatprep.subr.bf16.mxu0 %v4239_v2  ;;  %1729 = vmatprep.subr.bf16.mxu1 %v6419_v54  ;;  %v6429_v2 = vld [vmem:[#allocation56_spill] sm:$0xff]  ;;  %v6430_v54 = vld [vmem:[#allocation57_spill] sm:$0xff] }
 0x2cd   :  { %1689 = vmatpush1.bf16.msra.mxu0 %v6420_v45  ;;  %1730 = vmatpush1.bf16.msra.mxu1 %v6421_v49  ;;  %v6431_v45 = vld [vmem:[#allocation58_spill] sm:$0xff]  ;;  %v6432_v49 = vld [vmem:[#allocation59_spill] sm:$0xff] }
 0x2ce   :  { %1690 = vmatprep.subr.bf16.mxu0 %v6422_v51  ;;  %1731 = vmatprep.subr.bf16.mxu1 %v6423_v52  ;;  %v6433_v51 = vld [vmem:[#allocation60_spill] sm:$0xff]  ;;  %v6434_v52 = vld [vmem:[#allocation61_spill] sm:$0xff] }
 0x2d1   :  { %1691 = vmatpush1.bf16.msra.mxu0 %v6424_v53  ;;  %1732 = vmatpush1.bf16.msra.mxu1 %v6425_v57  ;;  %v6435_v53 = vld [vmem:[#allocation62_spill] sm:$0xff]  ;;  %v6436_v57 = vld [vmem:[#allocation63_spill] sm:$0xff] }
 0x2d2   :  { %1692 = vmatprep.subr.bf16.mxu0 %v6426_v59  ;;  %1733 = vmatprep.subr.bf16.mxu1 %v6427_v60  ;;  %v6437_v59 = vld [vmem:[#allocation64_spill] sm:$0xff]  ;;  %v6438_v60 = vld [vmem:[#allocation65_spill] sm:$0xff] }
 0x2d5   :  { %1693 = vmatpush1.bf16.msra.mxu0 %v6428_v61  ;;  %1734 = vmatpush1.bf16.msra.mxu1 %v6429_v2  ;;  %v6439_v61 = vld [vmem:[#allocation66_spill] sm:$0xff]  ;;  %v6440_v2 = vld [vmem:[#allocation67_spill] sm:$0xff] }
 0x2d6   :  { %1694 = vmatprep.subr.bf16.mxu0 %v6430_v54  ;;  %1735 = vmatprep.subr.bf16.mxu1 %v6431_v45  ;;  %v6441_v54 = vld [vmem:[#allocation68_spill] sm:$0xff]  ;;  %v6442_v45 = vld [vmem:[#allocation69_spill] sm:$0xff] }
 0x2d9   :  { %1695 = vmatpush1.bf16.msra.mxu0 %v6432_v49  ;;  %1736 = vmatpush1.bf16.msra.mxu1 %v6433_v51  ;;  %v6443_v49 = vld [vmem:[#allocation71_spill] sm:$0xff]  ;;  %v6444_v51 = vld [vmem:[#allocation70_spill] sm:$0xff] }
 0x2da   :  { %1696 = vmatprep.subr.bf16.mxu0 %v6434_v52  ;;  %1737 = vmatprep.subr.bf16.mxu1 %v6435_v53  ;;  %v6445_v52 = vld [vmem:[#allocation72_spill] sm:$0xff]  ;;  %v6446_v53 = vld [vmem:[#allocation73_spill] sm:$0xff] }
 0x2dd   :  { %1697 = vmatpush1.bf16.msra.mxu0 %v6436_v57  ;;  %1738 = vmatpush1.bf16.msra.mxu1 %v6437_v59  ;;  %v6447_v57 = vld [vmem:[#allocation74_spill] sm:$0xff]  ;;  %v6448_v59 = vld [vmem:[#allocation75_spill] sm:$0xff] }
 0x2de   :  { %1698 = vmatprep.subr.bf16.mxu0 %v6438_v60  ;;  %1739 = vmatprep.subr.bf16.mxu1 %v6439_v61  ;;  %v6449_v60 = vld [vmem:[#allocation76_spill] sm:$0xff]  ;;  %v6450_v61 = vld [vmem:[#allocation77_spill] sm:$0xff] }
 0x2e1   :  { %1699 = vmatpush1.bf16.msra.mxu0 %v6440_v2  ;;  %1740 = vmatpush1.bf16.msra.mxu1 %v6441_v54  ;;  %v6451_v2 = vld [vmem:[#allocation78_spill] sm:$0xff]  ;;  %v6452_v54 = vld [vmem:[#allocation79_spill] sm:$0xff] }
 0x2e2   :  { %1700 = vmatprep.subr.bf16.mxu0 %v6442_v45  ;;  %1741 = vmatprep.subr.bf16.mxu1 %v6443_v49  ;;  %v6453_v45 = vld [vmem:[#allocation80_spill] sm:$0xff]  ;;  %v6454_v49 = vld [vmem:[#allocation81_spill] sm:$0xff] }
 0x2e5   :  { %1701 = vmatpush1.bf16.msra.mxu0 %v6444_v51  ;;  %1742 = vmatpush1.bf16.msra.mxu1 %v6445_v52  ;;  %v6455_v51 = vld [vmem:[#allocation82_spill] sm:$0xff] }
 0x2e6   :  { %1702 = vmatprep.subr.bf16.mxu0 %v6446_v53  ;;  %1743 = vmatprep.subr.bf16.mxu1 %v6447_v57 }
 0x2e9   :  { %1703 = vmatpush1.bf16.msra.mxu0 %v6448_v59  ;;  %1744 = vmatpush1.bf16.msra.mxu1 %v6449_v60 }
 0x2ea   :  { %1704 = vmatprep.subr.bf16.mxu0 %v6450_v61  ;;  %1745 = vmatprep.subr.bf16.mxu1 %v6451_v2 }
 0x2ed   :  { %1705 = vmatpush1.bf16.msra.mxu0 %v6452_v54  ;;  %1746 = vmatpush1.bf16.msra.mxu1 %v6453_v45 }
 0x2ee   :  { %1756 = vmatprep.subr.bf16.mxu0 %v6454_v49  ;;  %1797 = vmatprep.subr.bf16.mxu1 %v6455_v51 }
 0x343   :  { %v1479_v52 = vpop.f32.mrb[24].mxu0  ;;  %v1520_v53 = vpop.f32.mrb[24].mxu1 }
 0x344   :  { %v1609_v57 = vadd.f32 %v1479_v52, %v6456_v44  ;;  %v1481_v43 = vpop.f32.mrb[25].mxu0  ;;  %v1522_v59 = vpop.f32.mrb[25].mxu1  ;;  %v1611_v49 = vadd.f32 %v1520_v53, %v4730_v37 }
 0x345   :  { %v1610_v60 = vadd.f32 %v1481_v43, %v4726_v0  ;;  %v1483_v42 = vpop.f32.mrb[26].mxu0  ;;  %v1524_v61 = vpop.f32.mrb[26].mxu1  ;;  %v1612_v51 = vadd.f32 %v1522_v59, %v4732_v8 }
 0x346   :  { %v3481_v41 = vmul.f32 -1.442695, %v1609_v57  ;;  %v1484_v2 = vpop.f32.mrb[27].mxu0  ;;  %v1525_v40 = vpop.f32.mrb[27].mxu1  ;;  %v3483_v45 = vmul.f32 -1.442695, %v1611_v49 }
 0x347   :  { %v3482_v54 = vmul.f32 -1.442695, %v1610_v60 }
 0x348   :  { %3772 = vpow2.f32 %v3481_v41 }
 0x349   :  { %3774 = vpow2.f32 %v3482_v54  ;;  %v6458_v54 = vld [vmem:[#allocation145_spill] sm:$0xff] }
 0x34a   :  { %3776 = vtanh.f32 %v1612_v51 }
 0x34b   :  { %3778 = vpow2.f32 %v3483_v45 }
 0x352   :  { %v3773_v35 = vpop.eup %3772 }
 0x353   :  { %v1622_v34 = vadd.f32 1.0, %v3773_v35  ;;  %v3775_v52 = vpop.eup %3774 }
 0x354   :  { %v1623_v43 = vadd.f32 1.0, %v3775_v52  ;;  %v3777_v42 = vpop.eup %3776 }
 0x355   :  { %3780 = vrcp.f32 %v1622_v34  ;;  %v3779_v57 = vpop.eup %3778 }
 0x356   :  { %3782 = vrcp.f32 %v1623_v43  ;;  %v1624_v41 = vadd.f32 1.0, %v3779_v57  ;;  %v6459_v43 = vld [vmem:[#allocation147_spill] sm:$0xff] }
 0x358   :  { %3784 = vrcp.f32 %v1624_v41 }
 0x35f   :  { %v3781_v61 = vpop.eup %3780 }
 0x360   :  { %v1633_v40 = vmul.f32 %v3781_v61, %v3777_v42  ;;  %v3783_v60 = vpop.eup %3782 }
 0x361   :  { %v1632_v2 = vmul.f32 %v3783_v60, %v4736_v14  ;;  %v6460_v14 = vld [vmem:[#allocation146_spill] sm:$0xff]  ;;  %v6461_v60 = vld [vmem:[#allocation148_spill] sm:$0xff] }
 0x362   :  { %v3785_v35 = vpop.eup %3784 }
 0x363   :  { %v4886_v53 = vadd.f32 %v1633_v40, %v1632_v2 }
 0x365   :  { %6457 = vst [vmem:[#allocation84_spill] sm:$0xff] %v4886_v53  ;;  %3786 = vtanh.f32 %v4886_v53 }
 0x36f   :  { %v3787_v49 = vpop.eup %3786 }
 0x370   :  { %v1636_v51 = vmul.f32 %v3787_v49, %v3785_v35 }
 0x372   :  { %v1673_v45 = vpack.c.bf16 %v1636_v51, %v1636_v51 }
 0x374   :  { %1706 = vmatprep.mubr.bf16.mxu0 %v1673_v45  ;;  %1747 = vmatprep.mubr.bf16.mxu1 %v1673_v45 }
 0x383   :  { %v1561_v34 = vpop.f32.mrb[28].mxu0  ;;  %v1602_v59 = vpop.f32.mrb[28].mxu1 }
 0x384   :  { %v1644_v52 = vadd.f32 %v1561_v34, %v6458_v54  ;;  %v1646_v42 = vadd.f32 %v1602_v59, %v6459_v43  ;;  %v1563_v57 = vpop.f32.mrb[29].mxu0  ;;  %v1604_v61 = vpop.f32.mrb[29].mxu1 }
 0x385   :  { %v1645_v40 = vadd.f32 %v1563_v57, %v6460_v14  ;;  %v1647_v41 = vadd.f32 %v1604_v61, %v6461_v60  ;;  %v1565_v2 = vpop.f32.mrb[30].mxu0  ;;  %v1606_v53 = vpop.f32.mrb[30].mxu1  ;;  %v6465_v60 = vld [vmem:[#allocation96_spill] sm:$0xff] }
 0x386   :  { %v3484_v8 = vmul.f32 -1.442695, %v1644_v52  ;;  %v1566_v37 = vpop.f32.mrb[31].mxu0  ;;  %v1607_v35 = vpop.f32.mrb[31].mxu1  ;;  %v3486_v51 = vmul.f32 -1.442695, %v1646_v42 }
 0x387   :  { %v3485_v49 = vmul.f32 -1.442695, %v1645_v40  ;;  %v6467_v2 = vld [vmem:[#allocation98_spill] sm:$0xff]  ;;  %v6468_v35 = vld [vmem:[#allocation99_spill] sm:$0xff] }
 0x388   :  { %3788 = vpow2.f32 %v3484_v8 }
 0x389   :  { %3790 = vpow2.f32 %v3485_v49  ;;  %v6469_v49 = vld [vmem:[#allocation100_spill] sm:$0xff] }
 0x38a   :  { %3792 = vtanh.f32 %v1647_v41  ;;  %v6466_v41 = vld [vmem:[#allocation97_spill] sm:$0xff] }
 0x38b   :  { %3794 = vpow2.f32 %v3486_v51  ;;  %v6470_v51 = vld [vmem:[#allocation101_spill] sm:$0xff] }
 0x392   :  { %v3789_v0 = vpop.eup %3788 }
 0x393   :  { %v1657_v44 = vadd.f32 1.0, %v3789_v0  ;;  %v3791_v34 = vpop.eup %3790 }
 0x394   :  { %v1658_v59 = vadd.f32 1.0, %v3791_v34  ;;  %v3793_v54 = vpop.eup %3792  ;;  %v6471_v34 = vld [vmem:[#allocation102_spill] sm:$0xff] }
 0x395   :  { %3796 = vrcp.f32 %v1657_v44  ;;  %v3795_v43 = vpop.eup %3794  ;;  %v6462_v44 = vld [vmem:[#allocation93_spill] sm:$0xff] }
 0x396   :  { %3798 = vrcp.f32 %v1658_v59  ;;  %v1659_v52 = vadd.f32 1.0, %v3795_v43  ;;  %v6472_v59 = vld [vmem:[#allocation103_spill] sm:$0xff]  ;;  %v6474_v43 = vld [vmem:[#allocation105_spill] sm:$0xff] }
 0x398   :  { %3800 = vrcp.f32 %v1659_v52  ;;  %v6478_v52 = vld [vmem:[#allocation109_spill] sm:$0xff] }
 0x39f   :  { %v3797_v57 = vpop.eup %3796 }
 0x3a0   :  { %v1668_v61 = vmul.f32 %v3797_v57, %v3793_v54  ;;  %v3799_v53 = vpop.eup %3798  ;;  %v6473_v54 = vld [vmem:[#allocation104_spill] sm:$0xff]  ;;  %v6475_v57 = vld [vmem:[#allocation106_spill] sm:$0xff] }
 0x3a1   :  { %v1667_v37 = vmul.f32 %v3799_v53, %v4744_v15  ;;  %v6463_v15 = vld [vmem:[#allocation94_spill] sm:$0xff]  ;;  %v6477_v53 = vld [vmem:[#allocation108_spill] sm:$0xff] }
 0x3a2   :  { %v3801_v0 = vpop.eup %3800 }
 0x3a3   :  { %v4894_v14 = vadd.f32 %v1668_v61, %v1667_v37  ;;  %v6476_v61 = vld [vmem:[#allocation107_spill] sm:$0xff]  ;;  %v6479_v37 = vld [vmem:[#allocation110_spill] sm:$0xff] }
 0x3a5   :  { %3802 = vtanh.f32 %v4894_v14 }
 0x3af   :  { %v3803_v8 = vpop.eup %3802 }
 0x3b0   :  { %v1671_v42 = vmul.f32 %v3803_v8, %v3801_v0  ;;  %v6480_v0 = vld [vmem:[#allocation111_spill] sm:$0xff]  ;;  %v6481_v8 = vld [vmem:[#allocation112_spill] sm:$0xff] }
 0x3b2   :  { %v4897_v40 = vpack.c.bf16 %v1671_v42, %v1671_v42  ;;  %v6482_v42 = vld [vmem:[#allocation113_spill] sm:$0xff] }
 0x3b4   :  { %1707 = vmatmul.mubr.bf16.vlgmr.msra.gmra.mrb[32].mxu0 %v4897_v40  ;;  %1748 = vmatmul.mubr.bf16.vlgmr.msra.gmra.mrb[32].mxu1 %v4897_v40 }
 0x3b5   :  { %1757 = vmatpush1.bf16.msra.mxu0 %v4400_v22  ;;  %1798 = vmatpush1.bf16.msra.mxu1 %v6366_v13 }
 0x3b6   :  { %1788 = vmatprep.mubr.bf16.mxu0 %v1673_v45  ;;  %1829 = vmatprep.mubr.bf16.mxu1 %v1673_v45  ;;  %v6464_v45 = vld [vmem:[#allocation95_spill] sm:$0xff] }
 0x3b7   :  { %1758 = vmatprep.subr.bf16.mxu0 %v6367_v6  ;;  %1799 = vmatprep.subr.bf16.mxu1 %v6368_v58 }
 0x3b9   :  { %1759 = vmatpush1.bf16.msra.mxu0 %v6369_v31  ;;  %1800 = vmatpush1.bf16.msra.mxu1 %v6370_v4 }
 0x3ba   :  { %1760 = vmatprep.subr.bf16.mxu0 %v6371_v47  ;;  %1801 = vmatprep.subr.bf16.mxu1 %v6372_v39 }
 0x3bd   :  { %1761 = vmatpush1.bf16.msra.mxu0 %v6373_v20  ;;  %1802 = vmatpush1.bf16.msra.mxu1 %v6374_v9 }
 0x3be   :  { %1762 = vmatprep.subr.bf16.mxu0 %v6462_v44  ;;  %1803 = vmatprep.subr.bf16.mxu1 %v6463_v15 }
 0x3c1   :  { %1763 = vmatpush1.bf16.msra.mxu0 %v6464_v45  ;;  %1804 = vmatpush1.bf16.msra.mxu1 %v6465_v60 }
 0x3c2   :  { %1764 = vmatprep.subr.bf16.mxu0 %v6466_v41  ;;  %1805 = vmatprep.subr.bf16.mxu1 %v6467_v2 }
 0x3c5   :  { %1765 = vmatpush1.bf16.msra.mxu0 %v6468_v35  ;;  %1806 = vmatpush1.bf16.msra.mxu1 %v6469_v49 }
 0x3c6   :  { %1766 = vmatprep.subr.bf16.mxu0 %v6470_v51  ;;  %1807 = vmatprep.subr.bf16.mxu1 %v6471_v34 }
 0x3c9   :  { %1767 = vmatpush1.bf16.msra.mxu0 %v6472_v59  ;;  %1808 = vmatpush1.bf16.msra.mxu1 %v6473_v54  ;;  %v6483_v59 = vld [vmem:[#allocation114_spill] sm:$0xff]  ;;  %v6484_v54 = vld [vmem:[#allocation115_spill] sm:$0xff] }
 0x3ca   :  { %1768 = vmatprep.subr.bf16.mxu0 %v6474_v43  ;;  %1809 = vmatprep.subr.bf16.mxu1 %v6475_v57  ;;  %v6485_v43 = vld [vmem:[#allocation116_spill] sm:$0xff]  ;;  %v6486_v57 = vld [vmem:[#allocation117_spill] sm:$0xff] }
 0x3cd   :  { %1769 = vmatpush1.bf16.msra.mxu0 %v6476_v61  ;;  %1810 = vmatpush1.bf16.msra.mxu1 %v6477_v53  ;;  %v6487_v61 = vld [vmem:[#allocation118_spill] sm:$0xff]  ;;  %v6488_v53 = vld [vmem:[#allocation119_spill] sm:$0xff] }
 0x3ce   :  { %1770 = vmatprep.subr.bf16.mxu0 %v6478_v52  ;;  %1811 = vmatprep.subr.bf16.mxu1 %v6479_v37  ;;  %v6489_v37 = vld [vmem:[#allocation121_spill] sm:$0xff] }
 0x3d1   :  { %1771 = vmatpush1.bf16.msra.mxu0 %v6480_v0  ;;  %1812 = vmatpush1.bf16.msra.mxu1 %v6481_v8  ;;  %v6490_v0 = vld [vmem:[#allocation122_spill] sm:$0xff]  ;;  %v6491_v8 = vld [vmem:[#allocation123_spill] sm:$0xff] }
 0x3d2   :  { %1772 = vmatprep.subr.bf16.mxu0 %v6482_v42  ;;  %1813 = vmatprep.subr.bf16.mxu1 %v6483_v59  ;;  %v6492_v42 = vld [vmem:[#allocation124_spill] sm:$0xff] }
 0x3d5   :  { %1773 = vmatpush1.bf16.msra.mxu0 %v6484_v54  ;;  %1814 = vmatpush1.bf16.msra.mxu1 %v6485_v43  ;;  %v6493_v54 = vld [vmem:[#allocation126_spill] sm:$0xff]  ;;  %v6494_v43 = vld [vmem:[#allocation127_spill] sm:$0xff] }
 0x3d6   :  { %1774 = vmatprep.subr.bf16.mxu0 %v6486_v57  ;;  %1815 = vmatprep.subr.bf16.mxu1 %v6487_v61 }
 0x3d9   :  { %1775 = vmatpush1.bf16.msra.mxu0 %v6488_v53  ;;  %1816 = vmatpush1.bf16.msra.mxu1 %v6402_v23 }
 0x3da   :  { %1776 = vmatprep.subr.bf16.mxu0 %v6489_v37  ;;  %1817 = vmatprep.subr.bf16.mxu1 %v6490_v0 }
 0x3dd   :  { %1777 = vmatpush1.bf16.msra.mxu0 %v6491_v8  ;;  %1818 = vmatpush1.bf16.msra.mxu1 %v6492_v42 }
 0x3de   :  { %1778 = vmatprep.subr.bf16.mxu0 %v6407_v36  ;;  %1819 = vmatprep.subr.bf16.mxu1 %v6493_v54 }
 0x3e1   :  { %1779 = vmatpush1.bf16.msra.mxu0 %v6494_v43  ;;  %1820 = vmatpush1.bf16.msra.mxu1 %v6410_v7 }
 0x3e2   :  { %1780 = vmatprep.subr.bf16.mxu0 %v6411_v30  ;;  %1821 = vmatprep.subr.bf16.mxu1 %v6412_v46 }
 0x3e5   :  { %1781 = vmatpush1.bf16.msra.mxu0 %v4553_v3  ;;  %1822 = vmatpush1.bf16.msra.mxu1 %v6413_v28 }
 0x3e6   :  { %1782 = vmatprep.subr.bf16.mxu0 %v6414_v19  ;;  %1823 = vmatprep.subr.bf16.mxu1 %v6415_v55 }
 0x3e9   :  { %1783 = vmatpush1.bf16.msra.mxu0 %v6416_v18  ;;  %1824 = vmatpush1.bf16.msra.mxu1 %v4567_v50 }
 0x3ea   :  { %1784 = vmatprep.subr.bf16.mxu0 %v6417_v5  ;;  %1825 = vmatprep.subr.bf16.mxu1 %v6418_v38 }
 0x3ed   :  { %1785 = vmatpush1.bf16.msra.mxu0 %v4577_v56  ;;  %1826 = vmatpush1.bf16.msra.mxu1 %v4579_v1  ;;  %v6552_v1 = vld [vmem:[#allocation172_spill] sm:$0xff] }
 0x3ee   :  { %1786 = vmatprep.subr.bf16.mxu0 %v4583_v63  ;;  %1827 = vmatprep.subr.bf16.mxu1 %v4585_v29 }
 0x3f1   :  { %1787 = vmatpush1.bf16.msra.mxu0 %v4597_v62  ;;  %1828 = vmatpush1.bf16.msra.mxu1 %v4599_v48  ;;  %v6550_v48 = vld [vmem:[#allocation170_spill] sm:$0xff] }
 0x3f2   :  { %1903 = vmatprep.subr.bf16.mxu0 %v4152_v10  ;;  %1944 = vmatprep.subr.bf16.mxu1 %v4154_v11  ;;  %v6549_v11 = vld [vmem:[#allocation169_spill] sm:$0xff] }
 0x3f4   :  { %1789 = vmatmul.mubr.bf16.vlgmr.msra.gmra.mrb[36].mxu0 %v4897_v40  ;;  %1830 = vmatmul.mubr.bf16.vlgmr.msra.gmra.mrb[36].mxu1 %v4897_v40  ;;  %v6495_v40 = vld [vmem:[#allocation29_spill] sm:$0xff] }
 0x3f5   :  { %1904 = vmatpush1.bf16.msra.mxu0 %v4156_v12  ;;  %1945 = vmatpush1.bf16.msra.mxu1 %v4159_v16  ;;  %v6496_v12 = vld [vmem:[#allocation30_spill] sm:$0xff]  ;;  %v6497_v16 = vld [vmem:[#allocation31_spill] sm:$0xff] }
 0x3f6   :  { %1905 = vmatprep.subr.bf16.mxu0 %v4161_v17  ;;  %1946 = vmatprep.subr.bf16.mxu1 %v4166_v21  ;;  %v6498_v17 = vld [vmem:[#allocation32_spill] sm:$0xff]  ;;  %v6499_v21 = vld [vmem:[#allocation33_spill] sm:$0xff] }
 0x3f9   :  { %1906 = vmatpush1.bf16.msra.mxu0 %v4170_v24  ;;  %1947 = vmatpush1.bf16.msra.mxu1 %v4172_v25  ;;  %v6500_v24 = vld [vmem:[#allocation34_spill] sm:$0xff]  ;;  %v6501_v25 = vld [vmem:[#allocation35_spill] sm:$0xff] }
 0x3fa   :  { %1907 = vmatprep.subr.bf16.mxu0 %v4176_v26  ;;  %1948 = vmatprep.subr.bf16.mxu1 %v4178_v27  ;;  %v6502_v26 = vld [vmem:[#allocation36_spill] sm:$0xff]  ;;  %v6503_v27 = vld [vmem:[#allocation37_spill] sm:$0xff] }
 0x3fd   :  { %1908 = vmatpush1.bf16.msra.mxu0 %v4183_v32  ;;  %1949 = vmatpush1.bf16.msra.mxu1 %v4185_v33  ;;  %v6504_v32 = vld [vmem:[#allocation38_spill] sm:$0xff]  ;;  %v6505_v33 = vld [vmem:[#allocation39_spill] sm:$0xff] }
 0x3fe   :  { %1909 = vmatprep.subr.bf16.mxu0 %v6495_v40  ;;  %1950 = vmatprep.subr.bf16.mxu1 %v6496_v12  ;;  %v6506_v40 = vld [vmem:[#allocation40_spill] sm:$0xff]  ;;  %v6507_v12 = vld [vmem:[#allocation41_spill] sm:$0xff] }
 0x401   :  { %1910 = vmatpush1.bf16.msra.mxu0 %v6497_v16  ;;  %1951 = vmatpush1.bf16.msra.mxu1 %v6498_v17  ;;  %v6508_v16 = vld [vmem:[#allocation42_spill] sm:$0xff]  ;;  %v6509_v17 = vld [vmem:[#allocation43_spill] sm:$0xff] }
 0x402   :  { %1911 = vmatprep.subr.bf16.mxu0 %v6499_v21  ;;  %1952 = vmatprep.subr.bf16.mxu1 %v6500_v24  ;;  %v6510_v21 = vld [vmem:[#allocation44_spill] sm:$0xff]  ;;  %v6511_v24 = vld [vmem:[#allocation45_spill] sm:$0xff] }
 0x405   :  { %1912 = vmatpush1.bf16.msra.mxu0 %v6501_v25  ;;  %1953 = vmatpush1.bf16.msra.mxu1 %v6502_v26  ;;  %v6512_v25 = vld [vmem:[#allocation46_spill] sm:$0xff]  ;;  %v6513_v26 = vld [vmem:[#allocation47_spill] sm:$0xff] }
 0x406   :  { %1913 = vmatprep.subr.bf16.mxu0 %v6503_v27  ;;  %1954 = vmatprep.subr.bf16.mxu1 %v6504_v32  ;;  %v6514_v27 = vld [vmem:[#allocation48_spill] sm:$0xff]  ;;  %v6515_v32 = vld [vmem:[#allocation49_spill] sm:$0xff] }
 0x409   :  { %1914 = vmatpush1.bf16.msra.mxu0 %v6505_v33  ;;  %1955 = vmatpush1.bf16.msra.mxu1 %v6506_v40  ;;  %v6516_v33 = vld [vmem:[#allocation50_spill] sm:$0xff]  ;;  %v6517_v40 = vld [vmem:[#allocation51_spill] sm:$0xff] }
 0x40a   :  { %1915 = vmatprep.subr.bf16.mxu0 %v6507_v12  ;;  %1956 = vmatprep.subr.bf16.mxu1 %v6508_v16  ;;  %v6518_v12 = vld [vmem:[#allocation52_spill] sm:$0xff]  ;;  %v6519_v16 = vld [vmem:[#allocation53_spill] sm:$0xff] }
 0x40d   :  { %1916 = vmatpush1.bf16.msra.mxu0 %v6509_v17  ;;  %1957 = vmatpush1.bf16.msra.mxu1 %v6510_v21  ;;  %v6520_v17 = vld [vmem:[#allocation54_spill] sm:$0xff]  ;;  %v6521_v21 = vld [vmem:[#allocation55_spill] sm:$0xff] }
 0x40e   :  { %1917 = vmatprep.subr.bf16.mxu0 %v6511_v24  ;;  %1958 = vmatprep.subr.bf16.mxu1 %v6512_v25  ;;  %v6522_v24 = vld [vmem:[#allocation56_spill] sm:$0xff]  ;;  %v6523_v25 = vld [vmem:[#allocation57_spill] sm:$0xff] }
 0x411   :  { %1918 = vmatpush1.bf16.msra.mxu0 %v6513_v26  ;;  %1959 = vmatpush1.bf16.msra.mxu1 %v6514_v27  ;;  %v6524_v26 = vld [vmem:[#allocation58_spill] sm:$0xff]  ;;  %v6525_v27 = vld [vmem:[#allocation59_spill] sm:$0xff] }
 0x412   :  { %1919 = vmatprep.subr.bf16.mxu0 %v6515_v32  ;;  %1960 = vmatprep.subr.bf16.mxu1 %v6516_v33  ;;  %v6526_v32 = vld [vmem:[#allocation60_spill] sm:$0xff]  ;;  %v6527_v33 = vld [vmem:[#allocation61_spill] sm:$0xff] }
 0x415   :  { %1920 = vmatpush1.bf16.msra.mxu0 %v6517_v40  ;;  %1961 = vmatpush1.bf16.msra.mxu1 %v6518_v12  ;;  %v6528_v40 = vld [vmem:[#allocation62_spill] sm:$0xff]  ;;  %v6529_v12 = vld [vmem:[#allocation63_spill] sm:$0xff] }
 0x416   :  { %1921 = vmatprep.subr.bf16.mxu0 %v6519_v16  ;;  %1962 = vmatprep.subr.bf16.mxu1 %v6520_v17  ;;  %v6530_v16 = vld [vmem:[#allocation64_spill] sm:$0xff]  ;;  %v6531_v17 = vld [vmem:[#allocation65_spill] sm:$0xff] }
 0x419   :  { %1922 = vmatpush1.bf16.msra.mxu0 %v6521_v21  ;;  %1963 = vmatpush1.bf16.msra.mxu1 %v6522_v24  ;;  %v6532_v21 = vld [vmem:[#allocation66_spill] sm:$0xff]  ;;  %v6533_v24 = vld [vmem:[#allocation67_spill] sm:$0xff] }
 0x41a   :  { %1923 = vmatprep.subr.bf16.mxu0 %v6523_v25  ;;  %1964 = vmatprep.subr.bf16.mxu1 %v6524_v26  ;;  %v6534_v25 = vld [vmem:[#allocation68_spill] sm:$0xff]  ;;  %v6535_v26 = vld [vmem:[#allocation69_spill] sm:$0xff] }
 0x41d   :  { %1924 = vmatpush1.bf16.msra.mxu0 %v6525_v27  ;;  %1965 = vmatpush1.bf16.msra.mxu1 %v6526_v32  ;;  %v6536_v27 = vld [vmem:[#allocation71_spill] sm:$0xff]  ;;  %v6537_v32 = vld [vmem:[#allocation70_spill] sm:$0xff] }
 0x41e   :  { %1925 = vmatprep.subr.bf16.mxu0 %v6527_v33  ;;  %1966 = vmatprep.subr.bf16.mxu1 %v6528_v40  ;;  %v6538_v33 = vld [vmem:[#allocation72_spill] sm:$0xff]  ;;  %v6539_v40 = vld [vmem:[#allocation73_spill] sm:$0xff] }
 0x421   :  { %1926 = vmatpush1.bf16.msra.mxu0 %v6529_v12  ;;  %1967 = vmatpush1.bf16.msra.mxu1 %v6530_v16  ;;  %v6540_v12 = vld [vmem:[#allocation74_spill] sm:$0xff]  ;;  %v6541_v16 = vld [vmem:[#allocation75_spill] sm:$0xff] }
 0x422   :  { %1927 = vmatprep.subr.bf16.mxu0 %v6531_v17  ;;  %1968 = vmatprep.subr.bf16.mxu1 %v6532_v21  ;;  %v6542_v17 = vld [vmem:[#allocation76_spill] sm:$0xff]  ;;  %v6543_v21 = vld [vmem:[#allocation77_spill] sm:$0xff] }
 0x425   :  { %1928 = vmatpush1.bf16.msra.mxu0 %v6533_v24  ;;  %1969 = vmatpush1.bf16.msra.mxu1 %v6534_v25  ;;  %v6544_v24 = vld [vmem:[#allocation78_spill] sm:$0xff]  ;;  %v6545_v25 = vld [vmem:[#allocation79_spill] sm:$0xff] }
 0x426   :  { %1929 = vmatprep.subr.bf16.mxu0 %v6535_v26  ;;  %1970 = vmatprep.subr.bf16.mxu1 %v6536_v27  ;;  %v6546_v26 = vld [vmem:[#allocation80_spill] sm:$0xff]  ;;  %v6547_v27 = vld [vmem:[#allocation81_spill] sm:$0xff] }
 0x429   :  { %1930 = vmatpush1.bf16.msra.mxu0 %v6537_v32  ;;  %1971 = vmatpush1.bf16.msra.mxu1 %v6538_v33  ;;  %v6548_v32 = vld [vmem:[#allocation82_spill] sm:$0xff] }
 0x42a   :  { %1931 = vmatprep.subr.bf16.mxu0 %v6539_v40  ;;  %1972 = vmatprep.subr.bf16.mxu1 %v6540_v12 }
 0x42d   :  { %1932 = vmatpush1.bf16.msra.mxu0 %v6541_v16  ;;  %1973 = vmatpush1.bf16.msra.mxu1 %v6542_v17 }
 0x42e   :  { %1933 = vmatprep.subr.bf16.mxu0 %v6543_v21  ;;  %1974 = vmatprep.subr.bf16.mxu1 %v6544_v24 }
 0x431   :  { %1934 = vmatpush1.bf16.msra.mxu0 %v6545_v25  ;;  %1975 = vmatpush1.bf16.msra.mxu1 %v6546_v26  ;;  %v6551_v26 = vld [vmem:[#allocation171_spill] sm:$0xff] }
 0x432   :  { %1985 = vmatprep.subr.bf16.mxu0 %v6547_v27  ;;  %2026 = vmatprep.subr.bf16.mxu1 %v6548_v32 }
 0x487   :  { %v1708_v33 = vpop.f32.mrb[32].mxu0  ;;  %v1749_v40 = vpop.f32.mrb[32].mxu1 }
 0x488   :  { %v1838_v12 = vadd.f32 %v1708_v33, %v6549_v11  ;;  %v1710_v10 = vpop.f32.mrb[33].mxu0  ;;  %v1751_v16 = vpop.f32.mrb[33].mxu1  ;;  %v1840_v27 = vadd.f32 %v1749_v40, %v6551_v26 }
 0x489   :  { %v1839_v17 = vadd.f32 %v1710_v10, %v6550_v48  ;;  %v1712_v62 = vpop.f32.mrb[34].mxu0  ;;  %v1753_v21 = vpop.f32.mrb[34].mxu1  ;;  %v1841_v32 = vadd.f32 %v1751_v16, %v6552_v1 }
 0x48a   :  { %v3487_v29 = vmul.f32 -1.442695, %v1838_v12  ;;  %v1713_v24 = vpop.f32.mrb[35].mxu0  ;;  %v1754_v63 = vpop.f32.mrb[35].mxu1  ;;  %v3489_v56 = vmul.f32 -1.442695, %v1840_v27 }
 0x48b   :  { %v3488_v25 = vmul.f32 -1.442695, %v1839_v17 }
 0x48c   :  { %3804 = vpow2.f32 %v3487_v29 }
 0x48d   :  { %3806 = vpow2.f32 %v3488_v25  ;;  %v6553_v25 = vld [vmem:[#allocation84_spill] sm:$0xff] }
 0x48e   :  { %3808 = vtanh.f32 %v1841_v32 }
 0x48f   :  { %3810 = vpow2.f32 %v3489_v56 }
 0x496   :  { %v3805_v38 = vpop.eup %3804 }
 0x497   :  { %v1851_v5 = vadd.f32 1.0, %v3805_v38  ;;  %v3807_v33 = vpop.eup %3806 }
 0x498   :  { %v1852_v10 = vadd.f32 1.0, %v3807_v33  ;;  %v3809_v21 = vpop.eup %3808  ;;  %v6555_v33 = vld [vmem:[#allocation149_spill] sm:$0xff] }
 0x499   :  { %3812 = vrcp.f32 %v1851_v5  ;;  %v3811_v12 = vpop.eup %3810 }
 0x49a   :  { %3814 = vrcp.f32 %v1852_v10  ;;  %v1853_v29 = vadd.f32 1.0, %v3811_v12 }
 0x49c   :  { %3816 = vrcp.f32 %v1853_v29 }
 0x4a3   :  { %v3813_v24 = vpop.eup %3812 }
 0x4a4   :  { %v1862_v63 = vmul.f32 %v3813_v24, %v3809_v21  ;;  %v3815_v17 = vpop.eup %3814  ;;  %v6556_v21 = vld [vmem:[#allocation151_spill] sm:$0xff] }
 0x4a5   :  { %v1861_v62 = vmul.f32 %v3815_v17, %v6553_v25  ;;  %v6557_v17 = vld [vmem:[#allocation150_spill] sm:$0xff]  ;;  %v6558_v25 = vld [vmem:[#allocation152_spill] sm:$0xff] }
 0x4a6   :  { %v3817_v16 = vpop.eup %3816 }
 0x4a7   :  { %v5036_v40 = vadd.f32 %v1862_v63, %v1861_v62 }
 0x4a9   :  { %6554 = vst [vmem:[#allocation83_spill] sm:$0xff] %v5036_v40  ;;  %3818 = vtanh.f32 %v5036_v40 }
 0x4b3   :  { %v3819_v27 = vpop.eup %3818 }
 0x4b4   :  { %v1865_v32 = vmul.f32 %v3819_v27, %v3817_v16 }
 0x4b6   :  { %v1902_v56 = vpack.c.bf16 %v1865_v32, %v1865_v32 }
 0x4b8   :  { %1935 = vmatprep.mubr.bf16.mxu0 %v1902_v56  ;;  %1976 = vmatprep.mubr.bf16.mxu1 %v1902_v56 }
 0x4c7   :  { %v1790_v5 = vpop.f32.mrb[36].mxu0  ;;  %v1831_v38 = vpop.f32.mrb[36].mxu1 }
 0x4c8   :  { %v1873_v10 = vadd.f32 %v1790_v5, %v6555_v33  ;;  %v1875_v24 = vadd.f32 %v1831_v38, %v6556_v21  ;;  %v1792_v12 = vpop.f32.mrb[37].mxu0  ;;  %v1833_v1 = vpop.f32.mrb[37].mxu1 }
 0x4c9   :  { %v1874_v63 = vadd.f32 %v1792_v12, %v6557_v17  ;;  %v1876_v29 = vadd.f32 %v1833_v1, %v6558_v25  ;;  %v1794_v62 = vpop.f32.mrb[38].mxu0  ;;  %v1835_v40 = vpop.f32.mrb[38].mxu1  ;;  %v6562_v25 = vld [vmem:[#allocation106_spill] sm:$0xff] }
 0x4ca   :  { %v3490_v26 = vmul.f32 -1.442695, %v1873_v10  ;;  %v1795_v48 = vpop.f32.mrb[39].mxu0  ;;  %v1836_v16 = vpop.f32.mrb[39].mxu1  ;;  %v3492_v32 = vmul.f32 -1.442695, %v1875_v24 }
 0x4cb   :  { %v3491_v27 = vmul.f32 -1.442695, %v1874_v63  ;;  %v6564_v62 = vld [vmem:[#allocation108_spill] sm:$0xff]  ;;  %v6565_v16 = vld [vmem:[#allocation110_spill] sm:$0xff] }
 0x4cc   :  { %3820 = vpow2.f32 %v3490_v26 }
 0x4cd   :  { %3822 = vpow2.f32 %v3491_v27  ;;  %v6566_v27 = vld [vmem:[#allocation111_spill] sm:$0xff] }
 0x4ce   :  { %3824 = vtanh.f32 %v1876_v29  ;;  %v6563_v29 = vld [vmem:[#allocation107_spill] sm:$0xff] }
 0x4cf   :  { %3826 = vpow2.f32 %v3492_v32  ;;  %v6567_v32 = vld [vmem:[#allocation112_spill] sm:$0xff] }
 0x4d6   :  { %v3821_v11 = vpop.eup %3820 }
 0x4d7   :  { %v1886_v50 = vadd.f32 1.0, %v3821_v11  ;;  %v3823_v5 = vpop.eup %3822 }
 0x4d8   :  { %v1887_v38 = vadd.f32 1.0, %v3823_v5  ;;  %v3825_v33 = vpop.eup %3824  ;;  %v6568_v5 = vld [vmem:[#allocation113_spill] sm:$0xff] }
 0x4d9   :  { %3828 = vrcp.f32 %v1886_v50  ;;  %v3827_v21 = vpop.eup %3826  ;;  %v6559_v50 = vld [vmem:[#allocation103_spill] sm:$0xff] }
 0x4da   :  { %3830 = vrcp.f32 %v1887_v38  ;;  %v1888_v10 = vadd.f32 1.0, %v3827_v21  ;;  %v6569_v38 = vld [vmem:[#allocation115_spill] sm:$0xff]  ;;  %v6571_v21 = vld [vmem:[#allocation136_spill] sm:$0xff] }
 0x4dc   :  { %3832 = vrcp.f32 %v1888_v10  ;;  %v6575_v10 = vld [vmem:[#allocation140_spill] sm:$0xff] }
 0x4e3   :  { %v3829_v1 = vpop.eup %3828 }
 0x4e4   :  { %v1897_v12 = vmul.f32 %v3829_v1, %v3825_v33  ;;  %v3831_v40 = vpop.eup %3830  ;;  %v6570_v33 = vld [vmem:[#allocation116_spill] sm:$0xff]  ;;  %v6572_v1 = vld [vmem:[#allocation137_spill] sm:$0xff] }
 0x4e5   :  { %v1896_v48 = vmul.f32 %v3831_v40, %v4894_v14  ;;  %v6560_v14 = vld [vmem:[#allocation104_spill] sm:$0xff]  ;;  %v6574_v40 = vld [vmem:[#allocation139_spill] sm:$0xff] }
 0x4e6   :  { %v3833_v11 = vpop.eup %3832 }
 0x4e7   :  { %v5044_v17 = vadd.f32 %v1897_v12, %v1896_v48  ;;  %v6573_v12 = vld [vmem:[#allocation138_spill] sm:$0xff]  ;;  %v6576_v48 = vld [vmem:[#allocation141_spill] sm:$0xff] }
 0x4e9   :  { %3834 = vtanh.f32 %v5044_v17 }
 0x4f3   :  { %v3835_v26 = vpop.eup %3834 }
 0x4f4   :  { %v1900_v24 = vmul.f32 %v3835_v26, %v3833_v11  ;;  %v6577_v11 = vld [vmem:[#allocation142_spill] sm:$0xff]  ;;  %v6578_v26 = vld [vmem:[#allocation143_spill] sm:$0xff] }
 0x4f6   :  { %v5047_v63 = vpack.c.bf16 %v1900_v24, %v1900_v24  ;;  %v6579_v24 = vld [vmem:[#allocation144_spill] sm:$0xff] }
 0x4f8   :  { %1936 = vmatmul.mubr.bf16.vlgmr.msra.gmra.mrb[40].mxu0 %v5047_v63  ;;  %1977 = vmatmul.mubr.bf16.vlgmr.msra.gmra.mrb[40].mxu1 %v5047_v63 }
 0x4f9   :  { %1986 = vmatpush1.bf16.msra.mxu0 %v4400_v22  ;;  %2027 = vmatpush1.bf16.msra.mxu1 %v6366_v13 }
 0x4fa   :  { %2017 = vmatprep.mubr.bf16.mxu0 %v1902_v56  ;;  %2058 = vmatprep.mubr.bf16.mxu1 %v1902_v56  ;;  %v6561_v56 = vld [vmem:[#allocation105_spill] sm:$0xff] }
 0x4fb   :  { %1987 = vmatprep.subr.bf16.mxu0 %v6367_v6  ;;  %2028 = vmatprep.subr.bf16.mxu1 %v6368_v58 }
 0x4fd   :  { %1988 = vmatpush1.bf16.msra.mxu0 %v6369_v31  ;;  %2029 = vmatpush1.bf16.msra.mxu1 %v6370_v4 }
 0x4fe   :  { %1989 = vmatprep.subr.bf16.mxu0 %v6371_v47  ;;  %2030 = vmatprep.subr.bf16.mxu1 %v6372_v39 }
 0x501   :  { %1990 = vmatpush1.bf16.msra.mxu0 %v6373_v20  ;;  %2031 = vmatpush1.bf16.msra.mxu1 %v6374_v9 }
 0x502   :  { %1991 = vmatprep.subr.bf16.mxu0 %v6462_v44  ;;  %2032 = vmatprep.subr.bf16.mxu1 %v6463_v15 }
 0x505   :  { %1992 = vmatpush1.bf16.msra.mxu0 %v6464_v45  ;;  %2033 = vmatpush1.bf16.msra.mxu1 %v6465_v60 }
 0x506   :  { %1993 = vmatprep.subr.bf16.mxu0 %v6466_v41  ;;  %2034 = vmatprep.subr.bf16.mxu1 %v6467_v2 }
 0x509   :  { %1994 = vmatpush1.bf16.msra.mxu0 %v6468_v35  ;;  %2035 = vmatpush1.bf16.msra.mxu1 %v6469_v49 }
 0x50a   :  { %1995 = vmatprep.subr.bf16.mxu0 %v6470_v51  ;;  %2036 = vmatprep.subr.bf16.mxu1 %v6471_v34 }
 0x50d   :  { %1996 = vmatpush1.bf16.msra.mxu0 %v6559_v50  ;;  %2037 = vmatpush1.bf16.msra.mxu1 %v6560_v14 }
 0x50e   :  { %1997 = vmatprep.subr.bf16.mxu0 %v6561_v56  ;;  %2038 = vmatprep.subr.bf16.mxu1 %v6562_v25 }
 0x511   :  { %1998 = vmatpush1.bf16.msra.mxu0 %v6563_v29  ;;  %2039 = vmatpush1.bf16.msra.mxu1 %v6564_v62 }
 0x512   :  { %1999 = vmatprep.subr.bf16.mxu0 %v6478_v52  ;;  %2040 = vmatprep.subr.bf16.mxu1 %v6565_v16 }
 0x515   :  { %2000 = vmatpush1.bf16.msra.mxu0 %v6566_v27  ;;  %2041 = vmatpush1.bf16.msra.mxu1 %v6567_v32 }
 0x516   :  { %2001 = vmatprep.subr.bf16.mxu0 %v6568_v5  ;;  %2042 = vmatprep.subr.bf16.mxu1 %v6483_v59 }
 0x519   :  { %2002 = vmatpush1.bf16.msra.mxu0 %v6569_v38  ;;  %2043 = vmatpush1.bf16.msra.mxu1 %v6570_v33 }
 0x51a   :  { %2003 = vmatprep.subr.bf16.mxu0 %v6486_v57  ;;  %2044 = vmatprep.subr.bf16.mxu1 %v6487_v61 }
 0x51d   :  { %2004 = vmatpush1.bf16.msra.mxu0 %v6488_v53  ;;  %2045 = vmatpush1.bf16.msra.mxu1 %v6402_v23 }
 0x51e   :  { %2005 = vmatprep.subr.bf16.mxu0 %v6489_v37  ;;  %2046 = vmatprep.subr.bf16.mxu1 %v6490_v0 }
 0x521   :  { %2006 = vmatpush1.bf16.msra.mxu0 %v6491_v8  ;;  %2047 = vmatpush1.bf16.msra.mxu1 %v6492_v42 }
 0x522   :  { %2007 = vmatprep.subr.bf16.mxu0 %v6407_v36  ;;  %2048 = vmatprep.subr.bf16.mxu1 %v6493_v54 }
 0x525   :  { %2008 = vmatpush1.bf16.msra.mxu0 %v6494_v43  ;;  %2049 = vmatpush1.bf16.msra.mxu1 %v6410_v7  ;;  %v6649_v7 = vld [vmem:[#allocation172_spill] sm:$0xff] }
 0x526   :  { %2009 = vmatprep.subr.bf16.mxu0 %v6411_v30  ;;  %2050 = vmatprep.subr.bf16.mxu1 %v6412_v46 }
 0x529   :  { %2010 = vmatpush1.bf16.msra.mxu0 %v4553_v3  ;;  %2051 = vmatpush1.bf16.msra.mxu1 %v6413_v28  ;;  %v6647_v28 = vld [vmem:[#allocation170_spill] sm:$0xff] }
 0x52a   :  { %2011 = vmatprep.subr.bf16.mxu0 %v6414_v19  ;;  %2052 = vmatprep.subr.bf16.mxu1 %v6415_v55  ;;  %v6580_v55 = vld [vmem:[#allocation17_spill] sm:$0xff] }
 0x52d   :  { %2012 = vmatpush1.bf16.msra.mxu0 %v6416_v18  ;;  %2053 = vmatpush1.bf16.msra.mxu1 %v6571_v21  ;;  %v6581_v18 = vld [vmem:[#allocation18_spill] sm:$0xff]  ;;  %v6646_v21 = vld [vmem:[#allocation169_spill] sm:$0xff] }
 0x52e   :  { %2013 = vmatprep.subr.bf16.mxu0 %v6572_v1  ;;  %2054 = vmatprep.subr.bf16.mxu1 %v6573_v12  ;;  %v6582_v12 = vld [vmem:[#allocation19_spill] sm:$0xff]  ;;  %v6591_v1 = vld [vmem:[#allocation28_spill] sm:$0xff] }
 0x531   :  { %2014 = vmatpush1.bf16.msra.mxu0 %v6574_v40  ;;  %2055 = vmatpush1.bf16.msra.mxu1 %v6575_v10  ;;  %v6583_v40 = vld [vmem:[#allocation20_spill] sm:$0xff]  ;;  %v6584_v10 = vld [vmem:[#allocation21_spill] sm:$0xff] }
 0x532   :  { %2015 = vmatprep.subr.bf16.mxu0 %v6576_v48  ;;  %2056 = vmatprep.subr.bf16.mxu1 %v6577_v11  ;;  %v6585_v48 = vld [vmem:[#allocation22_spill] sm:$0xff]  ;;  %v6586_v11 = vld [vmem:[#allocation23_spill] sm:$0xff] }
 0x535   :  { %2016 = vmatpush1.bf16.msra.mxu0 %v6578_v26  ;;  %2057 = vmatpush1.bf16.msra.mxu1 %v6579_v24  ;;  %v6587_v26 = vld [vmem:[#allocation24_spill] sm:$0xff]  ;;  %v6588_v24 = vld [vmem:[#allocation25_spill] sm:$0xff] }
 0x536   :  { %2132 = vmatprep.subr.bf16.mxu0 %v6580_v55  ;;  %2173 = vmatprep.subr.bf16.mxu1 %v6581_v18  ;;  %v6589_v55 = vld [vmem:[#allocation26_spill] sm:$0xff]  ;;  %v6590_v18 = vld [vmem:[#allocation27_spill] sm:$0xff] }
 0x538   :  { %2018 = vmatmul.mubr.bf16.vlgmr.msra.gmra.mrb[44].mxu0 %v5047_v63  ;;  %2059 = vmatmul.mubr.bf16.vlgmr.msra.gmra.mrb[44].mxu1 %v5047_v63  ;;  %v6592_v63 = vld [vmem:[#allocation29_spill] sm:$0xff] }
 0x539   :  { %2133 = vmatpush1.bf16.msra.mxu0 %v6582_v12  ;;  %2174 = vmatpush1.bf16.msra.mxu1 %v6583_v40  ;;  %v6593_v12 = vld [vmem:[#allocation30_spill] sm:$0xff]  ;;  %v6594_v40 = vld [vmem:[#allocation31_spill] sm:$0xff] }
 0x53a   :  { %2134 = vmatprep.subr.bf16.mxu0 %v6584_v10  ;;  %2175 = vmatprep.subr.bf16.mxu1 %v6585_v48  ;;  %v6595_v10 = vld [vmem:[#allocation32_spill] sm:$0xff]  ;;  %v6596_v48 = vld [vmem:[#allocation33_spill] sm:$0xff] }
 0x53d   :  { %2135 = vmatpush1.bf16.msra.mxu0 %v6586_v11  ;;  %2176 = vmatpush1.bf16.msra.mxu1 %v6587_v26  ;;  %v6597_v11 = vld [vmem:[#allocation34_spill] sm:$0xff]  ;;  %v6598_v26 = vld [vmem:[#allocation35_spill] sm:$0xff] }
 0x53e   :  { %2136 = vmatprep.subr.bf16.mxu0 %v6588_v24  ;;  %2177 = vmatprep.subr.bf16.mxu1 %v6589_v55  ;;  %v6599_v24 = vld [vmem:[#allocation36_spill] sm:$0xff]  ;;  %v6600_v55 = vld [vmem:[#allocation37_spill] sm:$0xff] }
 0x541   :  { %2137 = vmatpush1.bf16.msra.mxu0 %v6590_v18  ;;  %2178 = vmatpush1.bf16.msra.mxu1 %v6591_v1  ;;  %v6601_v18 = vld [vmem:[#allocation38_spill] sm:$0xff]  ;;  %v6602_v1 = vld [vmem:[#allocation39_spill] sm:$0xff] }
 0x542   :  { %2138 = vmatprep.subr.bf16.mxu0 %v6592_v63  ;;  %2179 = vmatprep.subr.bf16.mxu1 %v6593_v12  ;;  %v6603_v63 = vld [vmem:[#allocation40_spill] sm:$0xff]  ;;  %v6604_v12 = vld [vmem:[#allocation41_spill] sm:$0xff] }
 0x545   :  { %2139 = vmatpush1.bf16.msra.mxu0 %v6594_v40  ;;  %2180 = vmatpush1.bf16.msra.mxu1 %v6595_v10  ;;  %v6605_v40 = vld [vmem:[#allocation42_spill] sm:$0xff]  ;;  %v6606_v10 = vld [vmem:[#allocation43_spill] sm:$0xff] }
 0x546   :  { %2140 = vmatprep.subr.bf16.mxu0 %v6596_v48  ;;  %2181 = vmatprep.subr.bf16.mxu1 %v6597_v11  ;;  %v6607_v48 = vld [vmem:[#allocation44_spill] sm:$0xff]  ;;  %v6608_v11 = vld [vmem:[#allocation45_spill] sm:$0xff] }
 0x549   :  { %2141 = vmatpush1.bf16.msra.mxu0 %v6598_v26  ;;  %2182 = vmatpush1.bf16.msra.mxu1 %v6599_v24  ;;  %v6609_v26 = vld [vmem:[#allocation46_spill] sm:$0xff]  ;;  %v6610_v24 = vld [vmem:[#allocation47_spill] sm:$0xff] }
 0x54a   :  { %2142 = vmatprep.subr.bf16.mxu0 %v6600_v55  ;;  %2183 = vmatprep.subr.bf16.mxu1 %v6601_v18  ;;  %v6611_v55 = vld [vmem:[#allocation48_spill] sm:$0xff]  ;;  %v6612_v18 = vld [vmem:[#allocation49_spill] sm:$0xff] }
 0x54d   :  { %2143 = vmatpush1.bf16.msra.mxu0 %v6602_v1  ;;  %2184 = vmatpush1.bf16.msra.mxu1 %v6603_v63  ;;  %v6613_v1 = vld [vmem:[#allocation50_spill] sm:$0xff]  ;;  %v6614_v63 = vld [vmem:[#allocation51_spill] sm:$0xff] }
 0x54e   :  { %2144 = vmatprep.subr.bf16.mxu0 %v6604_v12  ;;  %2185 = vmatprep.subr.bf16.mxu1 %v6605_v40  ;;  %v6615_v12 = vld [vmem:[#allocation52_spill] sm:$0xff]  ;;  %v6616_v40 = vld [vmem:[#allocation53_spill] sm:$0xff] }
 0x551   :  { %2145 = vmatpush1.bf16.msra.mxu0 %v6606_v10  ;;  %2186 = vmatpush1.bf16.msra.mxu1 %v6607_v48  ;;  %v6617_v10 = vld [vmem:[#allocation54_spill] sm:$0xff]  ;;  %v6618_v48 = vld [vmem:[#allocation55_spill] sm:$0xff] }
 0x552   :  { %2146 = vmatprep.subr.bf16.mxu0 %v6608_v11  ;;  %2187 = vmatprep.subr.bf16.mxu1 %v6609_v26  ;;  %v6619_v11 = vld [vmem:[#allocation56_spill] sm:$0xff]  ;;  %v6620_v26 = vld [vmem:[#allocation57_spill] sm:$0xff] }
 0x555   :  { %2147 = vmatpush1.bf16.msra.mxu0 %v6610_v24  ;;  %2188 = vmatpush1.bf16.msra.mxu1 %v6611_v55  ;;  %v6621_v24 = vld [vmem:[#allocation58_spill] sm:$0xff]  ;;  %v6622_v55 = vld [vmem:[#allocation59_spill] sm:$0xff] }
 0x556   :  { %2148 = vmatprep.subr.bf16.mxu0 %v6612_v18  ;;  %2189 = vmatprep.subr.bf16.mxu1 %v6613_v1  ;;  %v6623_v18 = vld [vmem:[#allocation60_spill] sm:$0xff]  ;;  %v6624_v1 = vld [vmem:[#allocation61_spill] sm:$0xff] }
 0x559   :  { %2149 = vmatpush1.bf16.msra.mxu0 %v6614_v63  ;;  %2190 = vmatpush1.bf16.msra.mxu1 %v6615_v12  ;;  %v6625_v63 = vld [vmem:[#allocation62_spill] sm:$0xff]  ;;  %v6626_v12 = vld [vmem:[#allocation63_spill] sm:$0xff] }
 0x55a   :  { %2150 = vmatprep.subr.bf16.mxu0 %v6616_v40  ;;  %2191 = vmatprep.subr.bf16.mxu1 %v6617_v10  ;;  %v6627_v40 = vld [vmem:[#allocation64_spill] sm:$0xff]  ;;  %v6628_v10 = vld [vmem:[#allocation65_spill] sm:$0xff] }
 0x55d   :  { %2151 = vmatpush1.bf16.msra.mxu0 %v6618_v48  ;;  %2192 = vmatpush1.bf16.msra.mxu1 %v6619_v11  ;;  %v6629_v48 = vld [vmem:[#allocation66_spill] sm:$0xff]  ;;  %v6630_v11 = vld [vmem:[#allocation67_spill] sm:$0xff] }
 0x55e   :  { %2152 = vmatprep.subr.bf16.mxu0 %v6620_v26  ;;  %2193 = vmatprep.subr.bf16.mxu1 %v6621_v24  ;;  %v6631_v26 = vld [vmem:[#allocation68_spill] sm:$0xff]  ;;  %v6632_v24 = vld [vmem:[#allocation69_spill] sm:$0xff] }
 0x561   :  { %2153 = vmatpush1.bf16.msra.mxu0 %v6622_v55  ;;  %2194 = vmatpush1.bf16.msra.mxu1 %v6623_v18  ;;  %v6633_v55 = vld [vmem:[#allocation71_spill] sm:$0xff]  ;;  %v6634_v18 = vld [vmem:[#allocation70_spill] sm:$0xff] }
 0x562   :  { %2154 = vmatprep.subr.bf16.mxu0 %v6624_v1  ;;  %2195 = vmatprep.subr.bf16.mxu1 %v6625_v63  ;;  %v6635_v1 = vld [vmem:[#allocation72_spill] sm:$0xff]  ;;  %v6636_v63 = vld [vmem:[#allocation73_spill] sm:$0xff] }
 0x565   :  { %2155 = vmatpush1.bf16.msra.mxu0 %v6626_v12  ;;  %2196 = vmatpush1.bf16.msra.mxu1 %v6627_v40  ;;  %v6637_v12 = vld [vmem:[#allocation74_spill] sm:$0xff]  ;;  %v6638_v40 = vld [vmem:[#allocation75_spill] sm:$0xff] }
 0x566   :  { %2156 = vmatprep.subr.bf16.mxu0 %v6628_v10  ;;  %2197 = vmatprep.subr.bf16.mxu1 %v6629_v48  ;;  %v6639_v10 = vld [vmem:[#allocation76_spill] sm:$0xff]  ;;  %v6640_v48 = vld [vmem:[#allocation77_spill] sm:$0xff] }
 0x569   :  { %2157 = vmatpush1.bf16.msra.mxu0 %v6630_v11  ;;  %2198 = vmatpush1.bf16.msra.mxu1 %v6631_v26  ;;  %v6641_v11 = vld [vmem:[#allocation78_spill] sm:$0xff]  ;;  %v6642_v26 = vld [vmem:[#allocation79_spill] sm:$0xff] }
 0x56a   :  { %2158 = vmatprep.subr.bf16.mxu0 %v6632_v24  ;;  %2199 = vmatprep.subr.bf16.mxu1 %v6633_v55  ;;  %v6643_v24 = vld [vmem:[#allocation80_spill] sm:$0xff]  ;;  %v6644_v55 = vld [vmem:[#allocation81_spill] sm:$0xff] }
 0x56d   :  { %2159 = vmatpush1.bf16.msra.mxu0 %v6634_v18  ;;  %2200 = vmatpush1.bf16.msra.mxu1 %v6635_v1  ;;  %v6645_v18 = vld [vmem:[#allocation82_spill] sm:$0xff] }
 0x56e   :  { %2160 = vmatprep.subr.bf16.mxu0 %v6636_v63  ;;  %2201 = vmatprep.subr.bf16.mxu1 %v6637_v12 }
 0x571   :  { %2161 = vmatpush1.bf16.msra.mxu0 %v6638_v40  ;;  %2202 = vmatpush1.bf16.msra.mxu1 %v6639_v10 }
 0x572   :  { %2162 = vmatprep.subr.bf16.mxu0 %v6640_v48  ;;  %2203 = vmatprep.subr.bf16.mxu1 %v6641_v11 }
 0x575   :  { %2163 = vmatpush1.bf16.msra.mxu0 %v6642_v26  ;;  %2204 = vmatpush1.bf16.msra.mxu1 %v6643_v24  ;;  %v6648_v24 = vld [vmem:[#allocation171_spill] sm:$0xff] }
 0x576   :  { %2214 = vmatprep.subr.bf16.mxu0 %v6644_v55  ;;  %2255 = vmatprep.subr.bf16.mxu1 %v6645_v18 }
 0x5cb   :  { %v1937_v1 = vpop.f32.mrb[40].mxu0  ;;  %v1978_v63 = vpop.f32.mrb[40].mxu1 }
 0x5cc   :  { %v2067_v12 = vadd.f32 %v1937_v1, %v6646_v21  ;;  %v1939_v19 = vpop.f32.mrb[41].mxu0  ;;  %v1980_v40 = vpop.f32.mrb[41].mxu1  ;;  %v2069_v55 = vadd.f32 %v1978_v63, %v6648_v24 }
 0x5cd   :  { %v2068_v10 = vadd.f32 %v1939_v19, %v6647_v28  ;;  %v1941_v3 = vpop.f32.mrb[42].mxu0  ;;  %v1982_v48 = vpop.f32.mrb[42].mxu1  ;;  %v2070_v18 = vadd.f32 %v1980_v40, %v6649_v7 }
 0x5ce   :  { %v3493_v46 = vmul.f32 -1.442695, %v2067_v12  ;;  %v1942_v11 = vpop.f32.mrb[43].mxu0  ;;  %v1983_v30 = vpop.f32.mrb[43].mxu1  ;;  %v3495_v43 = vmul.f32 -1.442695, %v2069_v55 }
 0x5cf   :  { %v3494_v26 = vmul.f32 -1.442695, %v2068_v10  ;;  %v6650_v11 = vld [vmem:[#allocation83_spill] sm:$0xff] }
 0x5d0   :  { %3836 = vpow2.f32 %v3493_v46 }
 0x5d1   :  { %3838 = vpow2.f32 %v3494_v26 }
 0x5d2   :  { %3840 = vtanh.f32 %v2070_v18 }
 0x5d3   :  { %3842 = vpow2.f32 %v3495_v43 }
 0x5da   :  { %v3837_v54 = vpop.eup %3836 }
 0x5db   :  { %v2080_v36 = vadd.f32 1.0, %v3837_v54  ;;  %v3839_v1 = vpop.eup %3838 }
 0x5dc   :  { %v2081_v19 = vadd.f32 1.0, %v3839_v1  ;;  %v3841_v3 = vpop.eup %3840  ;;  %v6652_v1 = vld [vmem:[#allocation153_spill] sm:$0xff] }
 0x5dd   :  { %3844 = vrcp.f32 %v2080_v36  ;;  %v3843_v12 = vpop.eup %3842 }
 0x5de   :  { %3846 = vrcp.f32 %v2081_v19  ;;  %v2082_v46 = vadd.f32 1.0, %v3843_v12 }
 0x5e0   :  { %3848 = vrcp.f32 %v2082_v46 }
 0x5e7   :  { %v3845_v48 = vpop.eup %3844 }
 0x5e8   :  { %v2091_v30 = vmul.f32 %v3845_v48, %v3841_v3  ;;  %v3847_v10 = vpop.eup %3846  ;;  %v6653_v3 = vld [vmem:[#allocation155_spill] sm:$0xff] }
 0x5e9   :  { %v2090_v26 = vmul.f32 %v3847_v10, %v6650_v11  ;;  %v6654_v10 = vld [vmem:[#allocation154_spill] sm:$0xff]  ;;  %v6655_v11 = vld [vmem:[#allocation156_spill] sm:$0xff] }
 0x5ea   :  { %v3849_v55 = vpop.eup %3848 }
 0x5eb   :  { %v5186_v63 = vadd.f32 %v2091_v30, %v2090_v26 }
 0x5ed   :  { %6651 = vst [vmem:[#allocation85_spill] sm:$0xff] %v5186_v63  ;;  %3850 = vtanh.f32 %v5186_v63 }
 0x5f7   :  { %v3851_v18 = vpop.eup %3850 }
 0x5f8   :  { %v2094_v54 = vmul.f32 %v3851_v18, %v3849_v55 }
 0x5fa   :  { %v2131_v43 = vpack.c.bf16 %v2094_v54, %v2094_v54 }
 0x5fc   :  { %2164 = vmatprep.mubr.bf16.mxu0 %v2131_v43  ;;  %2205 = vmatprep.mubr.bf16.mxu1 %v2131_v43 }
 0x60b   :  { %v2019_v36 = vpop.f32.mrb[44].mxu0  ;;  %v2060_v40 = vpop.f32.mrb[44].mxu1 }
 0x60c   :  { %v2102_v19 = vadd.f32 %v2019_v36, %v6652_v1  ;;  %v2104_v48 = vadd.f32 %v2060_v40, %v6653_v3  ;;  %v2021_v12 = vpop.f32.mrb[45].mxu0  ;;  %v2062_v7 = vpop.f32.mrb[45].mxu1 }
 0x60d   :  { %v2103_v30 = vadd.f32 %v2021_v12, %v6654_v10  ;;  %v2105_v46 = vadd.f32 %v2062_v7, %v6655_v11  ;;  %v2023_v26 = vpop.f32.mrb[46].mxu0  ;;  %v2064_v63 = vpop.f32.mrb[46].mxu1  ;;  %v6659_v11 = vld [vmem:[#allocation127_spill] sm:$0xff] }
 0x60e   :  { %v3496_v24 = vmul.f32 -1.442695, %v2102_v19  ;;  %v2024_v28 = vpop.f32.mrb[47].mxu0  ;;  %v2065_v55 = vpop.f32.mrb[47].mxu1  ;;  %v3498_v54 = vmul.f32 -1.442695, %v2104_v48 }
 0x60f   :  { %v3497_v18 = vmul.f32 -1.442695, %v2103_v30  ;;  %v6661_v26 = vld [vmem:[#allocation129_spill] sm:$0xff]  ;;  %v6662_v55 = vld [vmem:[#allocation130_spill] sm:$0xff] }
 0x610   :  { %3852 = vpow2.f32 %v3496_v24 }
 0x611   :  { %3854 = vpow2.f32 %v3497_v18  ;;  %v6663_v18 = vld [vmem:[#allocation131_spill] sm:$0xff] }
 0x612   :  { %3856 = vtanh.f32 %v2105_v46  ;;  %v6660_v46 = vld [vmem:[#allocation128_spill] sm:$0xff] }
 0x613   :  { %3858 = vpow2.f32 %v3498_v54  ;;  %v6664_v54 = vld [vmem:[#allocation132_spill] sm:$0xff] }
 0x61a   :  { %v3853_v21 = vpop.eup %3852 }
 0x61b   :  { %v2115_v42 = vadd.f32 1.0, %v3853_v21  ;;  %v3855_v36 = vpop.eup %3854 }
 0x61c   :  { %v2116_v40 = vadd.f32 1.0, %v3855_v36  ;;  %v3857_v1 = vpop.eup %3856  ;;  %v6665_v36 = vld [vmem:[#allocation133_spill] sm:$0xff] }
 0x61d   :  { %3860 = vrcp.f32 %v2115_v42  ;;  %v3859_v3 = vpop.eup %3858  ;;  %v6656_v42 = vld [vmem:[#allocation124_spill] sm:$0xff] }
 0x61e   :  { %3862 = vrcp.f32 %v2116_v40  ;;  %v2117_v19 = vadd.f32 1.0, %v3859_v3  ;;  %v6666_v40 = vld [vmem:[#allocation134_spill] sm:$0xff]  ;;  %v6668_v3 = vld [vmem:[#allocation136_spill] sm:$0xff] }
 0x620   :  { %3864 = vrcp.f32 %v2117_v19  ;;  %v6672_v19 = vld [vmem:[#allocation140_spill] sm:$0xff] }
 0x627   :  { %v3861_v7 = vpop.eup %3860 }
 0x628   :  { %v2126_v12 = vmul.f32 %v3861_v7, %v3857_v1  ;;  %v3863_v63 = vpop.eup %3862  ;;  %v6667_v1 = vld [vmem:[#allocation135_spill] sm:$0xff]  ;;  %v6669_v7 = vld [vmem:[#allocation137_spill] sm:$0xff] }
 0x629   :  { %v2125_v28 = vmul.f32 %v3863_v63, %v5044_v17  ;;  %v6657_v17 = vld [vmem:[#allocation125_spill] sm:$0xff]  ;;  %v6671_v63 = vld [vmem:[#allocation139_spill] sm:$0xff] }
 0x62a   :  { %v3865_v21 = vpop.eup %3864 }
 0x62b   :  { %v5194_v10 = vadd.f32 %v2126_v12, %v2125_v28  ;;  %v6670_v12 = vld [vmem:[#allocation138_spill] sm:$0xff]  ;;  %v6673_v28 = vld [vmem:[#allocation141_spill] sm:$0xff] }
 0x62d   :  { %3866 = vtanh.f32 %v5194_v10 }
 0x637   :  { %v3867_v24 = vpop.eup %3866 }
 0x638   :  { %v2129_v48 = vmul.f32 %v3867_v24, %v3865_v21  ;;  %v6674_v21 = vld [vmem:[#allocation142_spill] sm:$0xff]  ;;  %v6675_v24 = vld [vmem:[#allocation143_spill] sm:$0xff] }
 0x63a   :  { %v5197_v30 = vpack.c.bf16 %v2129_v48, %v2129_v48  ;;  %v6676_v48 = vld [vmem:[#allocation144_spill] sm:$0xff] }
 0x63c   :  { %2165 = vmatmul.mubr.bf16.vlgmr.msra.gmra.mrb[48].mxu0 %v5197_v30  ;;  %2206 = vmatmul.mubr.bf16.vlgmr.msra.gmra.mrb[48].mxu1 %v5197_v30 }
 0x63d   :  { %2215 = vmatpush1.bf16.msra.mxu0 %v4400_v22  ;;  %2256 = vmatpush1.bf16.msra.mxu1 %v6366_v13 }
 0x63e   :  { %2246 = vmatprep.mubr.bf16.mxu0 %v2131_v43  ;;  %2287 = vmatprep.mubr.bf16.mxu1 %v2131_v43  ;;  %v6658_v43 = vld [vmem:[#allocation126_spill] sm:$0xff] }
 0x63f   :  { %2216 = vmatprep.subr.bf16.mxu0 %v6367_v6  ;;  %2257 = vmatprep.subr.bf16.mxu1 %v6368_v58 }
 0x641   :  { %2217 = vmatpush1.bf16.msra.mxu0 %v6369_v31  ;;  %2258 = vmatpush1.bf16.msra.mxu1 %v6370_v4 }
 0x642   :  { %2218 = vmatprep.subr.bf16.mxu0 %v6371_v47  ;;  %2259 = vmatprep.subr.bf16.mxu1 %v6372_v39 }
 0x645   :  { %2219 = vmatpush1.bf16.msra.mxu0 %v6373_v20  ;;  %2260 = vmatpush1.bf16.msra.mxu1 %v6374_v9 }
 0x646   :  { %2220 = vmatprep.subr.bf16.mxu0 %v6462_v44  ;;  %2261 = vmatprep.subr.bf16.mxu1 %v6463_v15 }
 0x649   :  { %2221 = vmatpush1.bf16.msra.mxu0 %v6464_v45  ;;  %2262 = vmatpush1.bf16.msra.mxu1 %v6465_v60 }
 0x64a   :  { %2222 = vmatprep.subr.bf16.mxu0 %v6466_v41  ;;  %2263 = vmatprep.subr.bf16.mxu1 %v6467_v2 }
 0x64d   :  { %2223 = vmatpush1.bf16.msra.mxu0 %v6468_v35  ;;  %2264 = vmatpush1.bf16.msra.mxu1 %v6469_v49 }
 0x64e   :  { %2224 = vmatprep.subr.bf16.mxu0 %v6470_v51  ;;  %2265 = vmatprep.subr.bf16.mxu1 %v6471_v34 }
 0x651   :  { %2225 = vmatpush1.bf16.msra.mxu0 %v6559_v50  ;;  %2266 = vmatpush1.bf16.msra.mxu1 %v6560_v14 }
 0x652   :  { %2226 = vmatprep.subr.bf16.mxu0 %v6561_v56  ;;  %2267 = vmatprep.subr.bf16.mxu1 %v6562_v25 }
 0x655   :  { %2227 = vmatpush1.bf16.msra.mxu0 %v6563_v29  ;;  %2268 = vmatpush1.bf16.msra.mxu1 %v6564_v62 }
 0x656   :  { %2228 = vmatprep.subr.bf16.mxu0 %v6478_v52  ;;  %2269 = vmatprep.subr.bf16.mxu1 %v6565_v16 }
 0x659   :  { %2229 = vmatpush1.bf16.msra.mxu0 %v6566_v27  ;;  %2270 = vmatpush1.bf16.msra.mxu1 %v6567_v32 }
 0x65a   :  { %2230 = vmatprep.subr.bf16.mxu0 %v6568_v5  ;;  %2271 = vmatprep.subr.bf16.mxu1 %v6483_v59 }
 0x65d   :  { %2231 = vmatpush1.bf16.msra.mxu0 %v6569_v38  ;;  %2272 = vmatpush1.bf16.msra.mxu1 %v6570_v33 }
 0x65e   :  { %2232 = vmatprep.subr.bf16.mxu0 %v6486_v57  ;;  %2273 = vmatprep.subr.bf16.mxu1 %v6487_v61 }
 0x661   :  { %2233 = vmatpush1.bf16.msra.mxu0 %v6488_v53  ;;  %2274 = vmatpush1.bf16.msra.mxu1 %v6402_v23 }
 0x662   :  { %2234 = vmatprep.subr.bf16.mxu0 %v6489_v37  ;;  %2275 = vmatprep.subr.bf16.mxu1 %v6490_v0 }
 0x665   :  { %2235 = vmatpush1.bf16.msra.mxu0 %v6491_v8  ;;  %2276 = vmatpush1.bf16.msra.mxu1 %v6656_v42 }
 0x666   :  { %2236 = vmatprep.subr.bf16.mxu0 %v6657_v17  ;;  %2277 = vmatprep.subr.bf16.mxu1 %v6658_v43 }
 0x669   :  { %2237 = vmatpush1.bf16.msra.mxu0 %v6659_v11  ;;  %2278 = vmatpush1.bf16.msra.mxu1 %v6660_v46  ;;  %v6746_v46 = vld [vmem:[#allocation172_spill] sm:$0xff] }
 0x66a   :  { %2238 = vmatprep.subr.bf16.mxu0 %v6661_v26  ;;  %2279 = vmatprep.subr.bf16.mxu1 %v6662_v55 }
 0x66d   :  { %2239 = vmatpush1.bf16.msra.mxu0 %v6663_v18  ;;  %2280 = vmatpush1.bf16.msra.mxu1 %v6664_v54  ;;  %v6744_v54 = vld [vmem:[#allocation170_spill] sm:$0xff] }
 0x66e   :  { %2240 = vmatprep.subr.bf16.mxu0 %v6665_v36  ;;  %2281 = vmatprep.subr.bf16.mxu1 %v6666_v40  ;;  %v6677_v40 = vld [vmem:[#allocation17_spill] sm:$0xff] }
 0x671   :  { %2241 = vmatpush1.bf16.msra.mxu0 %v6667_v1  ;;  %2282 = vmatpush1.bf16.msra.mxu1 %v6668_v3  ;;  %v6678_v1 = vld [vmem:[#allocation18_spill] sm:$0xff]  ;;  %v6743_v3 = vld [vmem:[#allocation169_spill] sm:$0xff] }
 0x672   :  { %2242 = vmatprep.subr.bf16.mxu0 %v6669_v7  ;;  %2283 = vmatprep.subr.bf16.mxu1 %v6670_v12  ;;  %v6679_v12 = vld [vmem:[#allocation19_spill] sm:$0xff]  ;;  %v6688_v7 = vld [vmem:[#allocation28_spill] sm:$0xff] }
 0x675   :  { %2243 = vmatpush1.bf16.msra.mxu0 %v6671_v63  ;;  %2284 = vmatpush1.bf16.msra.mxu1 %v6672_v19  ;;  %v6680_v63 = vld [vmem:[#allocation20_spill] sm:$0xff]  ;;  %v6681_v19 = vld [vmem:[#allocation21_spill] sm:$0xff] }
 0x676   :  { %2244 = vmatprep.subr.bf16.mxu0 %v6673_v28  ;;  %2285 = vmatprep.subr.bf16.mxu1 %v6674_v21  ;;  %v6682_v28 = vld [vmem:[#allocation22_spill] sm:$0xff]  ;;  %v6683_v21 = vld [vmem:[#allocation23_spill] sm:$0xff] }
 0x679   :  { %2245 = vmatpush1.bf16.msra.mxu0 %v6675_v24  ;;  %2286 = vmatpush1.bf16.msra.mxu1 %v6676_v48  ;;  %v6684_v24 = vld [vmem:[#allocation24_spill] sm:$0xff]  ;;  %v6685_v48 = vld [vmem:[#allocation25_spill] sm:$0xff] }
 0x67a   :  { %2361 = vmatprep.subr.bf16.mxu0 %v6677_v40  ;;  %2402 = vmatprep.subr.bf16.mxu1 %v6678_v1  ;;  %v6686_v40 = vld [vmem:[#allocation26_spill] sm:$0xff]  ;;  %v6687_v1 = vld [vmem:[#allocation27_spill] sm:$0xff] }
 0x67c   :  { %2247 = vmatmul.mubr.bf16.vlgmr.msra.gmra.mrb[52].mxu0 %v5197_v30  ;;  %2288 = vmatmul.mubr.bf16.vlgmr.msra.gmra.mrb[52].mxu1 %v5197_v30  ;;  %v6689_v30 = vld [vmem:[#allocation29_spill] sm:$0xff] }
 0x67d   :  { %2362 = vmatpush1.bf16.msra.mxu0 %v6679_v12  ;;  %2403 = vmatpush1.bf16.msra.mxu1 %v6680_v63  ;;  %v6690_v12 = vld [vmem:[#allocation30_spill] sm:$0xff]  ;;  %v6691_v63 = vld [vmem:[#allocation31_spill] sm:$0xff] }
 0x67e   :  { %2363 = vmatprep.subr.bf16.mxu0 %v6681_v19  ;;  %2404 = vmatprep.subr.bf16.mxu1 %v6682_v28  ;;  %v6692_v19 = vld [vmem:[#allocation32_spill] sm:$0xff]  ;;  %v6693_v28 = vld [vmem:[#allocation33_spill] sm:$0xff] }
 0x681   :  { %2364 = vmatpush1.bf16.msra.mxu0 %v6683_v21  ;;  %2405 = vmatpush1.bf16.msra.mxu1 %v6684_v24  ;;  %v6694_v21 = vld [vmem:[#allocation34_spill] sm:$0xff]  ;;  %v6695_v24 = vld [vmem:[#allocation35_spill] sm:$0xff] }
 0x682   :  { %2365 = vmatprep.subr.bf16.mxu0 %v6685_v48  ;;  %2406 = vmatprep.subr.bf16.mxu1 %v6686_v40  ;;  %v6696_v48 = vld [vmem:[#allocation36_spill] sm:$0xff]  ;;  %v6697_v40 = vld [vmem:[#allocation37_spill] sm:$0xff] }
 0x685   :  { %2366 = vmatpush1.bf16.msra.mxu0 %v6687_v1  ;;  %2407 = vmatpush1.bf16.msra.mxu1 %v6688_v7  ;;  %v6698_v1 = vld [vmem:[#allocation38_spill] sm:$0xff]  ;;  %v6699_v7 = vld [vmem:[#allocation39_spill] sm:$0xff] }
 0x686   :  { %2367 = vmatprep.subr.bf16.mxu0 %v6689_v30  ;;  %2408 = vmatprep.subr.bf16.mxu1 %v6690_v12  ;;  %v6700_v30 = vld [vmem:[#allocation40_spill] sm:$0xff]  ;;  %v6701_v12 = vld [vmem:[#allocation41_spill] sm:$0xff] }
 0x689   :  { %2368 = vmatpush1.bf16.msra.mxu0 %v6691_v63  ;;  %2409 = vmatpush1.bf16.msra.mxu1 %v6692_v19  ;;  %v6702_v63 = vld [vmem:[#allocation42_spill] sm:$0xff]  ;;  %v6703_v19 = vld [vmem:[#allocation43_spill] sm:$0xff] }
 0x68a   :  { %2369 = vmatprep.subr.bf16.mxu0 %v6693_v28  ;;  %2410 = vmatprep.subr.bf16.mxu1 %v6694_v21  ;;  %v6704_v28 = vld [vmem:[#allocation44_spill] sm:$0xff]  ;;  %v6705_v21 = vld [vmem:[#allocation45_spill] sm:$0xff] }
 0x68d   :  { %2370 = vmatpush1.bf16.msra.mxu0 %v6695_v24  ;;  %2411 = vmatpush1.bf16.msra.mxu1 %v6696_v48  ;;  %v6706_v24 = vld [vmem:[#allocation46_spill] sm:$0xff]  ;;  %v6707_v48 = vld [vmem:[#allocation47_spill] sm:$0xff] }
 0x68e   :  { %2371 = vmatprep.subr.bf16.mxu0 %v6697_v40  ;;  %2412 = vmatprep.subr.bf16.mxu1 %v6698_v1  ;;  %v6708_v40 = vld [vmem:[#allocation48_spill] sm:$0xff]  ;;  %v6709_v1 = vld [vmem:[#allocation49_spill] sm:$0xff] }
 0x691   :  { %2372 = vmatpush1.bf16.msra.mxu0 %v6699_v7  ;;  %2413 = vmatpush1.bf16.msra.mxu1 %v6700_v30  ;;  %v6710_v7 = vld [vmem:[#allocation50_spill] sm:$0xff]  ;;  %v6711_v30 = vld [vmem:[#allocation51_spill] sm:$0xff] }
 0x692   :  { %2373 = vmatprep.subr.bf16.mxu0 %v6701_v12  ;;  %2414 = vmatprep.subr.bf16.mxu1 %v6702_v63  ;;  %v6712_v12 = vld [vmem:[#allocation52_spill] sm:$0xff]  ;;  %v6713_v63 = vld [vmem:[#allocation53_spill] sm:$0xff] }
 0x695   :  { %2374 = vmatpush1.bf16.msra.mxu0 %v6703_v19  ;;  %2415 = vmatpush1.bf16.msra.mxu1 %v6704_v28  ;;  %v6714_v19 = vld [vmem:[#allocation54_spill] sm:$0xff]  ;;  %v6715_v28 = vld [vmem:[#allocation55_spill] sm:$0xff] }
 0x696   :  { %2375 = vmatprep.subr.bf16.mxu0 %v6705_v21  ;;  %2416 = vmatprep.subr.bf16.mxu1 %v6706_v24  ;;  %v6716_v21 = vld [vmem:[#allocation56_spill] sm:$0xff]  ;;  %v6717_v24 = vld [vmem:[#allocation57_spill] sm:$0xff] }
 0x699   :  { %2376 = vmatpush1.bf16.msra.mxu0 %v6707_v48  ;;  %2417 = vmatpush1.bf16.msra.mxu1 %v6708_v40  ;;  %v6718_v48 = vld [vmem:[#allocation58_spill] sm:$0xff]  ;;  %v6719_v40 = vld [vmem:[#allocation59_spill] sm:$0xff] }
 0x69a   :  { %2377 = vmatprep.subr.bf16.mxu0 %v6709_v1  ;;  %2418 = vmatprep.subr.bf16.mxu1 %v6710_v7  ;;  %v6720_v1 = vld [vmem:[#allocation60_spill] sm:$0xff]  ;;  %v6721_v7 = vld [vmem:[#allocation61_spill] sm:$0xff] }
 0x69d   :  { %2378 = vmatpush1.bf16.msra.mxu0 %v6711_v30  ;;  %2419 = vmatpush1.bf16.msra.mxu1 %v6712_v12  ;;  %v6722_v30 = vld [vmem:[#allocation62_spill] sm:$0xff]  ;;  %v6723_v12 = vld [vmem:[#allocation63_spill] sm:$0xff] }
 0x69e   :  { %2379 = vmatprep.subr.bf16.mxu0 %v6713_v63  ;;  %2420 = vmatprep.subr.bf16.mxu1 %v6714_v19  ;;  %v6724_v63 = vld [vmem:[#allocation64_spill] sm:$0xff]  ;;  %v6725_v19 = vld [vmem:[#allocation65_spill] sm:$0xff] }
 0x6a1   :  { %2380 = vmatpush1.bf16.msra.mxu0 %v6715_v28  ;;  %2421 = vmatpush1.bf16.msra.mxu1 %v6716_v21  ;;  %v6726_v28 = vld [vmem:[#allocation66_spill] sm:$0xff]  ;;  %v6727_v21 = vld [vmem:[#allocation67_spill] sm:$0xff] }
 0x6a2   :  { %2381 = vmatprep.subr.bf16.mxu0 %v6717_v24  ;;  %2422 = vmatprep.subr.bf16.mxu1 %v6718_v48  ;;  %v6728_v24 = vld [vmem:[#allocation68_spill] sm:$0xff]  ;;  %v6729_v48 = vld [vmem:[#allocation69_spill] sm:$0xff] }
 0x6a5   :  { %2382 = vmatpush1.bf16.msra.mxu0 %v6719_v40  ;;  %2423 = vmatpush1.bf16.msra.mxu1 %v6720_v1  ;;  %v6730_v40 = vld [vmem:[#allocation71_spill] sm:$0xff]  ;;  %v6731_v1 = vld [vmem:[#allocation70_spill] sm:$0xff] }
 0x6a6   :  { %2383 = vmatprep.subr.bf16.mxu0 %v6721_v7  ;;  %2424 = vmatprep.subr.bf16.mxu1 %v6722_v30  ;;  %v6732_v7 = vld [vmem:[#allocation72_spill] sm:$0xff]  ;;  %v6733_v30 = vld [vmem:[#allocation73_spill] sm:$0xff] }
 0x6a9   :  { %2384 = vmatpush1.bf16.msra.mxu0 %v6723_v12  ;;  %2425 = vmatpush1.bf16.msra.mxu1 %v6724_v63  ;;  %v6734_v12 = vld [vmem:[#allocation74_spill] sm:$0xff]  ;;  %v6735_v63 = vld [vmem:[#allocation75_spill] sm:$0xff] }
 0x6aa   :  { %2385 = vmatprep.subr.bf16.mxu0 %v6725_v19  ;;  %2426 = vmatprep.subr.bf16.mxu1 %v6726_v28  ;;  %v6736_v19 = vld [vmem:[#allocation76_spill] sm:$0xff]  ;;  %v6737_v28 = vld [vmem:[#allocation77_spill] sm:$0xff] }
 0x6ad   :  { %2386 = vmatpush1.bf16.msra.mxu0 %v6727_v21  ;;  %2427 = vmatpush1.bf16.msra.mxu1 %v6728_v24  ;;  %v6738_v21 = vld [vmem:[#allocation78_spill] sm:$0xff]  ;;  %v6739_v24 = vld [vmem:[#allocation79_spill] sm:$0xff] }
 0x6ae   :  { %2387 = vmatprep.subr.bf16.mxu0 %v6729_v48  ;;  %2428 = vmatprep.subr.bf16.mxu1 %v6730_v40  ;;  %v6740_v48 = vld [vmem:[#allocation80_spill] sm:$0xff]  ;;  %v6741_v40 = vld [vmem:[#allocation81_spill] sm:$0xff] }
 0x6b1   :  { %2388 = vmatpush1.bf16.msra.mxu0 %v6731_v1  ;;  %2429 = vmatpush1.bf16.msra.mxu1 %v6732_v7  ;;  %v6742_v1 = vld [vmem:[#allocation82_spill] sm:$0xff] }
 0x6b2   :  { %2389 = vmatprep.subr.bf16.mxu0 %v6733_v30  ;;  %2430 = vmatprep.subr.bf16.mxu1 %v6734_v12 }
 0x6b5   :  { %2390 = vmatpush1.bf16.msra.mxu0 %v6735_v63  ;;  %2431 = vmatpush1.bf16.msra.mxu1 %v6736_v19 }
 0x6b6   :  { %2391 = vmatprep.subr.bf16.mxu0 %v6737_v28  ;;  %2432 = vmatprep.subr.bf16.mxu1 %v6738_v21 }
 0x6b9   :  { %2392 = vmatpush1.bf16.msra.mxu0 %v6739_v24  ;;  %2433 = vmatpush1.bf16.msra.mxu1 %v6740_v48  ;;  %v6745_v48 = vld [vmem:[#allocation171_spill] sm:$0xff] }
 0x6ba   :  { %2443 = vmatprep.subr.bf16.mxu0 %v6741_v40  ;;  %2484 = vmatprep.subr.bf16.mxu1 %v6742_v1 }
 0x70f   :  { %v2166_v7 = vpop.f32.mrb[48].mxu0  ;;  %v2207_v30 = vpop.f32.mrb[48].mxu1 }
 0x710   :  { %v2296_v12 = vadd.f32 %v2166_v7, %v6743_v3  ;;  %v2168_v36 = vpop.f32.mrb[49].mxu0  ;;  %v2209_v63 = vpop.f32.mrb[49].mxu1  ;;  %v2298_v40 = vadd.f32 %v2207_v30, %v6745_v48 }
 0x711   :  { %v2297_v19 = vadd.f32 %v2168_v36, %v6744_v54  ;;  %v2170_v18 = vpop.f32.mrb[50].mxu0  ;;  %v2211_v28 = vpop.f32.mrb[50].mxu1  ;;  %v2299_v1 = vadd.f32 %v2209_v63, %v6746_v46 }
 0x712   :  { %v3499_v55 = vmul.f32 -1.442695, %v2296_v12  ;;  %v2171_v21 = vpop.f32.mrb[51].mxu0  ;;  %v2212_v26 = vpop.f32.mrb[51].mxu1  ;;  %v3501_v11 = vmul.f32 -1.442695, %v2298_v40 }
 0x713   :  { %v3500_v24 = vmul.f32 -1.442695, %v2297_v19  ;;  %v6747_v21 = vld [vmem:[#allocation85_spill] sm:$0xff] }
 0x714   :  { %3868 = vpow2.f32 %v3499_v55 }
 0x715   :  { %3870 = vpow2.f32 %v3500_v24 }
 0x716   :  { %3872 = vtanh.f32 %v2299_v1 }
 0x717   :  { %3874 = vpow2.f32 %v3501_v11 }
 0x71e   :  { %v3869_v43 = vpop.eup %3868 }
 0x71f   :  { %v2309_v17 = vadd.f32 1.0, %v3869_v43  ;;  %v3871_v7 = vpop.eup %3870 }
 0x720   :  { %v2310_v36 = vadd.f32 1.0, %v3871_v7  ;;  %v3873_v18 = vpop.eup %3872  ;;  %v6749_v7 = vld [vmem:[#allocation157_spill] sm:$0xff] }
 0x721   :  { %3876 = vrcp.f32 %v2309_v17  ;;  %v3875_v12 = vpop.eup %3874 }
 0x722   :  { %3878 = vrcp.f32 %v2310_v36  ;;  %v2311_v55 = vadd.f32 1.0, %v3875_v12 }
 0x724   :  { %3880 = vrcp.f32 %v2311_v55 }
 0x72b   :  { %v3877_v28 = vpop.eup %3876 }
 0x72c   :  { %v2320_v26 = vmul.f32 %v3877_v28, %v3873_v18  ;;  %v3879_v19 = vpop.eup %3878  ;;  %v6750_v18 = vld [vmem:[#allocation159_spill] sm:$0xff] }
 0x72d   :  { %v2319_v24 = vmul.f32 %v3879_v19, %v6747_v21  ;;  %v6751_v19 = vld [vmem:[#allocation158_spill] sm:$0xff]  ;;  %v6752_v21 = vld [vmem:[#allocation160_spill] sm:$0xff] }
 0x72e   :  { %v3881_v43 = vpop.eup %3880 }
 0x72f   :  { %v5336_v30 = vadd.f32 %v2320_v26, %v2319_v24 }
 0x731   :  { %6748 = vst [vmem:[#allocation86_spill] sm:$0xff] %v5336_v30  ;;  %3882 = vtanh.f32 %v5336_v30 }
 0x73b   :  { %v3883_v40 = vpop.eup %3882 }
 0x73c   :  { %v2323_v1 = vmul.f32 %v3883_v40, %v3881_v43 }
 0x73e   :  { %v2360_v11 = vpack.c.bf16 %v2323_v1, %v2323_v1 }
 0x740   :  { %2393 = vmatprep.mubr.bf16.mxu0 %v2360_v11  ;;  %2434 = vmatprep.mubr.bf16.mxu1 %v2360_v11 }
 0x74f   :  { %v2248_v17 = vpop.f32.mrb[52].mxu0  ;;  %v2289_v63 = vpop.f32.mrb[52].mxu1 }
 0x750   :  { %v2331_v36 = vadd.f32 %v2248_v17, %v6749_v7  ;;  %v2333_v28 = vadd.f32 %v2289_v63, %v6750_v18  ;;  %v2250_v12 = vpop.f32.mrb[53].mxu0  ;;  %v2291_v46 = vpop.f32.mrb[53].mxu1 }
 0x751   :  { %v2332_v26 = vadd.f32 %v2250_v12, %v6751_v19  ;;  %v2334_v55 = vadd.f32 %v2291_v46, %v6752_v21  ;;  %v2252_v24 = vpop.f32.mrb[54].mxu0  ;;  %v2293_v30 = vpop.f32.mrb[54].mxu1  ;;  %v6756_v21 = vld [vmem:[#allocation127_spill] sm:$0xff] }
 0x752   :  { %v3502_v48 = vmul.f32 -1.442695, %v2331_v36  ;;  %v2253_v54 = vpop.f32.mrb[55].mxu0  ;;  %v2294_v43 = vpop.f32.mrb[55].mxu1  ;;  %v3504_v1 = vmul.f32 -1.442695, %v2333_v28 }
 0x753   :  { %v3503_v40 = vmul.f32 -1.442695, %v2332_v26  ;;  %v6758_v24 = vld [vmem:[#allocation129_spill] sm:$0xff]  ;;  %v6759_v43 = vld [vmem:[#allocation130_spill] sm:$0xff] }
 0x754   :  { %3884 = vpow2.f32 %v3502_v48 }
 0x755   :  { %3886 = vpow2.f32 %v3503_v40  ;;  %v6760_v40 = vld [vmem:[#allocation131_spill] sm:$0xff] }
 0x756   :  { %3888 = vtanh.f32 %v2334_v55  ;;  %v6757_v55 = vld [vmem:[#allocation128_spill] sm:$0xff] }
 0x757   :  { %3890 = vpow2.f32 %v3504_v1  ;;  %v6761_v1 = vld [vmem:[#allocation132_spill] sm:$0xff] }
 0x75e   :  { %v3885_v3 = vpop.eup %3884 }
 0x75f   :  { %v2344_v42 = vadd.f32 1.0, %v3885_v3  ;;  %v3887_v17 = vpop.eup %3886 }
 0x760   :  { %v2345_v63 = vadd.f32 1.0, %v3887_v17  ;;  %v3889_v7 = vpop.eup %3888  ;;  %v6762_v17 = vld [vmem:[#allocation133_spill] sm:$0xff] }
 0x761   :  { %3892 = vrcp.f32 %v2344_v42  ;;  %v3891_v18 = vpop.eup %3890  ;;  %v6754_v42 = vld [vmem:[#allocation125_spill] sm:$0xff] }
 0x762   :  { %3894 = vrcp.f32 %v2345_v63  ;;  %v2346_v36 = vadd.f32 1.0, %v3891_v18  ;;  %v6763_v63 = vld [vmem:[#allocation134_spill] sm:$0xff]  ;;  %v6765_v18 = vld [vmem:[#allocation136_spill] sm:$0xff] }
 0x764   :  { %3896 = vrcp.f32 %v2346_v36  ;;  %v6769_v36 = vld [vmem:[#allocation140_spill] sm:$0xff] }
 0x76b   :  { %v3893_v46 = vpop.eup %3892 }
 0x76c   :  { %v2355_v12 = vmul.f32 %v3893_v46, %v3889_v7  ;;  %v3895_v30 = vpop.eup %3894  ;;  %v6764_v7 = vld [vmem:[#allocation135_spill] sm:$0xff]  ;;  %v6766_v46 = vld [vmem:[#allocation137_spill] sm:$0xff] }
 0x76d   :  { %v2354_v54 = vmul.f32 %v3895_v30, %v5194_v10  ;;  %v6753_v10 = vld [vmem:[#allocation124_spill] sm:$0xff]  ;;  %v6768_v30 = vld [vmem:[#allocation139_spill] sm:$0xff] }
 0x76e   :  { %v3897_v3 = vpop.eup %3896 }
 0x76f   :  { %v5344_v19 = vadd.f32 %v2355_v12, %v2354_v54  ;;  %v6767_v12 = vld [vmem:[#allocation138_spill] sm:$0xff]  ;;  %v6770_v54 = vld [vmem:[#allocation141_spill] sm:$0xff] }
 0x771   :  { %3898 = vtanh.f32 %v5344_v19 }
 0x77b   :  { %v3899_v48 = vpop.eup %3898 }
 0x77c   :  { %v2358_v28 = vmul.f32 %v3899_v48, %v3897_v3  ;;  %v6771_v3 = vld [vmem:[#allocation142_spill] sm:$0xff]  ;;  %v6772_v48 = vld [vmem:[#allocation143_spill] sm:$0xff] }
 0x77e   :  { %v5347_v26 = vpack.c.bf16 %v2358_v28, %v2358_v28  ;;  %v6773_v28 = vld [vmem:[#allocation144_spill] sm:$0xff] }
 0x780   :  { %2394 = vmatmul.mubr.bf16.vlgmr.msra.gmra.mrb[56].mxu0 %v5347_v26  ;;  %2435 = vmatmul.mubr.bf16.vlgmr.msra.gmra.mrb[56].mxu1 %v5347_v26 }
 0x781   :  { %2444 = vmatpush1.bf16.msra.mxu0 %v4400_v22  ;;  %2485 = vmatpush1.bf16.msra.mxu1 %v6366_v13 }
 0x782   :  { %2475 = vmatprep.mubr.bf16.mxu0 %v2360_v11  ;;  %2516 = vmatprep.mubr.bf16.mxu1 %v2360_v11  ;;  %v6755_v11 = vld [vmem:[#allocation126_spill] sm:$0xff] }
 0x783   :  { %2445 = vmatprep.subr.bf16.mxu0 %v6367_v6  ;;  %2486 = vmatprep.subr.bf16.mxu1 %v6368_v58 }
 0x785   :  { %2446 = vmatpush1.bf16.msra.mxu0 %v6369_v31  ;;  %2487 = vmatpush1.bf16.msra.mxu1 %v6370_v4 }
 0x786   :  { %2447 = vmatprep.subr.bf16.mxu0 %v6371_v47  ;;  %2488 = vmatprep.subr.bf16.mxu1 %v6372_v39 }
 0x789   :  { %2448 = vmatpush1.bf16.msra.mxu0 %v6373_v20  ;;  %2489 = vmatpush1.bf16.msra.mxu1 %v6374_v9 }
 0x78a   :  { %2449 = vmatprep.subr.bf16.mxu0 %v6462_v44  ;;  %2490 = vmatprep.subr.bf16.mxu1 %v6463_v15 }
 0x78d   :  { %2450 = vmatpush1.bf16.msra.mxu0 %v6464_v45  ;;  %2491 = vmatpush1.bf16.msra.mxu1 %v6465_v60 }
 0x78e   :  { %2451 = vmatprep.subr.bf16.mxu0 %v6466_v41  ;;  %2492 = vmatprep.subr.bf16.mxu1 %v6467_v2 }
 0x791   :  { %2452 = vmatpush1.bf16.msra.mxu0 %v6468_v35  ;;  %2493 = vmatpush1.bf16.msra.mxu1 %v6469_v49 }
 0x792   :  { %2453 = vmatprep.subr.bf16.mxu0 %v6470_v51  ;;  %2494 = vmatprep.subr.bf16.mxu1 %v6471_v34 }
 0x795   :  { %2454 = vmatpush1.bf16.msra.mxu0 %v6559_v50  ;;  %2495 = vmatpush1.bf16.msra.mxu1 %v6560_v14 }
 0x796   :  { %2455 = vmatprep.subr.bf16.mxu0 %v6561_v56  ;;  %2496 = vmatprep.subr.bf16.mxu1 %v6562_v25 }
 0x799   :  { %2456 = vmatpush1.bf16.msra.mxu0 %v6563_v29  ;;  %2497 = vmatpush1.bf16.msra.mxu1 %v6564_v62 }
 0x79a   :  { %2457 = vmatprep.subr.bf16.mxu0 %v6478_v52  ;;  %2498 = vmatprep.subr.bf16.mxu1 %v6565_v16 }
 0x79d   :  { %2458 = vmatpush1.bf16.msra.mxu0 %v6566_v27  ;;  %2499 = vmatpush1.bf16.msra.mxu1 %v6567_v32 }
 0x79e   :  { %2459 = vmatprep.subr.bf16.mxu0 %v6568_v5  ;;  %2500 = vmatprep.subr.bf16.mxu1 %v6483_v59 }
 0x7a1   :  { %2460 = vmatpush1.bf16.msra.mxu0 %v6569_v38  ;;  %2501 = vmatpush1.bf16.msra.mxu1 %v6570_v33 }
 0x7a2   :  { %2461 = vmatprep.subr.bf16.mxu0 %v6486_v57  ;;  %2502 = vmatprep.subr.bf16.mxu1 %v6487_v61 }
 0x7a5   :  { %2462 = vmatpush1.bf16.msra.mxu0 %v6488_v53  ;;  %2503 = vmatpush1.bf16.msra.mxu1 %v6402_v23 }
 0x7a6   :  { %2463 = vmatprep.subr.bf16.mxu0 %v6489_v37  ;;  %2504 = vmatprep.subr.bf16.mxu1 %v6490_v0 }
 0x7a9   :  { %2464 = vmatpush1.bf16.msra.mxu0 %v6491_v8  ;;  %2505 = vmatpush1.bf16.msra.mxu1 %v6753_v10 }
 0x7aa   :  { %2465 = vmatprep.subr.bf16.mxu0 %v6754_v42  ;;  %2506 = vmatprep.subr.bf16.mxu1 %v6755_v11 }
 0x7ad   :  { %2466 = vmatpush1.bf16.msra.mxu0 %v6756_v21  ;;  %2507 = vmatpush1.bf16.msra.mxu1 %v6757_v55  ;;  %v6843_v55 = vld [vmem:[#allocation172_spill] sm:$0xff] }
 0x7ae   :  { %2467 = vmatprep.subr.bf16.mxu0 %v6758_v24  ;;  %2508 = vmatprep.subr.bf16.mxu1 %v6759_v43 }
 0x7b1   :  { %2468 = vmatpush1.bf16.msra.mxu0 %v6760_v40  ;;  %2509 = vmatpush1.bf16.msra.mxu1 %v6761_v1  ;;  %v6841_v1 = vld [vmem:[#allocation170_spill] sm:$0xff] }
 0x7b2   :  { %2469 = vmatprep.subr.bf16.mxu0 %v6762_v17  ;;  %2510 = vmatprep.subr.bf16.mxu1 %v6763_v63  ;;  %v6774_v63 = vld [vmem:[#allocation17_spill] sm:$0xff] }
 0x7b5   :  { %2470 = vmatpush1.bf16.msra.mxu0 %v6764_v7  ;;  %2511 = vmatpush1.bf16.msra.mxu1 %v6765_v18  ;;  %v6775_v7 = vld [vmem:[#allocation18_spill] sm:$0xff]  ;;  %v6840_v18 = vld [vmem:[#allocation169_spill] sm:$0xff] }
 0x7b6   :  { %2471 = vmatprep.subr.bf16.mxu0 %v6766_v46  ;;  %2512 = vmatprep.subr.bf16.mxu1 %v6767_v12  ;;  %v6776_v12 = vld [vmem:[#allocation19_spill] sm:$0xff]  ;;  %v6785_v46 = vld [vmem:[#allocation28_spill] sm:$0xff] }
 0x7b9   :  { %2472 = vmatpush1.bf16.msra.mxu0 %v6768_v30  ;;  %2513 = vmatpush1.bf16.msra.mxu1 %v6769_v36  ;;  %v6777_v30 = vld [vmem:[#allocation20_spill] sm:$0xff]  ;;  %v6778_v36 = vld [vmem:[#allocation21_spill] sm:$0xff] }
 0x7ba   :  { %2473 = vmatprep.subr.bf16.mxu0 %v6770_v54  ;;  %2514 = vmatprep.subr.bf16.mxu1 %v6771_v3  ;;  %v6779_v54 = vld [vmem:[#allocation22_spill] sm:$0xff]  ;;  %v6780_v3 = vld [vmem:[#allocation23_spill] sm:$0xff] }
 0x7bd   :  { %2474 = vmatpush1.bf16.msra.mxu0 %v6772_v48  ;;  %2515 = vmatpush1.bf16.msra.mxu1 %v6773_v28  ;;  %v6781_v48 = vld [vmem:[#allocation24_spill] sm:$0xff]  ;;  %v6782_v28 = vld [vmem:[#allocation25_spill] sm:$0xff] }
 0x7be   :  { %2590 = vmatprep.subr.bf16.mxu0 %v6774_v63  ;;  %2631 = vmatprep.subr.bf16.mxu1 %v6775_v7  ;;  %v6783_v63 = vld [vmem:[#allocation26_spill] sm:$0xff]  ;;  %v6784_v7 = vld [vmem:[#allocation27_spill] sm:$0xff] }
 0x7c0   :  { %2476 = vmatmul.mubr.bf16.vlgmr.msra.gmra.mrb[60].mxu0 %v5347_v26  ;;  %2517 = vmatmul.mubr.bf16.vlgmr.msra.gmra.mrb[60].mxu1 %v5347_v26  ;;  %v6786_v26 = vld [vmem:[#allocation29_spill] sm:$0xff] }
 0x7c1   :  { %2591 = vmatpush1.bf16.msra.mxu0 %v6776_v12  ;;  %2632 = vmatpush1.bf16.msra.mxu1 %v6777_v30  ;;  %v6787_v12 = vld [vmem:[#allocation30_spill] sm:$0xff]  ;;  %v6788_v30 = vld [vmem:[#allocation31_spill] sm:$0xff] }
 0x7c2   :  { %2592 = vmatprep.subr.bf16.mxu0 %v6778_v36  ;;  %2633 = vmatprep.subr.bf16.mxu1 %v6779_v54  ;;  %v6789_v36 = vld [vmem:[#allocation32_spill] sm:$0xff]  ;;  %v6790_v54 = vld [vmem:[#allocation33_spill] sm:$0xff] }
 0x7c5   :  { %2593 = vmatpush1.bf16.msra.mxu0 %v6780_v3  ;;  %2634 = vmatpush1.bf16.msra.mxu1 %v6781_v48  ;;  %v6791_v3 = vld [vmem:[#allocation34_spill] sm:$0xff]  ;;  %v6792_v48 = vld [vmem:[#allocation35_spill] sm:$0xff] }
 0x7c6   :  { %2594 = vmatprep.subr.bf16.mxu0 %v6782_v28  ;;  %2635 = vmatprep.subr.bf16.mxu1 %v6783_v63  ;;  %v6793_v28 = vld [vmem:[#allocation36_spill] sm:$0xff]  ;;  %v6794_v63 = vld [vmem:[#allocation37_spill] sm:$0xff] }
 0x7c9   :  { %2595 = vmatpush1.bf16.msra.mxu0 %v6784_v7  ;;  %2636 = vmatpush1.bf16.msra.mxu1 %v6785_v46  ;;  %v6795_v7 = vld [vmem:[#allocation38_spill] sm:$0xff]  ;;  %v6796_v46 = vld [vmem:[#allocation39_spill] sm:$0xff] }
 0x7ca   :  { %2596 = vmatprep.subr.bf16.mxu0 %v6786_v26  ;;  %2637 = vmatprep.subr.bf16.mxu1 %v6787_v12  ;;  %v6797_v26 = vld [vmem:[#allocation40_spill] sm:$0xff]  ;;  %v6798_v12 = vld [vmem:[#allocation41_spill] sm:$0xff] }
 0x7cd   :  { %2597 = vmatpush1.bf16.msra.mxu0 %v6788_v30  ;;  %2638 = vmatpush1.bf16.msra.mxu1 %v6789_v36  ;;  %v6799_v30 = vld [vmem:[#allocation42_spill] sm:$0xff]  ;;  %v6800_v36 = vld [vmem:[#allocation43_spill] sm:$0xff] }
 0x7ce   :  { %2598 = vmatprep.subr.bf16.mxu0 %v6790_v54  ;;  %2639 = vmatprep.subr.bf16.mxu1 %v6791_v3  ;;  %v6801_v54 = vld [vmem:[#allocation44_spill] sm:$0xff]  ;;  %v6802_v3 = vld [vmem:[#allocation45_spill] sm:$0xff] }
 0x7d1   :  { %2599 = vmatpush1.bf16.msra.mxu0 %v6792_v48  ;;  %2640 = vmatpush1.bf16.msra.mxu1 %v6793_v28  ;;  %v6803_v48 = vld [vmem:[#allocation46_spill] sm:$0xff]  ;;  %v6804_v28 = vld [vmem:[#allocation47_spill] sm:$0xff] }
 0x7d2   :  { %2600 = vmatprep.subr.bf16.mxu0 %v6794_v63  ;;  %2641 = vmatprep.subr.bf16.mxu1 %v6795_v7  ;;  %v6805_v63 = vld [vmem:[#allocation48_spill] sm:$0xff]  ;;  %v6806_v7 = vld [vmem:[#allocation49_spill] sm:$0xff] }
 0x7d5   :  { %2601 = vmatpush1.bf16.msra.mxu0 %v6796_v46  ;;  %2642 = vmatpush1.bf16.msra.mxu1 %v6797_v26  ;;  %v6807_v46 = vld [vmem:[#allocation50_spill] sm:$0xff]  ;;  %v6808_v26 = vld [vmem:[#allocation51_spill] sm:$0xff] }
 0x7d6   :  { %2602 = vmatprep.subr.bf16.mxu0 %v6798_v12  ;;  %2643 = vmatprep.subr.bf16.mxu1 %v6799_v30  ;;  %v6809_v12 = vld [vmem:[#allocation52_spill] sm:$0xff]  ;;  %v6810_v30 = vld [vmem:[#allocation53_spill] sm:$0xff] }
 0x7d9   :  { %2603 = vmatpush1.bf16.msra.mxu0 %v6800_v36  ;;  %2644 = vmatpush1.bf16.msra.mxu1 %v6801_v54  ;;  %v6811_v36 = vld [vmem:[#allocation54_spill] sm:$0xff]  ;;  %v6812_v54 = vld [vmem:[#allocation55_spill] sm:$0xff] }
 0x7da   :  { %2604 = vmatprep.subr.bf16.mxu0 %v6802_v3  ;;  %2645 = vmatprep.subr.bf16.mxu1 %v6803_v48  ;;  %v6813_v3 = vld [vmem:[#allocation56_spill] sm:$0xff]  ;;  %v6814_v48 = vld [vmem:[#allocation57_spill] sm:$0xff] }
 0x7dd   :  { %2605 = vmatpush1.bf16.msra.mxu0 %v6804_v28  ;;  %2646 = vmatpush1.bf16.msra.mxu1 %v6805_v63  ;;  %v6815_v28 = vld [vmem:[#allocation58_spill] sm:$0xff]  ;;  %v6816_v63 = vld [vmem:[#allocation59_spill] sm:$0xff] }
 0x7de   :  { %2606 = vmatprep.subr.bf16.mxu0 %v6806_v7  ;;  %2647 = vmatprep.subr.bf16.mxu1 %v6807_v46  ;;  %v6817_v7 = vld [vmem:[#allocation60_spill] sm:$0xff]  ;;  %v6818_v46 = vld [vmem:[#allocation61_spill] sm:$0xff] }
 0x7e1   :  { %2607 = vmatpush1.bf16.msra.mxu0 %v6808_v26  ;;  %2648 = vmatpush1.bf16.msra.mxu1 %v6809_v12  ;;  %v6819_v26 = vld [vmem:[#allocation62_spill] sm:$0xff]  ;;  %v6820_v12 = vld [vmem:[#allocation63_spill] sm:$0xff] }
 0x7e2   :  { %2608 = vmatprep.subr.bf16.mxu0 %v6810_v30  ;;  %2649 = vmatprep.subr.bf16.mxu1 %v6811_v36  ;;  %v6821_v30 = vld [vmem:[#allocation64_spill] sm:$0xff]  ;;  %v6822_v36 = vld [vmem:[#allocation65_spill] sm:$0xff] }
 0x7e5   :  { %2609 = vmatpush1.bf16.msra.mxu0 %v6812_v54  ;;  %2650 = vmatpush1.bf16.msra.mxu1 %v6813_v3  ;;  %v6823_v54 = vld [vmem:[#allocation66_spill] sm:$0xff]  ;;  %v6824_v3 = vld [vmem:[#allocation67_spill] sm:$0xff] }
 0x7e6   :  { %2610 = vmatprep.subr.bf16.mxu0 %v6814_v48  ;;  %2651 = vmatprep.subr.bf16.mxu1 %v6815_v28  ;;  %v6825_v48 = vld [vmem:[#allocation68_spill] sm:$0xff]  ;;  %v6826_v28 = vld [vmem:[#allocation69_spill] sm:$0xff] }
 0x7e9   :  { %2611 = vmatpush1.bf16.msra.mxu0 %v6816_v63  ;;  %2652 = vmatpush1.bf16.msra.mxu1 %v6817_v7  ;;  %v6827_v63 = vld [vmem:[#allocation71_spill] sm:$0xff]  ;;  %v6828_v7 = vld [vmem:[#allocation70_spill] sm:$0xff] }
 0x7ea   :  { %2612 = vmatprep.subr.bf16.mxu0 %v6818_v46  ;;  %2653 = vmatprep.subr.bf16.mxu1 %v6819_v26  ;;  %v6829_v46 = vld [vmem:[#allocation72_spill] sm:$0xff]  ;;  %v6830_v26 = vld [vmem:[#allocation73_spill] sm:$0xff] }
 0x7ed   :  { %2613 = vmatpush1.bf16.msra.mxu0 %v6820_v12  ;;  %2654 = vmatpush1.bf16.msra.mxu1 %v6821_v30  ;;  %v6831_v12 = vld [vmem:[#allocation74_spill] sm:$0xff]  ;;  %v6832_v30 = vld [vmem:[#allocation75_spill] sm:$0xff] }
 0x7ee   :  { %2614 = vmatprep.subr.bf16.mxu0 %v6822_v36  ;;  %2655 = vmatprep.subr.bf16.mxu1 %v6823_v54  ;;  %v6833_v36 = vld [vmem:[#allocation76_spill] sm:$0xff]  ;;  %v6834_v54 = vld [vmem:[#allocation77_spill] sm:$0xff] }
 0x7f1   :  { %2615 = vmatpush1.bf16.msra.mxu0 %v6824_v3  ;;  %2656 = vmatpush1.bf16.msra.mxu1 %v6825_v48  ;;  %v6835_v3 = vld [vmem:[#allocation78_spill] sm:$0xff]  ;;  %v6836_v48 = vld [vmem:[#allocation79_spill] sm:$0xff] }
 0x7f2   :  { %2616 = vmatprep.subr.bf16.mxu0 %v6826_v28  ;;  %2657 = vmatprep.subr.bf16.mxu1 %v6827_v63  ;;  %v6837_v28 = vld [vmem:[#allocation80_spill] sm:$0xff]  ;;  %v6838_v63 = vld [vmem:[#allocation81_spill] sm:$0xff] }
 0x7f5   :  { %2617 = vmatpush1.bf16.msra.mxu0 %v6828_v7  ;;  %2658 = vmatpush1.bf16.msra.mxu1 %v6829_v46  ;;  %v6839_v7 = vld [vmem:[#allocation82_spill] sm:$0xff] }
 0x7f6   :  { %2618 = vmatprep.subr.bf16.mxu0 %v6830_v26  ;;  %2659 = vmatprep.subr.bf16.mxu1 %v6831_v12 }
 0x7f9   :  { %2619 = vmatpush1.bf16.msra.mxu0 %v6832_v30  ;;  %2660 = vmatpush1.bf16.msra.mxu1 %v6833_v36 }
 0x7fa   :  { %2620 = vmatprep.subr.bf16.mxu0 %v6834_v54  ;;  %2661 = vmatprep.subr.bf16.mxu1 %v6835_v3 }
 0x7fd   :  { %2621 = vmatpush1.bf16.msra.mxu0 %v6836_v48  ;;  %2662 = vmatpush1.bf16.msra.mxu1 %v6837_v28  ;;  %v6842_v28 = vld [vmem:[#allocation171_spill] sm:$0xff] }
 0x7fe   :  { %2672 = vmatprep.subr.bf16.mxu0 %v6838_v63  ;;  %2713 = vmatprep.subr.bf16.mxu1 %v6839_v7 }
 0x853   :  { %v2395_v46 = vpop.f32.mrb[56].mxu0  ;;  %v2436_v26 = vpop.f32.mrb[56].mxu1 }
 0x854   :  { %v2525_v12 = vadd.f32 %v2395_v46, %v6840_v18  ;;  %v2397_v17 = vpop.f32.mrb[57].mxu0  ;;  %v2438_v30 = vpop.f32.mrb[57].mxu1  ;;  %v2527_v63 = vadd.f32 %v2436_v26, %v6842_v28 }
 0x855   :  { %v2526_v36 = vadd.f32 %v2397_v17, %v6841_v1  ;;  %v2399_v40 = vpop.f32.mrb[58].mxu0  ;;  %v2440_v54 = vpop.f32.mrb[58].mxu1  ;;  %v2528_v7 = vadd.f32 %v2438_v30, %v6843_v55 }
 0x856   :  { %v3505_v43 = vmul.f32 -1.442695, %v2525_v12  ;;  %v2400_v3 = vpop.f32.mrb[59].mxu0  ;;  %v2441_v24 = vpop.f32.mrb[59].mxu1  ;;  %v3507_v21 = vmul.f32 -1.442695, %v2527_v63 }
 0x857   :  { %v3506_v48 = vmul.f32 -1.442695, %v2526_v36  ;;  %v6844_v3 = vld [vmem:[#allocation86_spill] sm:$0xff] }
 0x858   :  { %3900 = vpow2.f32 %v3505_v43 }
 0x859   :  { %3902 = vpow2.f32 %v3506_v48 }
 0x85a   :  { %3904 = vtanh.f32 %v2528_v7 }
 0x85b   :  { %3906 = vpow2.f32 %v3507_v21 }
 0x862   :  { %v3901_v11 = vpop.eup %3900 }
 0x863   :  { %v2538_v42 = vadd.f32 1.0, %v3901_v11  ;;  %v3903_v46 = vpop.eup %3902 }
 0x864   :  { %v2539_v17 = vadd.f32 1.0, %v3903_v46  ;;  %v3905_v40 = vpop.eup %3904  ;;  %v6846_v46 = vld [vmem:[#allocation161_spill] sm:$0xff] }
 0x865   :  { %3908 = vrcp.f32 %v2538_v42  ;;  %v3907_v12 = vpop.eup %3906 }
 0x866   :  { %3910 = vrcp.f32 %v2539_v17  ;;  %v2540_v43 = vadd.f32 1.0, %v3907_v12 }
 0x868   :  { %3912 = vrcp.f32 %v2540_v43 }
 0x86f   :  { %v3909_v54 = vpop.eup %3908 }
 0x870   :  { %v2549_v24 = vmul.f32 %v3909_v54, %v3905_v40  ;;  %v3911_v36 = vpop.eup %3910  ;;  %v6847_v40 = vld [vmem:[#allocation163_spill] sm:$0xff] }
 0x871   :  { %v2548_v48 = vmul.f32 %v3911_v36, %v6844_v3  ;;  %v6848_v36 = vld [vmem:[#allocation162_spill] sm:$0xff]  ;;  %v6849_v3 = vld [vmem:[#allocation164_spill] sm:$0xff] }
 0x872   :  { %v3913_v11 = vpop.eup %3912 }
 0x873   :  { %v5486_v26 = vadd.f32 %v2549_v24, %v2548_v48 }
 0x875   :  { %6845 = vst [vmem:[#allocation87_spill] sm:$0xff] %v5486_v26  ;;  %3914 = vtanh.f32 %v5486_v26 }
 0x87f   :  { %v3915_v63 = vpop.eup %3914 }
 0x880   :  { %v2552_v7 = vmul.f32 %v3915_v63, %v3913_v11 }
 0x882   :  { %v2589_v21 = vpack.c.bf16 %v2552_v7, %v2552_v7 }
 0x884   :  { %2622 = vmatprep.mubr.bf16.mxu0 %v2589_v21  ;;  %2663 = vmatprep.mubr.bf16.mxu1 %v2589_v21 }
 0x893   :  { %v2477_v42 = vpop.f32.mrb[60].mxu0  ;;  %v2518_v30 = vpop.f32.mrb[60].mxu1 }
 0x894   :  { %v2560_v17 = vadd.f32 %v2477_v42, %v6846_v46  ;;  %v2562_v54 = vadd.f32 %v2518_v30, %v6847_v40  ;;  %v2479_v12 = vpop.f32.mrb[61].mxu0  ;;  %v2520_v55 = vpop.f32.mrb[61].mxu1 }
 0x895   :  { %v2561_v24 = vadd.f32 %v2479_v12, %v6848_v36  ;;  %v2563_v43 = vadd.f32 %v2520_v55, %v6849_v3  ;;  %v2481_v48 = vpop.f32.mrb[62].mxu0  ;;  %v2522_v26 = vpop.f32.mrb[62].mxu1  ;;  %v6853_v3 = vld [vmem:[#allocation127_spill] sm:$0xff] }
 0x896   :  { %v3508_v28 = vmul.f32 -1.442695, %v2560_v17  ;;  %v2482_v1 = vpop.f32.mrb[63].mxu0  ;;  %v2523_v11 = vpop.f32.mrb[63].mxu1  ;;  %v3510_v7 = vmul.f32 -1.442695, %v2562_v54 }
 0x897   :  { %v3509_v63 = vmul.f32 -1.442695, %v2561_v24  ;;  %v6855_v48 = vld [vmem:[#allocation129_spill] sm:$0xff]  ;;  %v6856_v11 = vld [vmem:[#allocation130_spill] sm:$0xff] }
 0x898   :  { %3916 = vpow2.f32 %v3508_v28 }
 0x899   :  { %3918 = vpow2.f32 %v3509_v63  ;;  %v6857_v63 = vld [vmem:[#allocation131_spill] sm:$0xff] }
 0x89a   :  { %3920 = vtanh.f32 %v2563_v43  ;;  %v6854_v43 = vld [vmem:[#allocation128_spill] sm:$0xff] }
 0x89b   :  { %3922 = vpow2.f32 %v3510_v7  ;;  %v6858_v7 = vld [vmem:[#allocation132_spill] sm:$0xff] }
 0x8a2   :  { %v3917_v18 = vpop.eup %3916 }
 0x8a3   :  { %v2573_v10 = vadd.f32 1.0, %v3917_v18  ;;  %v3919_v42 = vpop.eup %3918 }
 0x8a4   :  { %v2574_v30 = vadd.f32 1.0, %v3919_v42  ;;  %v3921_v46 = vpop.eup %3920  ;;  %v6859_v42 = vld [vmem:[#allocation133_spill] sm:$0xff] }
 0x8a5   :  { %3924 = vrcp.f32 %v2573_v10  ;;  %v3923_v40 = vpop.eup %3922  ;;  %v6851_v10 = vld [vmem:[#allocation125_spill] sm:$0xff] }
 0x8a6   :  { %3926 = vrcp.f32 %v2574_v30  ;;  %v2575_v17 = vadd.f32 1.0, %v3923_v40  ;;  %v6860_v30 = vld [vmem:[#allocation134_spill] sm:$0xff]  ;;  %v6862_v40 = vld [vmem:[#allocation136_spill] sm:$0xff] }
 0x8a8   :  { %3928 = vrcp.f32 %v2575_v17  ;;  %v6866_v17 = vld [vmem:[#allocation140_spill] sm:$0xff] }
 0x8af   :  { %v3925_v55 = vpop.eup %3924 }
 0x8b0   :  { %v2584_v12 = vmul.f32 %v3925_v55, %v3921_v46  ;;  %v3927_v26 = vpop.eup %3926  ;;  %v6861_v46 = vld [vmem:[#allocation135_spill] sm:$0xff]  ;;  %v6863_v55 = vld [vmem:[#allocation137_spill] sm:$0xff] }
 0x8b1   :  { %v2583_v1 = vmul.f32 %v3927_v26, %v5344_v19  ;;  %v6850_v19 = vld [vmem:[#allocation124_spill] sm:$0xff]  ;;  %v6865_v26 = vld [vmem:[#allocation139_spill] sm:$0xff] }
 0x8b2   :  { %v3929_v18 = vpop.eup %3928 }
 0x8b3   :  { %v5494_v36 = vadd.f32 %v2584_v12, %v2583_v1  ;;  %v6864_v12 = vld [vmem:[#allocation138_spill] sm:$0xff]  ;;  %v6867_v1 = vld [vmem:[#allocation141_spill] sm:$0xff] }
 0x8b5   :  { %3930 = vtanh.f32 %v5494_v36 }
 0x8bf   :  { %v3931_v28 = vpop.eup %3930 }
 0x8c0   :  { %v2587_v54 = vmul.f32 %v3931_v28, %v3929_v18  ;;  %v6868_v18 = vld [vmem:[#allocation142_spill] sm:$0xff]  ;;  %v6869_v28 = vld [vmem:[#allocation143_spill] sm:$0xff] }
 0x8c2   :  { %v5497_v24 = vpack.c.bf16 %v2587_v54, %v2587_v54  ;;  %v6870_v54 = vld [vmem:[#allocation144_spill] sm:$0xff] }
 0x8c4   :  { %2623 = vmatmul.mubr.bf16.vlgmr.msra.gmra.mrb[64].mxu0 %v5497_v24  ;;  %2664 = vmatmul.mubr.bf16.vlgmr.msra.gmra.mrb[64].mxu1 %v5497_v24 }
 0x8c5   :  { %2673 = vmatpush1.bf16.msra.mxu0 %v4400_v22  ;;  %2714 = vmatpush1.bf16.msra.mxu1 %v6366_v13 }
 0x8c6   :  { %2704 = vmatprep.mubr.bf16.mxu0 %v2589_v21  ;;  %2745 = vmatprep.mubr.bf16.mxu1 %v2589_v21  ;;  %v6852_v21 = vld [vmem:[#allocation126_spill] sm:$0xff] }
 0x8c7   :  { %2674 = vmatprep.subr.bf16.mxu0 %v6367_v6  ;;  %2715 = vmatprep.subr.bf16.mxu1 %v6368_v58 }
 0x8c9   :  { %2675 = vmatpush1.bf16.msra.mxu0 %v6369_v31  ;;  %2716 = vmatpush1.bf16.msra.mxu1 %v6370_v4 }
 0x8ca   :  { %2676 = vmatprep.subr.bf16.mxu0 %v6371_v47  ;;  %2717 = vmatprep.subr.bf16.mxu1 %v6372_v39 }
 0x8cd   :  { %2677 = vmatpush1.bf16.msra.mxu0 %v6373_v20  ;;  %2718 = vmatpush1.bf16.msra.mxu1 %v6374_v9 }
 0x8ce   :  { %2678 = vmatprep.subr.bf16.mxu0 %v6462_v44  ;;  %2719 = vmatprep.subr.bf16.mxu1 %v6463_v15 }
 0x8d1   :  { %2679 = vmatpush1.bf16.msra.mxu0 %v6464_v45  ;;  %2720 = vmatpush1.bf16.msra.mxu1 %v6465_v60 }
 0x8d2   :  { %2680 = vmatprep.subr.bf16.mxu0 %v6466_v41  ;;  %2721 = vmatprep.subr.bf16.mxu1 %v6467_v2 }
 0x8d5   :  { %2681 = vmatpush1.bf16.msra.mxu0 %v6468_v35  ;;  %2722 = vmatpush1.bf16.msra.mxu1 %v6469_v49 }
 0x8d6   :  { %2682 = vmatprep.subr.bf16.mxu0 %v6470_v51  ;;  %2723 = vmatprep.subr.bf16.mxu1 %v6471_v34 }
 0x8d9   :  { %2683 = vmatpush1.bf16.msra.mxu0 %v6559_v50  ;;  %2724 = vmatpush1.bf16.msra.mxu1 %v6560_v14 }
 0x8da   :  { %2684 = vmatprep.subr.bf16.mxu0 %v6561_v56  ;;  %2725 = vmatprep.subr.bf16.mxu1 %v6562_v25 }
 0x8dd   :  { %2685 = vmatpush1.bf16.msra.mxu0 %v6563_v29  ;;  %2726 = vmatpush1.bf16.msra.mxu1 %v6564_v62 }
 0x8de   :  { %2686 = vmatprep.subr.bf16.mxu0 %v6478_v52  ;;  %2727 = vmatprep.subr.bf16.mxu1 %v6565_v16 }
 0x8e1   :  { %2687 = vmatpush1.bf16.msra.mxu0 %v6566_v27  ;;  %2728 = vmatpush1.bf16.msra.mxu1 %v6567_v32 }
 0x8e2   :  { %2688 = vmatprep.subr.bf16.mxu0 %v6568_v5  ;;  %2729 = vmatprep.subr.bf16.mxu1 %v6483_v59 }
 0x8e5   :  { %2689 = vmatpush1.bf16.msra.mxu0 %v6569_v38  ;;  %2730 = vmatpush1.bf16.msra.mxu1 %v6570_v33 }
 0x8e6   :  { %2690 = vmatprep.subr.bf16.mxu0 %v6486_v57  ;;  %2731 = vmatprep.subr.bf16.mxu1 %v6487_v61 }
 0x8e9   :  { %2691 = vmatpush1.bf16.msra.mxu0 %v6488_v53  ;;  %2732 = vmatpush1.bf16.msra.mxu1 %v6402_v23 }
 0x8ea   :  { %2692 = vmatprep.subr.bf16.mxu0 %v6489_v37  ;;  %2733 = vmatprep.subr.bf16.mxu1 %v6490_v0 }
 0x8ed   :  { %2693 = vmatpush1.bf16.msra.mxu0 %v6491_v8  ;;  %2734 = vmatpush1.bf16.msra.mxu1 %v6850_v19 }
 0x8ee   :  { %2694 = vmatprep.subr.bf16.mxu0 %v6851_v10  ;;  %2735 = vmatprep.subr.bf16.mxu1 %v6852_v21 }
 0x8f1   :  { %2695 = vmatpush1.bf16.msra.mxu0 %v6853_v3  ;;  %2736 = vmatpush1.bf16.msra.mxu1 %v6854_v43  ;;  %v6940_v43 = vld [vmem:[#allocation172_spill] sm:$0xff] }
 0x8f2   :  { %2696 = vmatprep.subr.bf16.mxu0 %v6855_v48  ;;  %2737 = vmatprep.subr.bf16.mxu1 %v6856_v11 }
 0x8f5   :  { %2697 = vmatpush1.bf16.msra.mxu0 %v6857_v63  ;;  %2738 = vmatpush1.bf16.msra.mxu1 %v6858_v7  ;;  %v6938_v7 = vld [vmem:[#allocation170_spill] sm:$0xff] }
 0x8f6   :  { %2698 = vmatprep.subr.bf16.mxu0 %v6859_v42  ;;  %2739 = vmatprep.subr.bf16.mxu1 %v6860_v30  ;;  %v6871_v30 = vld [vmem:[#allocation17_spill] sm:$0xff] }
 0x8f9   :  { %2699 = vmatpush1.bf16.msra.mxu0 %v6861_v46  ;;  %2740 = vmatpush1.bf16.msra.mxu1 %v6862_v40  ;;  %v6872_v46 = vld [vmem:[#allocation18_spill] sm:$0xff]  ;;  %v6937_v40 = vld [vmem:[#allocation169_spill] sm:$0xff] }
 0x8fa   :  { %2700 = vmatprep.subr.bf16.mxu0 %v6863_v55  ;;  %2741 = vmatprep.subr.bf16.mxu1 %v6864_v12  ;;  %v6873_v12 = vld [vmem:[#allocation19_spill] sm:$0xff]  ;;  %v6882_v55 = vld [vmem:[#allocation28_spill] sm:$0xff] }
 0x8fd   :  { %2701 = vmatpush1.bf16.msra.mxu0 %v6865_v26  ;;  %2742 = vmatpush1.bf16.msra.mxu1 %v6866_v17  ;;  %v6874_v26 = vld [vmem:[#allocation20_spill] sm:$0xff]  ;;  %v6875_v17 = vld [vmem:[#allocation21_spill] sm:$0xff] }
 0x8fe   :  { %2702 = vmatprep.subr.bf16.mxu0 %v6867_v1  ;;  %2743 = vmatprep.subr.bf16.mxu1 %v6868_v18  ;;  %v6876_v1 = vld [vmem:[#allocation22_spill] sm:$0xff]  ;;  %v6877_v18 = vld [vmem:[#allocation23_spill] sm:$0xff] }
 0x901   :  { %2703 = vmatpush1.bf16.msra.mxu0 %v6869_v28  ;;  %2744 = vmatpush1.bf16.msra.mxu1 %v6870_v54  ;;  %v6878_v28 = vld [vmem:[#allocation24_spill] sm:$0xff]  ;;  %v6879_v54 = vld [vmem:[#allocation25_spill] sm:$0xff] }
 0x902   :  { %2819 = vmatprep.subr.bf16.mxu0 %v6871_v30  ;;  %2860 = vmatprep.subr.bf16.mxu1 %v6872_v46  ;;  %v6880_v30 = vld [vmem:[#allocation26_spill] sm:$0xff]  ;;  %v6881_v46 = vld [vmem:[#allocation27_spill] sm:$0xff] }
 0x904   :  { %2705 = vmatmul.mubr.bf16.vlgmr.msra.gmra.mrb[68].mxu0 %v5497_v24  ;;  %2746 = vmatmul.mubr.bf16.vlgmr.msra.gmra.mrb[68].mxu1 %v5497_v24  ;;  %v6883_v24 = vld [vmem:[#allocation29_spill] sm:$0xff] }
 0x905   :  { %2820 = vmatpush1.bf16.msra.mxu0 %v6873_v12  ;;  %2861 = vmatpush1.bf16.msra.mxu1 %v6874_v26  ;;  %v6884_v12 = vld [vmem:[#allocation30_spill] sm:$0xff]  ;;  %v6885_v26 = vld [vmem:[#allocation31_spill] sm:$0xff] }
 0x906   :  { %2821 = vmatprep.subr.bf16.mxu0 %v6875_v17  ;;  %2862 = vmatprep.subr.bf16.mxu1 %v6876_v1  ;;  %v6886_v17 = vld [vmem:[#allocation32_spill] sm:$0xff]  ;;  %v6887_v1 = vld [vmem:[#allocation33_spill] sm:$0xff] }
 0x909   :  { %2822 = vmatpush1.bf16.msra.mxu0 %v6877_v18  ;;  %2863 = vmatpush1.bf16.msra.mxu1 %v6878_v28  ;;  %v6888_v18 = vld [vmem:[#allocation34_spill] sm:$0xff]  ;;  %v6889_v28 = vld [vmem:[#allocation35_spill] sm:$0xff] }
 0x90a   :  { %2823 = vmatprep.subr.bf16.mxu0 %v6879_v54  ;;  %2864 = vmatprep.subr.bf16.mxu1 %v6880_v30  ;;  %v6890_v54 = vld [vmem:[#allocation36_spill] sm:$0xff]  ;;  %v6891_v30 = vld [vmem:[#allocation37_spill] sm:$0xff] }
 0x90d   :  { %2824 = vmatpush1.bf16.msra.mxu0 %v6881_v46  ;;  %2865 = vmatpush1.bf16.msra.mxu1 %v6882_v55  ;;  %v6892_v46 = vld [vmem:[#allocation38_spill] sm:$0xff]  ;;  %v6893_v55 = vld [vmem:[#allocation39_spill] sm:$0xff] }
 0x90e   :  { %2825 = vmatprep.subr.bf16.mxu0 %v6883_v24  ;;  %2866 = vmatprep.subr.bf16.mxu1 %v6884_v12  ;;  %v6894_v24 = vld [vmem:[#allocation40_spill] sm:$0xff]  ;;  %v6895_v12 = vld [vmem:[#allocation41_spill] sm:$0xff] }
 0x911   :  { %2826 = vmatpush1.bf16.msra.mxu0 %v6885_v26  ;;  %2867 = vmatpush1.bf16.msra.mxu1 %v6886_v17  ;;  %v6896_v26 = vld [vmem:[#allocation42_spill] sm:$0xff]  ;;  %v6897_v17 = vld [vmem:[#allocation43_spill] sm:$0xff] }
 0x912   :  { %2827 = vmatprep.subr.bf16.mxu0 %v6887_v1  ;;  %2868 = vmatprep.subr.bf16.mxu1 %v6888_v18  ;;  %v6898_v1 = vld [vmem:[#allocation44_spill] sm:$0xff]  ;;  %v6899_v18 = vld [vmem:[#allocation45_spill] sm:$0xff] }
 0x915   :  { %2828 = vmatpush1.bf16.msra.mxu0 %v6889_v28  ;;  %2869 = vmatpush1.bf16.msra.mxu1 %v6890_v54  ;;  %v6900_v28 = vld [vmem:[#allocation46_spill] sm:$0xff]  ;;  %v6901_v54 = vld [vmem:[#allocation47_spill] sm:$0xff] }
 0x916   :  { %2829 = vmatprep.subr.bf16.mxu0 %v6891_v30  ;;  %2870 = vmatprep.subr.bf16.mxu1 %v6892_v46  ;;  %v6902_v30 = vld [vmem:[#allocation48_spill] sm:$0xff]  ;;  %v6903_v46 = vld [vmem:[#allocation49_spill] sm:$0xff] }
 0x919   :  { %2830 = vmatpush1.bf16.msra.mxu0 %v6893_v55  ;;  %2871 = vmatpush1.bf16.msra.mxu1 %v6894_v24  ;;  %v6904_v55 = vld [vmem:[#allocation50_spill] sm:$0xff]  ;;  %v6905_v24 = vld [vmem:[#allocation51_spill] sm:$0xff] }
 0x91a   :  { %2831 = vmatprep.subr.bf16.mxu0 %v6895_v12  ;;  %2872 = vmatprep.subr.bf16.mxu1 %v6896_v26  ;;  %v6906_v12 = vld [vmem:[#allocation52_spill] sm:$0xff]  ;;  %v6907_v26 = vld [vmem:[#allocation53_spill] sm:$0xff] }
 0x91d   :  { %2832 = vmatpush1.bf16.msra.mxu0 %v6897_v17  ;;  %2873 = vmatpush1.bf16.msra.mxu1 %v6898_v1  ;;  %v6908_v17 = vld [vmem:[#allocation54_spill] sm:$0xff]  ;;  %v6909_v1 = vld [vmem:[#allocation55_spill] sm:$0xff] }
 0x91e   :  { %2833 = vmatprep.subr.bf16.mxu0 %v6899_v18  ;;  %2874 = vmatprep.subr.bf16.mxu1 %v6900_v28  ;;  %v6910_v18 = vld [vmem:[#allocation56_spill] sm:$0xff]  ;;  %v6911_v28 = vld [vmem:[#allocation57_spill] sm:$0xff] }
 0x921   :  { %2834 = vmatpush1.bf16.msra.mxu0 %v6901_v54  ;;  %2875 = vmatpush1.bf16.msra.mxu1 %v6902_v30  ;;  %v6912_v54 = vld [vmem:[#allocation58_spill] sm:$0xff]  ;;  %v6913_v30 = vld [vmem:[#allocation59_spill] sm:$0xff] }
 0x922   :  { %2835 = vmatprep.subr.bf16.mxu0 %v6903_v46  ;;  %2876 = vmatprep.subr.bf16.mxu1 %v6904_v55  ;;  %v6914_v46 = vld [vmem:[#allocation60_spill] sm:$0xff]  ;;  %v6915_v55 = vld [vmem:[#allocation61_spill] sm:$0xff] }
 0x925   :  { %2836 = vmatpush1.bf16.msra.mxu0 %v6905_v24  ;;  %2877 = vmatpush1.bf16.msra.mxu1 %v6906_v12  ;;  %v6916_v24 = vld [vmem:[#allocation62_spill] sm:$0xff]  ;;  %v6917_v12 = vld [vmem:[#allocation63_spill] sm:$0xff] }
 0x926   :  { %2837 = vmatprep.subr.bf16.mxu0 %v6907_v26  ;;  %2878 = vmatprep.subr.bf16.mxu1 %v6908_v17  ;;  %v6918_v26 = vld [vmem:[#allocation64_spill] sm:$0xff]  ;;  %v6919_v17 = vld [vmem:[#allocation65_spill] sm:$0xff] }
 0x929   :  { %2838 = vmatpush1.bf16.msra.mxu0 %v6909_v1  ;;  %2879 = vmatpush1.bf16.msra.mxu1 %v6910_v18  ;;  %v6920_v1 = vld [vmem:[#allocation66_spill] sm:$0xff]  ;;  %v6921_v18 = vld [vmem:[#allocation67_spill] sm:$0xff] }
 0x92a   :  { %2839 = vmatprep.subr.bf16.mxu0 %v6911_v28  ;;  %2880 = vmatprep.subr.bf16.mxu1 %v6912_v54  ;;  %v6922_v28 = vld [vmem:[#allocation68_spill] sm:$0xff]  ;;  %v6923_v54 = vld [vmem:[#allocation69_spill] sm:$0xff] }
 0x92d   :  { %2840 = vmatpush1.bf16.msra.mxu0 %v6913_v30  ;;  %2881 = vmatpush1.bf16.msra.mxu1 %v6914_v46  ;;  %v6924_v30 = vld [vmem:[#allocation71_spill] sm:$0xff]  ;;  %v6925_v46 = vld [vmem:[#allocation70_spill] sm:$0xff] }
 0x92e   :  { %2841 = vmatprep.subr.bf16.mxu0 %v6915_v55  ;;  %2882 = vmatprep.subr.bf16.mxu1 %v6916_v24  ;;  %v6926_v55 = vld [vmem:[#allocation72_spill] sm:$0xff]  ;;  %v6927_v24 = vld [vmem:[#allocation73_spill] sm:$0xff] }
 0x931   :  { %2842 = vmatpush1.bf16.msra.mxu0 %v6917_v12  ;;  %2883 = vmatpush1.bf16.msra.mxu1 %v6918_v26  ;;  %v6928_v12 = vld [vmem:[#allocation74_spill] sm:$0xff]  ;;  %v6929_v26 = vld [vmem:[#allocation75_spill] sm:$0xff] }
 0x932   :  { %2843 = vmatprep.subr.bf16.mxu0 %v6919_v17  ;;  %2884 = vmatprep.subr.bf16.mxu1 %v6920_v1  ;;  %v6930_v17 = vld [vmem:[#allocation76_spill] sm:$0xff]  ;;  %v6931_v1 = vld [vmem:[#allocation77_spill] sm:$0xff] }
 0x935   :  { %2844 = vmatpush1.bf16.msra.mxu0 %v6921_v18  ;;  %2885 = vmatpush1.bf16.msra.mxu1 %v6922_v28  ;;  %v6932_v18 = vld [vmem:[#allocation78_spill] sm:$0xff]  ;;  %v6933_v28 = vld [vmem:[#allocation79_spill] sm:$0xff] }
 0x936   :  { %2845 = vmatprep.subr.bf16.mxu0 %v6923_v54  ;;  %2886 = vmatprep.subr.bf16.mxu1 %v6924_v30  ;;  %v6934_v54 = vld [vmem:[#allocation80_spill] sm:$0xff]  ;;  %v6935_v30 = vld [vmem:[#allocation81_spill] sm:$0xff] }
 0x939   :  { %2846 = vmatpush1.bf16.msra.mxu0 %v6925_v46  ;;  %2887 = vmatpush1.bf16.msra.mxu1 %v6926_v55  ;;  %v6936_v46 = vld [vmem:[#allocation82_spill] sm:$0xff] }
 0x93a   :  { %2847 = vmatprep.subr.bf16.mxu0 %v6927_v24  ;;  %2888 = vmatprep.subr.bf16.mxu1 %v6928_v12 }
 0x93d   :  { %2848 = vmatpush1.bf16.msra.mxu0 %v6929_v26  ;;  %2889 = vmatpush1.bf16.msra.mxu1 %v6930_v17 }
 0x93e   :  { %2849 = vmatprep.subr.bf16.mxu0 %v6931_v1  ;;  %2890 = vmatprep.subr.bf16.mxu1 %v6932_v18 }
 0x941   :  { %2850 = vmatpush1.bf16.msra.mxu0 %v6933_v28  ;;  %2891 = vmatpush1.bf16.msra.mxu1 %v6934_v54  ;;  %v6939_v54 = vld [vmem:[#allocation171_spill] sm:$0xff] }
 0x942   :  { %2901 = vmatprep.subr.bf16.mxu0 %v6935_v30  ;;  %2942 = vmatprep.subr.bf16.mxu1 %v6936_v46 }
 0x997   :  { %v2624_v55 = vpop.f32.mrb[64].mxu0  ;;  %v2665_v24 = vpop.f32.mrb[64].mxu1 }
 0x998   :  { %v2754_v12 = vadd.f32 %v2624_v55, %v6937_v40  ;;  %v2626_v42 = vpop.f32.mrb[65].mxu0  ;;  %v2667_v26 = vpop.f32.mrb[65].mxu1  ;;  %v2756_v30 = vadd.f32 %v2665_v24, %v6939_v54 }
 0x999   :  { %v2755_v17 = vadd.f32 %v2626_v42, %v6938_v7  ;;  %v2628_v63 = vpop.f32.mrb[66].mxu0  ;;  %v2669_v1 = vpop.f32.mrb[66].mxu1  ;;  %v2757_v46 = vadd.f32 %v2667_v26, %v6940_v43 }
 0x99a   :  { %v3511_v11 = vmul.f32 -1.442695, %v2754_v12  ;;  %v2629_v18 = vpop.f32.mrb[67].mxu0  ;;  %v2670_v48 = vpop.f32.mrb[67].mxu1  ;;  %v3513_v3 = vmul.f32 -1.442695, %v2756_v30 }
 0x99b   :  { %v3512_v28 = vmul.f32 -1.442695, %v2755_v17  ;;  %v6941_v18 = vld [vmem:[#allocation87_spill] sm:$0xff] }
 0x99c   :  { %3932 = vpow2.f32 %v3511_v11 }
 0x99d   :  { %3934 = vpow2.f32 %v3512_v28 }
 0x99e   :  { %3936 = vtanh.f32 %v2757_v46 }
 0x99f   :  { %3938 = vpow2.f32 %v3513_v3 }
 0x9a6   :  { %v3933_v21 = vpop.eup %3932 }
 0x9a7   :  { %v2767_v10 = vadd.f32 1.0, %v3933_v21  ;;  %v3935_v55 = vpop.eup %3934 }
 0x9a8   :  { %v2768_v42 = vadd.f32 1.0, %v3935_v55  ;;  %v3937_v63 = vpop.eup %3936  ;;  %v6943_v55 = vld [vmem:[#allocation165_spill] sm:$0xff] }
 0x9a9   :  { %3940 = vrcp.f32 %v2767_v10  ;;  %v3939_v12 = vpop.eup %3938 }
 0x9aa   :  { %3942 = vrcp.f32 %v2768_v42  ;;  %v2769_v11 = vadd.f32 1.0, %v3939_v12 }
 0x9ac   :  { %3944 = vrcp.f32 %v2769_v11 }
 0x9b3   :  { %v3941_v1 = vpop.eup %3940 }
 0x9b4   :  { %v2778_v48 = vmul.f32 %v3941_v1, %v3937_v63  ;;  %v3943_v17 = vpop.eup %3942  ;;  %v6944_v63 = vld [vmem:[#allocation167_spill] sm:$0xff] }
 0x9b5   :  { %v2777_v28 = vmul.f32 %v3943_v17, %v6941_v18  ;;  %v6945_v17 = vld [vmem:[#allocation166_spill] sm:$0xff]  ;;  %v6946_v18 = vld [vmem:[#allocation168_spill] sm:$0xff] }
 0x9b6   :  { %v3945_v21 = vpop.eup %3944 }
 0x9b7   :  { %v5636_v24 = vadd.f32 %v2778_v48, %v2777_v28 }
 0x9b9   :  { %6942 = vst [vmem:[#allocation88_spill] sm:$0xff] %v5636_v24  ;;  %3946 = vtanh.f32 %v5636_v24 }
 0x9c3   :  { %v3947_v26 = vpop.eup %3946 }
 0x9c4   :  { %v2781_v30 = vmul.f32 %v3947_v26, %v3945_v21 }
 0x9c6   :  { %v2818_v3 = vpack.c.bf16 %v2781_v30, %v2781_v30 }
 0x9c8   :  { %2851 = vmatprep.mubr.bf16.mxu0 %v2818_v3  ;;  %2892 = vmatprep.mubr.bf16.mxu1 %v2818_v3 }
 0x9d7   :  { %v2706_v10 = vpop.f32.mrb[68].mxu0  ;;  %v2747_v46 = vpop.f32.mrb[68].mxu1 }
 0x9d8   :  { %v2789_v42 = vadd.f32 %v2706_v10, %v6943_v55  ;;  %v2791_v1 = vadd.f32 %v2747_v46, %v6944_v63  ;;  %v2708_v12 = vpop.f32.mrb[69].mxu0  ;;  %v2749_v43 = vpop.f32.mrb[69].mxu1 }
 0x9d9   :  { %v2790_v48 = vadd.f32 %v2708_v12, %v6945_v17  ;;  %v2792_v11 = vadd.f32 %v2749_v43, %v6946_v18  ;;  %v2710_v28 = vpop.f32.mrb[70].mxu0  ;;  %v2751_v24 = vpop.f32.mrb[70].mxu1  ;;  %v3037_v18 = vld [vmem:[%s5888_s4 + $0x70] sm:$0xff] }
 0x9da   :  { %v3514_v54 = vmul.f32 -1.442695, %v2789_v42  ;;  %v2711_v7 = vpop.f32.mrb[71].mxu0  ;;  %v2752_v21 = vpop.f32.mrb[71].mxu1  ;;  %v3516_v30 = vmul.f32 -1.442695, %v2791_v1 }
 0x9db   :  { %v3515_v26 = vmul.f32 -1.442695, %v2790_v48  ;;  %v3117_v21 = vld [vmem:[%s5890_s6] sm:$0xff] }
 0x9dc   :  { %3948 = vpow2.f32 %v3514_v54 }
 0x9dd   :  { %3950 = vpow2.f32 %v3515_v26  ;;  %v3118_v26 = vld [vmem:[%s5890_s6 + $0x8] sm:$0xff] }
 0x9de   :  { %3952 = vtanh.f32 %v2792_v11  ;;  %v3038_v11 = vld [vmem:[%s5888_s4 + $0x78] sm:$0xff] }
 0x9df   :  { %3954 = vpow2.f32 %v3516_v30  ;;  %v3678_v28 = vpack.c.bf16 %v3038_v11, %v3037_v18  ;;  %v3119_v30 = vld [vmem:[%s5890_s6 + $0x10] sm:$0xff] }
 0x9e6   :  { %v3949_v40 = vpop.eup %3948 }
 0x9e7   :  { %v2802_v19 = vadd.f32 1.0, %v3949_v40  ;;  %v3951_v10 = vpop.eup %3950 }
 0x9e8   :  { %v2803_v46 = vadd.f32 1.0, %v3951_v10  ;;  %v3953_v55 = vpop.eup %3952  ;;  %v3681_v10 = vpack.c.bf16 %v3118_v26, %v3117_v21 }
 0x9e9   :  { %3956 = vrcp.f32 %v2802_v19  ;;  %v3955_v63 = vpop.eup %3954  ;;  %v6969_v19 = vmov 0.0  }
 0x9ea   :  { %3958 = vrcp.f32 %v2803_v46  ;;  %v2804_v42 = vadd.f32 1.0, %v3955_v63  ;;  %v3120_v46 = vld [vmem:[%s5890_s6 + $0x18] sm:$0xff]  ;;  %v3121_v63 = vld [vmem:[%s5890_s6 + $0x20] sm:$0xff] }
 0x9ec   :  { %3960 = vrcp.f32 %v2804_v42  ;;  %v3124_v42 = vld [vmem:[%s5890_s6 + $0x38] sm:$0xff] }
 0x9f3   :  { %v3957_v43 = vpop.eup %3956 }
 0x9f4   :  { %v2813_v12 = vmul.f32 %v3957_v43, %v3953_v55  ;;  %v3959_v24 = vpop.eup %3958  ;;  %v3684_v55 = vpack.c.bf16 %v3120_v46, %v3119_v30  ;;  %v3122_v43 = vld [vmem:[%s5890_s6 + $0x28] sm:$0xff]  ;;  %v3131_v30 = vld [vmem:[%s5890_s6 + $0x70] sm:$0xff] }
 0x9f5   :  { %v2812_v7 = vmul.f32 %v3959_v24, %v5494_v36  ;;  %v3036_v36 = vld [vmem:[%s5888_s4 + $0x68] sm:$0xff]  ;;  %v3123_v24 = vld [vmem:[%s5890_s6 + $0x30] sm:$0xff] }
 0x9f6   :  { %v3961_v54 = vpop.eup %3960 }
 0x9f7   :  { %v2814_v17 = vadd.f32 %v2813_v12, %v2812_v7  ;;  %v3687_v12 = vpack.c.bf16 %v3122_v43, %v3121_v63  ;;  %v3690_v7 = vpack.c.bf16 %v3124_v42, %v3123_v24  ;;  %v3213_v63 = vld [vmem:[%s5892_s8 + $0x10] sm:$0xff]  ;;  %v3215_v42 = vld [vmem:[%s5892_s8 + $0x20] sm:$0xff] }
 0x9f9   :  { %3962 = vtanh.f32 %v2814_v17  ;;  %v3125_v17 = vld [vmem:[%s5890_s6 + $0x40] sm:$0xff] }
 0xa03   :  { %v3963_v1 = vpop.eup %3962 }
 0xa04   :  { %v2816_v40 = vmul.f32 %v3963_v1, %v3961_v54  ;;  %v3126_v54 = vld [vmem:[%s5890_s6 + $0x48] sm:$0xff] }
 0xa05   :  { %v3693_v1 = vpack.c.bf16 %v3126_v54, %v3125_v17  ;;  %v3520_v54 = vld [vmem:[%s5889_s5] ss:$0 sm:$0xff] }
 0xa06   :  { %v5644_v48 = vpack.c.bf16 %v2816_v40, %v2816_v40  ;;  %v3127_v40 = vld [vmem:[%s5890_s6 + $0x50] sm:$0xff] }
 0xa08   :  { %2852 = vmatmul.mubr.bf16.vlgmr.msra.gmra.mrb[72].mxu0 %v5644_v48  ;;  %2893 = vmatmul.mubr.bf16.vlgmr.msra.gmra.mrb[72].mxu1 %v5644_v48 }
 0xa09   :  { %2902 = vmatpush1.bf16.msra.mxu0 %v4400_v22  ;;  %2943 = vmatpush1.bf16.msra.mxu1 %v6366_v13  ;;  %v6947_v22 = vld [vmem:[#allocation124_spill] sm:$0xff]  ;;  %v6948_v13 = vld [vmem:[#allocation125_spill] sm:$0xff] }
 0xa0a   :  { %2933 = vmatprep.mubr.bf16.mxu0 %v2818_v3  ;;  %2974 = vmatprep.mubr.bf16.mxu1 %v2818_v3 }
 0xa0b   :  { %2903 = vmatprep.subr.bf16.mxu0 %v6367_v6  ;;  %2944 = vmatprep.subr.bf16.mxu1 %v6368_v58  ;;  %v6949_v6 = vld [vmem:[#allocation126_spill] sm:$0xff]  ;;  %v6950_v58 = vld [vmem:[#allocation127_spill] sm:$0xff] }
 0xa0d   :  { %2904 = vmatpush1.bf16.msra.mxu0 %v6369_v31  ;;  %2945 = vmatpush1.bf16.msra.mxu1 %v6370_v4  ;;  %v6951_v31 = vld [vmem:[#allocation128_spill] sm:$0xff]  ;;  %v6952_v4 = vld [vmem:[#allocation129_spill] sm:$0xff] }
 0xa0e   :  { %2905 = vmatprep.subr.bf16.mxu0 %v6371_v47  ;;  %2946 = vmatprep.subr.bf16.mxu1 %v6372_v39  ;;  %v6953_v47 = vld [vmem:[#allocation130_spill] sm:$0xff]  ;;  %v6954_v39 = vld [vmem:[#allocation131_spill] sm:$0xff] }
 0xa11   :  { %2906 = vmatpush1.bf16.msra.mxu0 %v6373_v20  ;;  %2947 = vmatpush1.bf16.msra.mxu1 %v6374_v9  ;;  %v6955_v20 = vld [vmem:[#allocation132_spill] sm:$0xff]  ;;  %v6956_v9 = vld [vmem:[#allocation133_spill] sm:$0xff] }
 0xa12   :  { %2907 = vmatprep.subr.bf16.mxu0 %v6462_v44  ;;  %2948 = vmatprep.subr.bf16.mxu1 %v6463_v15  ;;  %v6958_v44 = vld [vmem:[#allocation135_spill] sm:$0xff]  ;;  %v6959_v15 = vld [vmem:[#allocation136_spill] sm:$0xff] }
 0xa15   :  { %2908 = vmatpush1.bf16.msra.mxu0 %v6464_v45  ;;  %2949 = vmatpush1.bf16.msra.mxu1 %v6465_v60  ;;  %v6960_v45 = vld [vmem:[#allocation137_spill] sm:$0xff]  ;;  %v6961_v60 = vld [vmem:[#allocation138_spill] sm:$0xff] }
 0xa16   :  { %2909 = vmatprep.subr.bf16.mxu0 %v6466_v41  ;;  %2950 = vmatprep.subr.bf16.mxu1 %v6467_v2  ;;  %v6962_v41 = vld [vmem:[#allocation139_spill] sm:$0xff]  ;;  %v6963_v2 = vld [vmem:[#allocation140_spill] sm:$0xff] }
 0xa19   :  { %2910 = vmatpush1.bf16.msra.mxu0 %v6468_v35  ;;  %2951 = vmatpush1.bf16.msra.mxu1 %v6469_v49  ;;  %v6964_v35 = vld [vmem:[#allocation141_spill] sm:$0xff]  ;;  %v6965_v49 = vld [vmem:[#allocation142_spill] sm:$0xff] }
 0xa1a   :  { %2911 = vmatprep.subr.bf16.mxu0 %v6470_v51  ;;  %2952 = vmatprep.subr.bf16.mxu1 %v6471_v34  ;;  %v6966_v51 = vld [vmem:[#allocation143_spill] sm:$0xff]  ;;  %v6967_v34 = vld [vmem:[#allocation144_spill] sm:$0xff] }
 0xa1d   :  { %2912 = vmatpush1.bf16.msra.mxu0 %v6559_v50  ;;  %2953 = vmatpush1.bf16.msra.mxu1 %v6560_v14  ;;  %v3028_v50 = vld [vmem:[%s5888_s4 + $0x28] sm:$0xff] }
 0xa1e   :  { %2913 = vmatprep.subr.bf16.mxu0 %v6561_v56  ;;  %2954 = vmatprep.subr.bf16.mxu1 %v6562_v25  ;;  %v3029_v56 = vld [vmem:[%s5888_s4 + $0x30] sm:$0xff]  ;;  %v3030_v25 = vld [vmem:[%s5888_s4 + $0x38] sm:$0xff] }
 0xa21   :  { %2914 = vmatpush1.bf16.msra.mxu0 %v6563_v29  ;;  %2955 = vmatpush1.bf16.msra.mxu1 %v6564_v62  ;;  %v3666_v29 = vpack.c.bf16 %v3030_v25, %v3029_v56  ;;  %v3031_v62 = vld [vmem:[%s5888_s4 + $0x40] sm:$0xff] }
 0xa22   :  { %2915 = vmatprep.subr.bf16.mxu0 %v6478_v52  ;;  %2956 = vmatprep.subr.bf16.mxu1 %v6565_v16  ;;  %v3025_v52 = vld [vmem:[%s5888_s4 + $0x10] sm:$0xff]  ;;  %v3032_v16 = vld [vmem:[%s5888_s4 + $0x48] sm:$0xff] }
 0xa25   :  { %2916 = vmatpush1.bf16.msra.mxu0 %v6566_v27  ;;  %2957 = vmatpush1.bf16.msra.mxu1 %v6567_v32  ;;  %v3669_v27 = vpack.c.bf16 %v3032_v16, %v3031_v62  ;;  %v3033_v32 = vld [vmem:[%s5888_s4 + $0x50] sm:$0xff]  ;;  %v6974_v62 = vld [vmem:[#allocation88_spill] sm:$0xff] }
 0xa26   :  { %2917 = vmatprep.subr.bf16.mxu0 %v6568_v5  ;;  %2958 = vmatprep.subr.bf16.mxu1 %v6483_v59  ;;  %v6968_v59 = vmov 0.0|0.0   ;;  %v3034_v5 = vld [vmem:[%s5888_s4 + $0x58] sm:$0xff] }
 0xa29   :  { %2918 = vmatpush1.bf16.msra.mxu0 %v6569_v38  ;;  %2959 = vmatpush1.bf16.msra.mxu1 %v6570_v33  ;;  %v3672_v38 = vpack.c.bf16 %v3034_v5, %v3033_v32  ;;  %v3035_v33 = vld [vmem:[%s5888_s4 + $0x60] sm:$0xff] }
 0xa2a   :  { %2919 = vmatprep.subr.bf16.mxu0 %v6486_v57  ;;  %2960 = vmatprep.subr.bf16.mxu1 %v6487_v61  ;;  %v3023_v57 = vld [vmem:[%s5888_s4] sm:$0xff]  ;;  %v3024_v61 = vld [vmem:[%s5888_s4 + $0x8] sm:$0xff]  ;;  %v3675_v3 = vpack.c.bf16 %v3036_v36, %v3035_v33 }
 0xa2d   :  { %2920 = vmatpush1.bf16.msra.mxu0 %v6488_v53  ;;  %2961 = vmatpush1.bf16.msra.mxu1 %v6402_v23  ;;  %v6957_v23 = vld [vmem:[#allocation134_spill] sm:$0xff]  ;;  %v3657_v53 = vpack.c.bf16 %v3024_v61, %v3023_v57 }
 0xa2e   :  { %2921 = vmatprep.subr.bf16.mxu0 %v6489_v37  ;;  %2962 = vmatprep.subr.bf16.mxu1 %v6490_v0  ;;  %v3026_v37 = vld [vmem:[%s5888_s4 + $0x18] sm:$0xff] }
 0xa2f   :  { %v3660_v0 = vpack.c.bf16 %v3026_v37, %v3025_v52 }
 0xa31   :  { %2922 = vmatpush1.bf16.msra.mxu0 %v6491_v8  ;;  %2963 = vmatpush1.bf16.msra.mxu1 %v6947_v22  ;;  %v3027_v8 = vld [vmem:[%s5888_s4 + $0x20] sm:$0xff] }
 0xa32   :  { %2923 = vmatprep.subr.bf16.mxu0 %v6948_v13  ;;  %2964 = vmatprep.subr.bf16.mxu1 %v6949_v6  ;;  %v3663_v14 = vpack.c.bf16 %v3028_v50, %v3027_v8  ;;  %v3129_v13 = vld [vmem:[%s5890_s6 + $0x60] sm:$0xff]  ;;  %v3130_v6 = vld [vmem:[%s5890_s6 + $0x68] sm:$0xff] }
 0xa35   :  { %2924 = vmatpush1.bf16.msra.mxu0 %v6950_v58  ;;  %2965 = vmatpush1.bf16.msra.mxu1 %v6951_v31  ;;  %v3699_v58 = vpack.c.bf16 %v3130_v6, %v3129_v13  ;;  %v3217_v13 = vld [vmem:[%s5892_s8 + $0x30] sm:$0xff]  ;;  %v3218_v6 = vld [vmem:[%s5892_s8 + $0x38] sm:$0xff] }
 0xa36   :  { %2925 = vmatprep.subr.bf16.mxu0 %v6952_v4  ;;  %2966 = vmatprep.subr.bf16.mxu1 %v6953_v47  ;;  %v6970_v47 = vld [vmem:[#allocation169_spill] sm:$0xff] }
 0xa39   :  { %2926 = vmatpush1.bf16.msra.mxu0 %v6954_v39  ;;  %2967 = vmatpush1.bf16.msra.mxu1 %v6955_v20 }
 0xa3a   :  { %2927 = vmatprep.subr.bf16.mxu0 %v6956_v9  ;;  %2968 = vmatprep.subr.bf16.mxu1 %v6957_v23  ;;  %v6971_v23 = vld [vmem:[#allocation170_spill] sm:$0xff] }
 0xa3d   :  { %2928 = vmatpush1.bf16.msra.mxu0 %v6958_v44  ;;  %2969 = vmatpush1.bf16.msra.mxu1 %v6959_v15 }
 0xa3e   :  { %2929 = vmatprep.subr.bf16.mxu0 %v6960_v45  ;;  %2970 = vmatprep.subr.bf16.mxu1 %v6961_v60 }
 0xa41   :  { %2930 = vmatpush1.bf16.msra.mxu0 %v6962_v41  ;;  %2971 = vmatpush1.bf16.msra.mxu1 %v6963_v2 }
 0xa42   :  { %2931 = vmatprep.subr.bf16.mxu0 %v6964_v35  ;;  %2972 = vmatprep.subr.bf16.mxu1 %v6965_v49  ;;  %v6972_v49 = vld [vmem:[#allocation171_spill] sm:$0xff] }
 0xa45   :  { %2932 = vmatpush1.bf16.msra.mxu0 %v6966_v51  ;;  %2973 = vmatpush1.bf16.msra.mxu1 %v6967_v34  ;;  %v6973_v34 = vld [vmem:[#allocation172_spill] sm:$0xff] }
 0xa46   :  { %3656 = vmatprep.subr.bf16.mxu0 %v6968_v59  ;;  %3680 = vmatprep.subr.bf16.mxu1 %v6968_v59 }
 0xa48   :  { %2934 = vmatmul.mubr.bf16.vlgmr.msra.gmra.mrb[76].mxu0 %v5644_v48  ;;  %2975 = vmatmul.mubr.bf16.vlgmr.msra.gmra.mrb[76].mxu1 %v5644_v48  ;;  %v3128_v48 = vld [vmem:[%s5890_s6 + $0x58] sm:$0xff] }
 0xa49   :  { %3658 = vmatpush3.bf16.msra.mxu0 %v3657_v53  ;;  %3599 = vmatprep.mubr.msk.f32.mxu0 %vm4058_vm2, %v6969_v19  ;;  %v3696_v22 = vpack.c.bf16 %v3128_v48, %v3127_v40 }
 0xa4a   :  { %3659 = vmatprep.subr.bf16.mxu0 %v6968_v59  ;;  %3634 = vmatprep.mubr.msk.f32.mxu1 %vm4058_vm2, %v6969_v19 }
 0xa4b   :  { %3682 = vmatpush3.bf16.msra.mxu1 %v3681_v10  ;;  %v3132_v10 = vld [vmem:[%s5890_s6 + $0x78] sm:$0xff] }
 0xa4c   :  { %3683 = vmatprep.subr.bf16.mxu1 %v6968_v59  ;;  %v3702_v46 = vpack.c.bf16 %v3132_v10, %v3131_v30 }
 0xa4d   :  { %3661 = vmatpush3.bf16.msra.mxu0 %v3660_v0 }
 0xa4e   :  { %3662 = vmatprep.subr.bf16.mxu0 %v6968_v59 }
 0xa4f   :  { %3685 = vmatpush3.bf16.msra.mxu1 %v3684_v55  ;;  %v3212_v55 = vld [vmem:[%s5892_s8 + $0x8] sm:$0xff] }
 0xa50   :  { %3686 = vmatprep.subr.bf16.mxu1 %v6968_v59 }
 0xa51   :  { %3664 = vmatpush3.bf16.msra.mxu0 %v3663_v14 }
 0xa52   :  { %3665 = vmatprep.subr.bf16.mxu0 %v6968_v59 }
 0xa53   :  { %3688 = vmatpush3.bf16.msra.mxu1 %v3687_v12  ;;  %v3214_v12 = vld [vmem:[%s5892_s8 + $0x18] sm:$0xff] }
 0xa54   :  { %3689 = vmatprep.subr.bf16.mxu1 %v6968_v59  ;;  %v3708_v24 = vpack.c.bf16 %v3214_v12, %v3213_v63 }
 0xa55   :  { %3667 = vmatpush3.bf16.msra.mxu0 %v3666_v29 }
 0xa56   :  { %3668 = vmatprep.subr.bf16.mxu0 %v6968_v59 }
 0xa57   :  { %3691 = vmatpush3.bf16.msra.mxu1 %v3690_v7  ;;  %v3216_v7 = vld [vmem:[%s5892_s8 + $0x28] sm:$0xff] }
 0xa58   :  { %3692 = vmatprep.subr.bf16.mxu1 %v6968_v59  ;;  %v3711_v17 = vpack.c.bf16 %v3216_v7, %v3215_v42 }
 0xa59   :  { %3670 = vmatpush3.bf16.msra.mxu0 %v3669_v27 }
 0xa5a   :  { %3671 = vmatprep.subr.bf16.mxu0 %v6968_v59 }
 0xa5b   :  { %3694 = vmatpush3.bf16.msra.mxu1 %v3693_v1 }
 0xa5c   :  { %3695 = vmatprep.subr.bf16.mxu1 %v6968_v59 }
 0xa5d   :  { %3673 = vmatpush3.bf16.msra.mxu0 %v3672_v38 }
 0xa5e   :  { %3674 = vmatprep.subr.bf16.mxu0 %v6968_v59 }
 0xa5f   :  { %3697 = vmatpush3.bf16.msra.mxu1 %v3696_v22 }
 0xa60   :  { %3698 = vmatprep.subr.bf16.mxu1 %v6968_v59 }
 0xa61   :  { %3676 = vmatpush3.bf16.msra.mxu0 %v3675_v3 }
 0xa62   :  { %3677 = vmatprep.subr.bf16.mxu0 %v6968_v59 }
 0xa63   :  { %3700 = vmatpush3.bf16.msra.mxu1 %v3699_v58  ;;  %v3714_v58 = vpack.c.bf16 %v3218_v6, %v3217_v13 }
 0xa64   :  { %3701 = vmatprep.subr.bf16.mxu1 %v6968_v59 }
 0xa65   :  { %3679 = vmatpush3.bf16.msra.mxu0 %v3678_v28 }
 0xa66   :  { %3704 = vmatprep.subr.bf16.mxu0 %v6968_v59 }
 0xa67   :  { %3703 = vmatpush3.bf16.msra.mxu1 %v3702_v46 }
 0xadb   :  { %v2853_v31 = vpop.f32.mrb[72].mxu0  ;;  %v2894_v4 = vpop.f32.mrb[72].mxu1 }
 0xadc   :  { %v2983_v39 = vadd.f32 %v2853_v31, %v6970_v47  ;;  %v2855_v20 = vpop.f32.mrb[73].mxu0  ;;  %v2896_v9 = vpop.f32.mrb[73].mxu1  ;;  %v2985_v51 = vadd.f32 %v2894_v4, %v6972_v49 }
 0xadd   :  { %v2984_v44 = vadd.f32 %v2855_v20, %v6971_v23  ;;  %v2857_v15 = vpop.f32.mrb[74].mxu0  ;;  %v2898_v45 = vpop.f32.mrb[74].mxu1  ;;  %v2986_v57 = vadd.f32 %v2896_v9, %v6973_v34  ;;  %v3522_v20 = vld [vmem:[%s5893_s9] ss:$0 sm:$0xff] }
 0xade   :  { %v3517_v60 = vmul.f32 -1.442695, %v2983_v39  ;;  %v2858_v41 = vpop.f32.mrb[75].mxu0  ;;  %v2899_v2 = vpop.f32.mrb[75].mxu1  ;;  %v3519_v61 = vmul.f32 -1.442695, %v2985_v51 }
 0xadf   :  { %v3518_v35 = vmul.f32 -1.442695, %v2984_v44 }
 0xae0   :  { %3964 = vpow2.f32 %v3517_v60 }
 0xae1   :  { %3966 = vpow2.f32 %v3518_v35 }
 0xae2   :  { %3968 = vtanh.f32 %v2986_v57 }
 0xae3   :  { %3970 = vpow2.f32 %v3519_v61 }
 0xaea   :  { %v3965_v53 = vpop.eup %3964 }
 0xaeb   :  { %v2996_v52 = vadd.f32 1.0, %v3965_v53  ;;  %v3967_v37 = vpop.eup %3966 }
 0xaec   :  { %v2997_v0 = vadd.f32 1.0, %v3967_v37  ;;  %v3969_v8 = vpop.eup %3968 }
 0xaed   :  { %3972 = vrcp.f32 %v2996_v52  ;;  %v3971_v50 = vpop.eup %3970 }
 0xaee   :  { %3974 = vrcp.f32 %v2997_v0  ;;  %v2998_v29 = vadd.f32 1.0, %v3971_v50 }
 0xaf0   :  { %3976 = vrcp.f32 %v2998_v29 }
 0xaf7   :  { %v3973_v14 = vpop.eup %3972 }
 0xaf8   :  { %v3007_v56 = vmul.f32 %v3973_v14, %v3969_v8  ;;  %v3975_v25 = vpop.eup %3974 }
 0xaf9   :  { %v3006_v16 = vmul.f32 %v3975_v25, %v6974_v62 }
 0xafa   :  { %v3977_v32 = vpop.eup %3976 }
 0xafb   :  { %v3008_v27 = vadd.f32 %v3007_v56, %v3006_v16 }
 0xafd   :  { %3978 = vtanh.f32 %v3008_v27 }
 0xb07   :  { %v3979_v5 = vpop.eup %3978 }
 0xb08   :  { %v3010_v38 = vmul.f32 %v3979_v5, %v3977_v32 }
 0xb0a   :  { %3600 = vmatmul.mubr.f32.vlgmr.msra.gmra.mrb[80].mxu0 %v3010_v38 }
 0xb0b   :  { %3653 = vmatprep.mubr.msk.f32.mxu0 %vm4058_vm2, %v6969_v19  ;;  %v3211_v19 = vld [vmem:[%s5892_s8] sm:$0xff]  ;;  %s4024_s8 = scalar_lea.vmem %s3308_s22, 128 }
 0xb0c   :  { %v3705_v43 = vpack.c.bf16 %v3212_v55, %v3211_v19  ;;  %p4025_p2 = scmp.ne.s32.totalorder %s3308_s22, %s4024_s8  ;;  %p4030_p4 = scmp.lt.s32.totalorder %s4024_s8, %s4024_s8 }
 0xb0e   :  { %3706 = vmatpush3.bf16.msra.mxu0 %v3705_v43  ;;  %p4031_p5 = por %p4030_p4, %p4029_p3 }
 0xb0f   :  { %3707 = vmatprep.subr.bf16.mxu0 %v6968_v59 }
 0xb10   :  { %p4032_p6 = pnand %p4031_p5, %p4025_p2 }
 0xb12   :  { %3709 = vmatpush3.bf16.msra.mxu0 %v3708_v24 }
 0xb13   :  { %3710 = vmatprep.subr.bf16.mxu0 %v6968_v59 }
 0xb16   :  { %3712 = vmatpush3.bf16.msra.mxu0 %v3711_v17 }
 0xb17   :  { %3713 = vmatprep.subr.bf16.mxu0 %v6968_v59  ;;  %v3521_v59 = vld [vmem:[%s5891_s7] ss:$0 sm:$0xff] }
 0xb1a   :  { %3715 = vmatpush3.bf16.msra.mxu0 %v3714_v58 }
 0xb1b   :  { %v2935_v33 = vpop.f32.mrb[76].mxu0  ;;  %v2976_v36 = vpop.f32.mrb[76].mxu1 }
 0xb1c   :  { %v2937_v3 = vpop.f32.mrb[77].mxu0  ;;  %v2978_v18 = vpop.f32.mrb[77].mxu1 }
 0xb1d   :  { %v2939_v11 = vpop.f32.mrb[78].mxu0  ;;  %v2980_v28 = vpop.f32.mrb[78].mxu1 }
 0xb1e   :  { %v2940_v21 = vpop.f32.mrb[79].mxu0  ;;  %v2981_v26 = vpop.f32.mrb[79].mxu1 }
 0xbdd   :  { %v3112_v1 = vpop.f32.mrb[80].mxu0 }
 0xbde   :  { %v3113_v40 = vadd.f32 %v3520_v54, %v3112_v1  ;;  %v3601_v48 = vpop.f32.mrb[81].mxu0 }
 0xbe0   :  { %v3116_v22 = vmax.f32 %v3113_v40, 0.0 }
 0xbe2   :  { %3635 = vmatmul.mubr.f32.vlgmr.msra.gmra.mrb[80].mxu1 %v3116_v22 }
 0xcb5   :  { %v3206_v31 = vpop.f32.mrb[80].mxu1 }
 0xcb6   :  { %v3207_v4 = vadd.f32 %v3521_v59, %v3206_v31  ;;  %v3636_v47 = vpop.f32.mrb[81].mxu1 }
 0xcb8   :  { %v3210_v39 = vmax.f32 %v3207_v4, 0.0 }
 0xcba   :  { %3654 = vmatmul.mubr.msk.f32.vlgmr.msra.gmra.mrb[82].mxu0 %vm3226_vm3, %v3210_v39 }
 0xd8d   :  { %v3296_v9 = vpop.f32.mrb[82].mxu0 }
 0xd8e   :  { %v3297_v23 = vadd.f32 %v3522_v20, %v3296_v9  ;;  %v3655_v44 = vpop.f32.mrb[83].mxu0 }
 0xd90   :  { %3300 = vst.msk [vmem:[#allocation13] sm:$0xff] %vm3226_vm3, %v3297_v23 }
 0xd91   :  { %4035 = shalt.err (!%p4032_p6)
}
 0xd92   :  { %s4036_s24 = scalar_lea.hbm %s5894_s10, 128 }
 0xd93   :  { %p4037_p7 = scmp.ne.s32.totalorder %s5894_s10, %s4036_s24  ;;  %p4040_p8 = scmp.lt.u32.totalorder %s4036_s24, %s5894_s10 }
 0xd95   :  { %p4042_p9 = pnand %p4040_p8, %p4037_p7 }
 0xd97   :  { %4045 = shalt.err (!%p4042_p9)
}
 0xd98   :  { %3310 = dma.vmem_to_hbm [thread:$0]  %s3308_s22, 128, %s5894_s10, [#allocation10]  }
 0xd99   :  { %4050 = dma.done.wait [#allocation10], 128  }
 0xd9a   :  { %4051 = vsyncadd [#allocation10], 4294967168 }
 0xd9b   :  { %3314 = vsyncpa [#allocation9], 1 }
 0xd9c   :  { %3315 = vsyncpa [#allocation12], 1 }
 0xd9d   :  { %3316 = vsyncpa [#allocation10], 1 }

</bundles_post_ra>
